<compile_context>
chip_gen: v6e
topology: v6e:2x2x1
jax: 0.10.0
libtpu: 0.0.40
codegen_flags: <defaults>
</compile_context>

<pallas_src>
import math
import functools

import jax
import jax.numpy as jnp
from jax import lax
from jax.experimental import pallas as pl
from jax.experimental.pallas import tpu as pltpu


def _cspec(shape):
    # whole-array block, constant block index (grid=(1,))
    return pl.BlockSpec(shape, lambda *_: (0,) * len(shape))


def _layer_norm(x, g, b, eps=1e-5):
    mu = jnp.mean(x, axis=-1, keepdims=True)
    xc = x - mu
    var = jnp.mean(xc * xc, axis=-1, keepdims=True)
    return xc * lax.rsqrt(var + eps) * g + b


# --------------------------------------------------------------------------
# Fused kernel: embedding*sqrt(d_model) + PE row + encoder stack + LSTM
#               + eval-BatchNorm scale + last-row select + decoder linear.
# --------------------------------------------------------------------------
def _fused_kernel(x_ref, embw_ref, embb_ref, pe_ref,
                  wqkv_ref, bqkv_ref, wo_ref, bo_ref,
                  g1_ref, be1_ref, w1_ref, b1_ref,
                  w2_ref, b2_ref, g2_ref, be2_ref,
                  *rest, nhead, nlayers, n_lstm, emb_scale, bn_scale):
    lstm_refs = rest[:3 * n_lstm]
    wdec_ref = rest[3 * n_lstm]
    bdec_ref = rest[3 * n_lstm + 1]
    o_ref = rest[3 * n_lstm + 2]

    B, S, In = x_ref.shape
    D = embw_ref.shape[1]
    hd = D // nhead
    BS = B * S
    att_scale = 1.0 / math.sqrt(hd)

    # ---- input embedding (one dense (B*S, In)@(In, D) matmul) + scale + PE row
    x_in = x_ref[...].reshape(BS, In).astype(jnp.bfloat16)
    x = (jnp.dot(x_in, embw_ref[...], preferred_element_type=jnp.float32)
         + embb_ref[...]) * emb_scale + pe_ref[...]            # (BS, D) f32

    # ---- transformer encoder stack (post-norm), static unroll (nlayers small)
    for l in range(nlayers):
        xb = x.astype(jnp.bfloat16)
        # fused QKV projection: one (BS, D)@(D, 3D) matmul
        qkv = (jnp.dot(xb, wqkv_ref[l], preferred_element_type=jnp.float32)
               + bqkv_ref[l])                                  # (BS, 3D) f32
        qkv_b = qkv.astype(jnp.bfloat16)
        wo_l = wo_ref[l]                                       # (D, D) bf16

        attn = jnp.zeros((BS, D), jnp.float32)
        for h in range(nhead):
            # batch-batched attention per head: (B, S, hd) tensors, 3-D einsums
            q_h = qkv_b[:, h * hd:(h + 1) * hd].reshape(B, S, hd)
            k_h = qkv_b[:, D + h * hd:D + (h + 1) * hd].reshape(B, S, hd)
            v_h = qkv_b[:, 2 * D + h * hd:2 * D + (h + 1) * hd].reshape(B, S, hd)
            s = jnp.einsum('bqd,bkd->bqk', q_h, k_h,
                           preferred_element_type=jnp.float32) * att_scale
            s = s - jnp.max(s, axis=-1, keepdims=True)
            p = jnp.exp(s)
            p = p / jnp.sum(p, axis=-1, keepdims=True)         # exact softmax
            ctx_h = jnp.einsum('bqk,bkd->bqd', p.astype(jnp.bfloat16), v_h,
                               preferred_element_type=jnp.float32)  # (B,S,hd)
            # per-head out-projection accumulation (replaces the lane concat)
            attn = attn + jnp.dot(ctx_h.reshape(BS, hd).astype(jnp.bfloat16),
                                  wo_l[h * hd:(h + 1) * hd, :],
                                  preferred_element_type=jnp.float32)
        attn = attn + bo_ref[l]
        x = _layer_norm(x + attn, g1_ref[l], be1_ref[l])

        # FFN (lane-dense hidden width = 4D)
        hid = jnp.maximum(
            jnp.dot(x.astype(jnp.bfloat16), w1_ref[l],
                    preferred_element_type=jnp.float32) + b1_ref[l], 0.0)
        ffo = (jnp.dot(hid.astype(jnp.bfloat16), w2_ref[l],
                       preferred_element_type=jnp.float32) + b2_ref[l])
        x = _layer_norm(x + ffo, g2_ref[l], be2_ref[l])

    # ---- nn.LSTM quirk: batch_first=False, so the (B, S, D) encoder output is
    #      consumed as (time=B, batch=S, feature=D); rows of x are already
    #      ordered [t0 rows..., t1 rows...].
    T, N = B, S
    seq2d = x                                                   # (T*N, D) f32
    outs = []
    for l in range(n_lstm):
        wih = lstm_refs[3 * l][...]                             # (Din, 4H) bf16
        whh = lstm_refs[3 * l + 1][...]                         # (H, 4H)   bf16
        bias = lstm_refs[3 * l + 2][...]                        # (1, 4H)   f32
        H = whh.shape[0]
        # hoisted input->hidden matmul: one (T*N, Din)@(Din, 4H) dot
        gates_x = (jnp.dot(seq2d.astype(jnp.bfloat16), wih,
                           preferred_element_type=jnp.float32) + bias)  # (T*N,4H)
        h = jnp.zeros((N, H), jnp.float32)
        c = jnp.zeros((N, H), jnp.float32)
        outs = []
        for t in range(T):            # T == batch size (tiny); inherently serial
            gates = (gates_x[t * N:(t + 1) * N, :]
                     + jnp.dot(h.astype(jnp.bfloat16), whh,
                               preferred_element_type=jnp.float32))     # (N, 4H)
            i_g = jax.nn.sigmoid(gates[:, 0 * H:1 * H])
            f_g = jax.nn.sigmoid(gates[:, 1 * H:2 * H])
            g_g = jnp.tanh(gates[:, 2 * H:3 * H])
            o_g = jax.nn.sigmoid(gates[:, 3 * H:4 * H])
            c = f_g * c + i_g * g_g
            h = o_g * jnp.tanh(c)
            outs.append(h)
        seq2d = jnp.concatenate(outs, axis=0)                   # (T*N, H) next layer

    # lstm_out[:, -1, :]  ==  hidden of LSTM-"batch" row N-1 at each timestep t
    last = jnp.concatenate([outs[t][N - 1:N, :] for t in range(T)], axis=0)  # (T,H)
    # eval-mode BatchNorm1d with default running stats / identity affine is a
    # pure scale, so applying it after the row selection is equivalent.
    # TODO(synk): trained/loaded BatchNorm running stats or affine params are
    #   not represented here (module is assumed freshly constructed, eval mode).
    last = last * bn_scale
    o_ref[...] = (jnp.dot(last.astype(jnp.bfloat16), wdec_ref[...],
                          preferred_element_type=jnp.float32) + bdec_ref[...])


def fused_forward(x, pe_row, packed, *, nhead, emb_scale, norm_flag):
    B, S, In = x.shape
    enc = packed["enc"]
    L, D, threeD = enc["wqkv"].shape
    ff = enc["w1"].shape[2]
    lstm = packed["lstm"]
    n_lstm = len(lstm)
    out_size = packed["dec_wT"].shape[1]

    bn_scale = 1.0 / math.sqrt(1.0 + 1e-5) if norm_flag == "batch" else 1.0
    # TODO(synk): norm_flag == 'instance' (InstanceNorm1d on a 2-D view) raises
    #   in PyTorch; not reproduced here.

    in_specs = [
        _cspec((B, S, In)),
        _cspec((In, D)), _cspec((1, D)), _cspec((1, D)),         # emb_wT, emb_b, pe
        _cspec((L, D, threeD)), _cspec((L, 1, threeD)),          # fused QKV
        _cspec((L, D, D)), _cspec((L, 1, D)),                    # out-proj
        _cspec((L, 1, D)), _cspec((L, 1, D)),                    # LN1
        _cspec((L, D, ff)), _cspec((L, 1, ff)),                  # FFN W1
        _cspec((L, ff, D)), _cspec((L, 1, D)),                   # FFN W2
        _cspec((L, 1, D)), _cspec((L, 1, D)),                    # LN2
    ]
    args = [x, packed["emb_wT"], packed["emb_b"], pe_row,
            enc["wqkv"], enc["bqkv"], enc["wo"], enc["bo"],
            enc["g1"], enc["be1"], enc["w1"], enc["b1"],
            enc["w2"], enc["b2"], enc["g2"], enc["be2"]]
    for lp in lstm:
        in_specs += [_cspec(lp["wih"].shape), _cspec(lp["whh"].shape),
                     _cspec(lp["b"].shape)]
        args += [lp["wih"], lp["whh"], lp["b"]]
    in_specs += [_cspec(packed["dec_wT"].shape), _cspec(packed["dec_b"].shape)]
    args += [packed["dec_wT"], packed["dec_b"]]

    kernel = functools.partial(_fused_kernel, nhead=nhead, nlayers=L,
                               n_lstm=n_lstm, emb_scale=float(emb_scale),
                               bn_scale=float(bn_scale))
    return pl.pallas_call(
        kernel,
        out_shape=jax.ShapeDtypeStruct((B, out_size), jnp.float32),
        grid=(1,),
        in_specs=in_specs,
        out_specs=_cspec((B, out_size)),
        compiler_params=pltpu.CompilerParams(
            dimension_semantics=("arbitrary",),
            vmem_limit_bytes=32 * 1024 * 1024),
    )(*args)


# --------------------------------------------------------------------------
# Positional encoding (reproduces the module's quirk: `pe[:, seq_len, :]`
# is a SINGLE row at position == seq_len, broadcast over all positions).
# --------------------------------------------------------------------------
def positional_row(seq_len, d_model):
    position = float(seq_len)
    div_term = jnp.exp(jnp.arange(0, d_model, 2, dtype=jnp.float32)
                       * (-math.log(10000.0) / d_model))
    row = jnp.zeros((d_model,), jnp.float32)
    row = row.at[0::2].set(jnp.sin(position * div_term))
    row = row.at[1::2].set(jnp.cos(position * div_term))
    return row


# --------------------------------------------------------------------------
# One-time parameter packing: transposes, gate packing, bf16 weight casts
# (nothing is repacked inside forward()).
# --------------------------------------------------------------------------
def pack_params(raw):
    bf = jnp.bfloat16
    packed = {
        "emb_wT": jnp.transpose(raw["emb_w"]).astype(bf),        # (In, D)
        "emb_b": raw["emb_b"].reshape(1, -1),
        "dec_wT": jnp.transpose(raw["dec_w"]).astype(bf),        # (H, out)
        "dec_b": raw["dec_b"].reshape(1, -1),
    }
    cols = {k: [] for k in ("wqkv", "bqkv", "wo", "bo", "g1", "be1",
                            "w1", "b1", "w2", "b2", "g2", "be2")}
    for lyr in raw["enc_layers"]:
        cols["wqkv"].append(jnp.transpose(lyr["in_proj_w"]).astype(bf))  # (D,3D)
        cols["bqkv"].append(lyr["in_proj_b"].reshape(1, -1))
        cols["wo"].append(jnp.transpose(lyr["out_proj_w"]).astype(bf))   # (D,D)
        cols["bo"].append(lyr["out_proj_b"].reshape(1, -1))
        cols["g1"].append(lyr["ln1_g"].reshape(1, -1))
        cols["be1"].append(lyr["ln1_b"].reshape(1, -1))
        cols["w1"].append(jnp.transpose(lyr["ffn_w1"]).astype(bf))       # (D,4D)
        cols["b1"].append(lyr["ffn_b1"].reshape(1, -1))
        cols["w2"].append(jnp.transpose(lyr["ffn_w2"]).astype(bf))       # (4D,D)
        cols["b2"].append(lyr["ffn_b2"].reshape(1, -1))
        cols["g2"].append(lyr["ln2_g"].reshape(1, -1))
        cols["be2"].append(lyr["ln2_b"].reshape(1, -1))
    packed["enc"] = {k: jnp.stack(v) for k, v in cols.items()}

    packed["lstm"] = []
    for lw in raw["lstm"]:
        packed["lstm"].append({
            "wih": jnp.transpose(lw["w_ih"]).astype(bf),         # (Din, 4H), i|f|g|o
            "whh": jnp.transpose(lw["w_hh"]).astype(bf),         # (H, 4H)
            "b": (lw["b_ih"] + lw["b_hh"]).reshape(1, -1),       # (1, 4H), pre-summed
        })
    return packed


# --------------------------------------------------------------------------
# Parameter init (deterministic, synthetic, torch layouts)
# --------------------------------------------------------------------------
def init_params(key, input_size, output_size, d_model, nhead,
                num_enc_layers, lstm_hidden, lstm_layers):
    def nrm(k, shape, s=0.05):
        return s * jax.random.normal(k, shape, jnp.float32)

    keys = iter(jax.random.split(key, 8 + 12 * num_enc_layers + 4 * lstm_layers))
    D, ff = d_model, 4 * d_model
    params = {
        "emb_w": nrm(next(keys), (D, input_size)),
        "emb_b": nrm(next(keys), (D,), 0.01),
        "dec_w": nrm(next(keys), (output_size, lstm_hidden)),
        "dec_b": nrm(next(keys), (output_size,), 0.01),
        "enc_layers": [],
        "lstm": [],
    }
    for _ in range(num_enc_layers):
        params["enc_layers"].append({
            "in_proj_w": nrm(next(keys), (3 * D, D)),
            "in_proj_b": nrm(next(keys), (3 * D,), 0.01),
            "out_proj_w": nrm(next(keys), (D, D)),
            "out_proj_b": nrm(next(keys), (D,), 0.01),
            "ln1_g": jnp.ones((D,), jnp.float32),
            "ln1_b": jnp.zeros((D,), jnp.float32),
            "ffn_w1": nrm(next(keys), (ff, D)),
            "ffn_b1": nrm(next(keys), (ff,), 0.01),
            "ffn_w2": nrm(next(keys), (D, ff)),
            "ffn_b2": nrm(next(keys), (D,), 0.01),
            "ln2_g": jnp.ones((D,), jnp.float32),
            "ln2_b": jnp.zeros((D,), jnp.float32),
        })
    for l in range(lstm_layers):
        din = D if l == 0 else lstm_hidden
        params["lstm"].append({
            "w_ih": nrm(next(keys), (4 * lstm_hidden, din)),
            "w_hh": nrm(next(keys), (4 * lstm_hidden, lstm_hidden)),
            "b_ih": nrm(next(keys), (4 * lstm_hidden,), 0.01),
            "b_hh": nrm(next(keys), (4 * lstm_hidden,), 0.01),
        })
    return params


# --------------------------------------------------------------------------
# Full forward pass (matches TransformerEncoderOnly.forward, eval mode)
# --------------------------------------------------------------------------
def forward(packed, x, *, d_model, nhead, norm_flag="batch"):
    B, S, In = x.shape
    pe_row = positional_row(S, d_model).reshape(1, d_model)
    return fused_forward(x, pe_row, packed, nhead=nhead,
                         emb_scale=math.sqrt(d_model), norm_flag=norm_flag)


if __name__ == "__main__":
    B, S = 2, 8
    input_size, output_size = 16, 4
    d_model, nhead, num_enc_layers = 32, 4, 2
    lstm_hidden, lstm_layers = 32, 1

    key = jax.random.PRNGKey(0)
    kx, kp = jax.random.split(key)
    x = jax.random.normal(kx, (B, S, input_size), jnp.float32)
    raw = init_params(kp, input_size, output_size, d_model, nhead,
                      num_enc_layers, lstm_hidden, lstm_layers)
    packed = pack_params(raw)   # one-time weight packing (transposes, bf16 cast)

    fwd = jax.jit(functools.partial(forward, d_model=d_model, nhead=nhead,
                                    norm_flag="batch"))
    out = fwd(packed, x)
    out = jax.block_until_ready(out)
    assert out.shape == (B, output_size) and out.dtype == jnp.float32
    assert bool(jnp.all(jnp.isfinite(out)))
    print("KERNEL_OK")
</pallas_src>

<mosaic_0001>
module attributes {stable_mosaic.version = 11 : i64} {
  func.func @_fused_kernel(%arg0: i32, %arg1: memref<2x8x16xf32, #tpu.memory_space<vmem>>, %arg2: memref<16x32xbf16, #tpu.memory_space<vmem>>, %arg3: memref<1x32xf32, #tpu.memory_space<vmem>>, %arg4: memref<1x32xf32, #tpu.memory_space<vmem>>, %arg5: memref<2x32x96xbf16, #tpu.memory_space<vmem>>, %arg6: memref<2x1x96xf32, #tpu.memory_space<vmem>>, %arg7: memref<2x32x32xbf16, #tpu.memory_space<vmem>>, %arg8: memref<2x1x32xf32, #tpu.memory_space<vmem>>, %arg9: memref<2x1x32xf32, #tpu.memory_space<vmem>>, %arg10: memref<2x1x32xf32, #tpu.memory_space<vmem>>, %arg11: memref<2x32x128xbf16, #tpu.memory_space<vmem>>, %arg12: memref<2x1x128xf32, #tpu.memory_space<vmem>>, %arg13: memref<2x128x32xbf16, #tpu.memory_space<vmem>>, %arg14: memref<2x1x32xf32, #tpu.memory_space<vmem>>, %arg15: memref<2x1x32xf32, #tpu.memory_space<vmem>>, %arg16: memref<2x1x32xf32, #tpu.memory_space<vmem>>, %arg17: memref<32x128xbf16, #tpu.memory_space<vmem>>, %arg18: memref<32x128xbf16, #tpu.memory_space<vmem>>, %arg19: memref<1x128xf32, #tpu.memory_space<vmem>>, %arg20: memref<32x4xbf16, #tpu.memory_space<vmem>>, %arg21: memref<1x4xf32, #tpu.memory_space<vmem>>, %arg22: memref<2x4xf32, #tpu.memory_space<vmem>>) attributes {dimension_semantics = [#tpu.dimension_semantics<arbitrary>], iteration_bounds = array<i64: 1>, scalar_prefetch = 0 : i64, scratch_operands = 0 : i64, tpu.core_type = #tpu.core_type<tc>, window_params = [{pipeline_mode = #tpu.pipeline_mode<synchronous>, transform_indices = @transform_0, window_bounds = array<i64: 2, 8, 16>}, {pipeline_mode = #tpu.pipeline_mode<synchronous>, transform_indices = @transform_1, window_bounds = array<i64: 16, 32>}, {pipeline_mode = #tpu.pipeline_mode<synchronous>, transform_indices = @transform_2, window_bounds = array<i64: 1, 32>}, {pipeline_mode = #tpu.pipeline_mode<synchronous>, transform_indices = @transform_3, window_bounds = array<i64: 1, 32>}, {pipeline_mode = #tpu.pipeline_mode<synchronous>, transform_indices = @transform_4, window_bounds = array<i64: 2, 32, 96>}, {pipeline_mode = #tpu.pipeline_mode<synchronous>, transform_indices = @transform_5, window_bounds = array<i64: 2, 1, 96>}, {pipeline_mode = #tpu.pipeline_mode<synchronous>, transform_indices = @transform_6, window_bounds = array<i64: 2, 32, 32>}, {pipeline_mode = #tpu.pipeline_mode<synchronous>, transform_indices = @transform_7, window_bounds = array<i64: 2, 1, 32>}, {pipeline_mode = #tpu.pipeline_mode<synchronous>, transform_indices = @transform_8, window_bounds = array<i64: 2, 1, 32>}, {pipeline_mode = #tpu.pipeline_mode<synchronous>, transform_indices = @transform_9, window_bounds = array<i64: 2, 1, 32>}, {pipeline_mode = #tpu.pipeline_mode<synchronous>, transform_indices = @transform_10, window_bounds = array<i64: 2, 32, 128>}, {pipeline_mode = #tpu.pipeline_mode<synchronous>, transform_indices = @transform_11, window_bounds = array<i64: 2, 1, 128>}, {pipeline_mode = #tpu.pipeline_mode<synchronous>, transform_indices = @transform_12, window_bounds = array<i64: 2, 128, 32>}, {pipeline_mode = #tpu.pipeline_mode<synchronous>, transform_indices = @transform_13, window_bounds = array<i64: 2, 1, 32>}, {pipeline_mode = #tpu.pipeline_mode<synchronous>, transform_indices = @transform_14, window_bounds = array<i64: 2, 1, 32>}, {pipeline_mode = #tpu.pipeline_mode<synchronous>, transform_indices = @transform_15, window_bounds = array<i64: 2, 1, 32>}, {pipeline_mode = #tpu.pipeline_mode<synchronous>, transform_indices = @transform_16, window_bounds = array<i64: 32, 128>}, {pipeline_mode = #tpu.pipeline_mode<synchronous>, transform_indices = @transform_17, window_bounds = array<i64: 32, 128>}, {pipeline_mode = #tpu.pipeline_mode<synchronous>, transform_indices = @transform_18, window_bounds = array<i64: 1, 128>}, {pipeline_mode = #tpu.pipeline_mode<synchronous>, transform_indices = @transform_19, window_bounds = array<i64: 32, 4>}, {pipeline_mode = #tpu.pipeline_mode<synchronous>, transform_indices = @transform_20, window_bounds = array<i64: 1, 4>}, {pipeline_mode = #tpu.pipeline_mode<synchronous>, transform_indices = @transform_21, window_bounds = array<i64: 2, 4>}]} {
    %c0 = arith.constant 0 : index
    %c0_0 = arith.constant 0 : index
    %c0_1 = arith.constant 0 : index
    %0 = vector.load %arg1[%c0, %c0_0, %c0_1] : memref<2x8x16xf32, #tpu.memory_space<vmem>>, vector<2x8x16xf32>
    %1 = vector.shape_cast %0 : vector<2x8x16xf32> to vector<16x16xf32>
    %2 = arith.truncf %1 : vector<16x16xf32> to vector<16x16xbf16>
    %c0_2 = arith.constant 0 : index
    %c0_3 = arith.constant 0 : index
    %3 = vector.load %arg2[%c0_2, %c0_3] : memref<16x32xbf16, #tpu.memory_space<vmem>>, vector<16x32xbf16>
    %cst = arith.constant dense<0.000000e+00> : vector<16x32xf32>
    %4 = tpu.matmul %2, %3, %cst {dimension_numbers = #tpu.dot_dimension_numbers<[1], [0], [0], [1], [0, 0, 1, 1], [], []>} : vector<16x16xbf16>, vector<16x32xbf16>, vector<16x32xf32> -> vector<16x32xf32>
    %c0_4 = arith.constant 0 : index
    %c0_5 = arith.constant 0 : index
    %5 = vector.load %arg3[%c0_4, %c0_5] : memref<1x32xf32, #tpu.memory_space<vmem>>, vector<1x32xf32>
    %6 = vector.broadcast %5 : vector<1x32xf32> to vector<16x32xf32>
    %7 = arith.addf %4, %6 : vector<16x32xf32>
    %cst_6 = arith.constant 5.65685415 : f32
    %8 = vector.broadcast %cst_6 : f32 to vector<16x32xf32>
    %9 = arith.mulf %7, %8 : vector<16x32xf32>
    %c0_7 = arith.constant 0 : index
    %c0_8 = arith.constant 0 : index
    %10 = vector.load %arg4[%c0_7, %c0_8] : memref<1x32xf32, #tpu.memory_space<vmem>>, vector<1x32xf32>
    %11 = vector.broadcast %10 : vector<1x32xf32> to vector<16x32xf32>
    %12 = arith.addf %9, %11 : vector<16x32xf32>
    %13 = arith.truncf %12 : vector<16x32xf32> to vector<16x32xbf16>
    %c0_9 = arith.constant 0 : index
    %c0_10 = arith.constant 0 : index
    %c0_11 = arith.constant 0 : index
    %14 = vector.load %arg5[%c0_9, %c0_10, %c0_11] : memref<2x32x96xbf16, #tpu.memory_space<vmem>>, vector<1x32x96xbf16>
    %15 = vector.shape_cast %14 : vector<1x32x96xbf16> to vector<32x96xbf16>
    %cst_12 = arith.constant dense<0.000000e+00> : vector<16x96xf32>
    %16 = tpu.matmul %13, %15, %cst_12 {dimension_numbers = #tpu.dot_dimension_numbers<[1], [0], [0], [1], [0, 0, 1, 1], [], []>} : vector<16x32xbf16>, vector<32x96xbf16>, vector<16x96xf32> -> vector<16x96xf32>
    %c0_13 = arith.constant 0 : index
    %c0_14 = arith.constant 0 : index
    %c0_15 = arith.constant 0 : index
    %17 = vector.load %arg6[%c0_13, %c0_14, %c0_15] : memref<2x1x96xf32, #tpu.memory_space<vmem>>, vector<1x1x96xf32>
    %18 = vector.shape_cast %17 : vector<1x1x96xf32> to vector<1x96xf32>
    %19 = vector.broadcast %18 : vector<1x96xf32> to vector<16x96xf32>
    %20 = arith.addf %16, %19 : vector<16x96xf32>
    %21 = arith.truncf %20 : vector<16x96xf32> to vector<16x96xbf16>
    %c0_16 = arith.constant 0 : index
    %c0_17 = arith.constant 0 : index
    %c0_18 = arith.constant 0 : index
    %22 = vector.load %arg7[%c0_16, %c0_17, %c0_18] : memref<2x32x32xbf16, #tpu.memory_space<vmem>>, vector<1x32x32xbf16>
    %23 = vector.shape_cast %22 : vector<1x32x32xbf16> to vector<32x32xbf16>
    %cst_19 = arith.constant 0.000000e+00 : f32
    %24 = vector.broadcast %cst_19 : f32 to vector<16x32xf32>
    %25 = vector.extract_strided_slice %21 {offsets = [0, 0], sizes = [16, 8], strides = [1, 1]} : vector<16x96xbf16> to vector<16x8xbf16>
    %26 = vector.shape_cast %25 : vector<16x8xbf16> to vector<2x8x8xbf16>
    %27 = vector.extract_strided_slice %21 {offsets = [0, 32], sizes = [16, 8], strides = [1, 1]} : vector<16x96xbf16> to vector<16x8xbf16>
    %28 = vector.shape_cast %27 : vector<16x8xbf16> to vector<2x8x8xbf16>
    %29 = vector.extract_strided_slice %21 {offsets = [0, 64], sizes = [16, 8], strides = [1, 1]} : vector<16x96xbf16> to vector<16x8xbf16>
    %30 = vector.shape_cast %29 : vector<16x8xbf16> to vector<2x8x8xbf16>
    "tpu.trace_start"() <{level = 10 : i32, message = "bqd,bkd->bqk"}> : () -> ()
    %cst_20 = arith.constant dense<0.000000e+00> : vector<2x8x8xf32>
    %31 = tpu.matmul %26, %28, %cst_20 {dimension_numbers = #tpu.dot_dimension_numbers<[2], [2], [1], [1], [0, 0, 0, 1, 1, 1], [0], [0]>} : vector<2x8x8xbf16>, vector<2x8x8xbf16>, vector<2x8x8xf32> -> vector<2x8x8xf32>
    "tpu.trace_stop"() : () -> ()
    %cst_21 = arith.constant 0.353553385 : f32
    %32 = vector.broadcast %cst_21 : f32 to vector<2x8x8xf32>
    %33 = arith.mulf %31, %32 : vector<2x8x8xf32>
    %cst_22 = arith.constant dense<0xFF800000> : vector<2x8xf32>
    %34 = vector.multi_reduction <maximumf>, %33, %cst_22 [2] : vector<2x8x8xf32> to vector<2x8xf32>
    %35 = vector.shape_cast %34 : vector<2x8xf32> to vector<2x8x1xf32>
    %36 = vector.broadcast %35 : vector<2x8x1xf32> to vector<2x8x8xf32>
    %37 = arith.subf %33, %36 : vector<2x8x8xf32>
    %38 = math.exp %37 : vector<2x8x8xf32>
    %cst_23 = arith.constant dense<0.000000e+00> : vector<2x8xf32>
    %39 = vector.multi_reduction <add>, %38, %cst_23 [2] : vector<2x8x8xf32> to vector<2x8xf32>
    %40 = vector.shape_cast %39 : vector<2x8xf32> to vector<2x8x1xf32>
    %41 = vector.broadcast %40 : vector<2x8x1xf32> to vector<2x8x8xf32>
    %42 = arith.divf %38, %41 : vector<2x8x8xf32>
    %43 = arith.truncf %42 : vector<2x8x8xf32> to vector<2x8x8xbf16>
    "tpu.trace_start"() <{level = 10 : i32, message = "bqk,bkd->bqd"}> : () -> ()
    %cst_24 = arith.constant dense<0.000000e+00> : vector<2x8x8xf32>
    %44 = tpu.matmul %43, %30, %cst_24 {dimension_numbers = #tpu.dot_dimension_numbers<[2], [1], [1], [2], [0, 0, 0, 1, 1, 2], [0], [0]>} : vector<2x8x8xbf16>, vector<2x8x8xbf16>, vector<2x8x8xf32> -> vector<2x8x8xf32>
    "tpu.trace_stop"() : () -> ()
    %45 = vector.shape_cast %44 : vector<2x8x8xf32> to vector<16x8xf32>
    %46 = arith.truncf %45 : vector<16x8xf32> to vector<16x8xbf16>
    %47 = vector.extract_strided_slice %23 {offsets = [0, 0], sizes = [8, 32], strides = [1, 1]} : vector<32x32xbf16> to vector<8x32xbf16>
    %cst_25 = arith.constant dense<0.000000e+00> : vector<16x32xf32>
    %48 = tpu.matmul %46, %47, %cst_25 {dimension_numbers = #tpu.dot_dimension_numbers<[1], [0], [0], [1], [0, 0, 1, 1], [], []>} : vector<16x8xbf16>, vector<8x32xbf16>, vector<16x32xf32> -> vector<16x32xf32>
    %49 = arith.addf %24, %48 : vector<16x32xf32>
    %50 = vector.extract_strided_slice %21 {offsets = [0, 8], sizes = [16, 8], strides = [1, 1]} : vector<16x96xbf16> to vector<16x8xbf16>
    %51 = vector.shape_cast %50 : vector<16x8xbf16> to vector<2x8x8xbf16>
    %52 = vector.extract_strided_slice %21 {offsets = [0, 40], sizes = [16, 8], strides = [1, 1]} : vector<16x96xbf16> to vector<16x8xbf16>
    %53 = vector.shape_cast %52 : vector<16x8xbf16> to vector<2x8x8xbf16>
    %54 = vector.extract_strided_slice %21 {offsets = [0, 72], sizes = [16, 8], strides = [1, 1]} : vector<16x96xbf16> to vector<16x8xbf16>
    %55 = vector.shape_cast %54 : vector<16x8xbf16> to vector<2x8x8xbf16>
    "tpu.trace_start"() <{level = 10 : i32, message = "bqd,bkd->bqk"}> : () -> ()
    %cst_26 = arith.constant dense<0.000000e+00> : vector<2x8x8xf32>
    %56 = tpu.matmul %51, %53, %cst_26 {dimension_numbers = #tpu.dot_dimension_numbers<[2], [2], [1], [1], [0, 0, 0, 1, 1, 1], [0], [0]>} : vector<2x8x8xbf16>, vector<2x8x8xbf16>, vector<2x8x8xf32> -> vector<2x8x8xf32>
    "tpu.trace_stop"() : () -> ()
    %cst_27 = arith.constant 0.353553385 : f32
    %57 = vector.broadcast %cst_27 : f32 to vector<2x8x8xf32>
    %58 = arith.mulf %56, %57 : vector<2x8x8xf32>
    %cst_28 = arith.constant dense<0xFF800000> : vector<2x8xf32>
    %59 = vector.multi_reduction <maximumf>, %58, %cst_28 [2] : vector<2x8x8xf32> to vector<2x8xf32>
    %60 = vector.shape_cast %59 : vector<2x8xf32> to vector<2x8x1xf32>
    %61 = vector.broadcast %60 : vector<2x8x1xf32> to vector<2x8x8xf32>
    %62 = arith.subf %58, %61 : vector<2x8x8xf32>
    %63 = math.exp %62 : vector<2x8x8xf32>
    %cst_29 = arith.constant dense<0.000000e+00> : vector<2x8xf32>
    %64 = vector.multi_reduction <add>, %63, %cst_29 [2] : vector<2x8x8xf32> to vector<2x8xf32>
    %65 = vector.shape_cast %64 : vector<2x8xf32> to vector<2x8x1xf32>
    %66 = vector.broadcast %65 : vector<2x8x1xf32> to vector<2x8x8xf32>
    %67 = arith.divf %63, %66 : vector<2x8x8xf32>
    %68 = arith.truncf %67 : vector<2x8x8xf32> to vector<2x8x8xbf16>
    "tpu.trace_start"() <{level = 10 : i32, message = "bqk,bkd->bqd"}> : () -> ()
    %cst_30 = arith.constant dense<0.000000e+00> : vector<2x8x8xf32>
    %69 = tpu.matmul %68, %55, %cst_30 {dimension_numbers = #tpu.dot_dimension_numbers<[2], [1], [1], [2], [0, 0, 0, 1, 1, 2], [0], [0]>} : vector<2x8x8xbf16>, vector<2x8x8xbf16>, vector<2x8x8xf32> -> vector<2x8x8xf32>
    "tpu.trace_stop"() : () -> ()
    %70 = vector.shape_cast %69 : vector<2x8x8xf32> to vector<16x8xf32>
    %71 = arith.truncf %70 : vector<16x8xf32> to vector<16x8xbf16>
    %72 = vector.extract_strided_slice %23 {offsets = [8, 0], sizes = [8, 32], strides = [1, 1]} : vector<32x32xbf16> to vector<8x32xbf16>
    %cst_31 = arith.constant dense<0.000000e+00> : vector<16x32xf32>
    %73 = tpu.matmul %71, %72, %cst_31 {dimension_numbers = #tpu.dot_dimension_numbers<[1], [0], [0], [1], [0, 0, 1, 1], [], []>} : vector<16x8xbf16>, vector<8x32xbf16>, vector<16x32xf32> -> vector<16x32xf32>
    %74 = arith.addf %49, %73 : vector<16x32xf32>
    %75 = vector.extract_strided_slice %21 {offsets = [0, 16], sizes = [16, 8], strides = [1, 1]} : vector<16x96xbf16> to vector<16x8xbf16>
    %76 = vector.shape_cast %75 : vector<16x8xbf16> to vector<2x8x8xbf16>
    %77 = vector.extract_strided_slice %21 {offsets = [0, 48], sizes = [16, 8], strides = [1, 1]} : vector<16x96xbf16> to vector<16x8xbf16>
    %78 = vector.shape_cast %77 : vector<16x8xbf16> to vector<2x8x8xbf16>
    %79 = vector.extract_strided_slice %21 {offsets = [0, 80], sizes = [16, 8], strides = [1, 1]} : vector<16x96xbf16> to vector<16x8xbf16>
    %80 = vector.shape_cast %79 : vector<16x8xbf16> to vector<2x8x8xbf16>
    "tpu.trace_start"() <{level = 10 : i32, message = "bqd,bkd->bqk"}> : () -> ()
    %cst_32 = arith.constant dense<0.000000e+00> : vector<2x8x8xf32>
    %81 = tpu.matmul %76, %78, %cst_32 {dimension_numbers = #tpu.dot_dimension_numbers<[2], [2], [1], [1], [0, 0, 0, 1, 1, 1], [0], [0]>} : vector<2x8x8xbf16>, vector<2x8x8xbf16>, vector<2x8x8xf32> -> vector<2x8x8xf32>
    "tpu.trace_stop"() : () -> ()
    %cst_33 = arith.constant 0.353553385 : f32
    %82 = vector.broadcast %cst_33 : f32 to vector<2x8x8xf32>
    %83 = arith.mulf %81, %82 : vector<2x8x8xf32>
    %cst_34 = arith.constant dense<0xFF800000> : vector<2x8xf32>
    %84 = vector.multi_reduction <maximumf>, %83, %cst_34 [2] : vector<2x8x8xf32> to vector<2x8xf32>
    %85 = vector.shape_cast %84 : vector<2x8xf32> to vector<2x8x1xf32>
    %86 = vector.broadcast %85 : vector<2x8x1xf32> to vector<2x8x8xf32>
    %87 = arith.subf %83, %86 : vector<2x8x8xf32>
    %88 = math.exp %87 : vector<2x8x8xf32>
    %cst_35 = arith.constant dense<0.000000e+00> : vector<2x8xf32>
    %89 = vector.multi_reduction <add>, %88, %cst_35 [2] : vector<2x8x8xf32> to vector<2x8xf32>
    %90 = vector.shape_cast %89 : vector<2x8xf32> to vector<2x8x1xf32>
    %91 = vector.broadcast %90 : vector<2x8x1xf32> to vector<2x8x8xf32>
    %92 = arith.divf %88, %91 : vector<2x8x8xf32>
    %93 = arith.truncf %92 : vector<2x8x8xf32> to vector<2x8x8xbf16>
    "tpu.trace_start"() <{level = 10 : i32, message = "bqk,bkd->bqd"}> : () -> ()
    %cst_36 = arith.constant dense<0.000000e+00> : vector<2x8x8xf32>
    %94 = tpu.matmul %93, %80, %cst_36 {dimension_numbers = #tpu.dot_dimension_numbers<[2], [1], [1], [2], [0, 0, 0, 1, 1, 2], [0], [0]>} : vector<2x8x8xbf16>, vector<2x8x8xbf16>, vector<2x8x8xf32> -> vector<2x8x8xf32>
    "tpu.trace_stop"() : () -> ()
    %95 = vector.shape_cast %94 : vector<2x8x8xf32> to vector<16x8xf32>
    %96 = arith.truncf %95 : vector<16x8xf32> to vector<16x8xbf16>
    %97 = vector.extract_strided_slice %23 {offsets = [16, 0], sizes = [8, 32], strides = [1, 1]} : vector<32x32xbf16> to vector<8x32xbf16>
    %cst_37 = arith.constant dense<0.000000e+00> : vector<16x32xf32>
    %98 = tpu.matmul %96, %97, %cst_37 {dimension_numbers = #tpu.dot_dimension_numbers<[1], [0], [0], [1], [0, 0, 1, 1], [], []>} : vector<16x8xbf16>, vector<8x32xbf16>, vector<16x32xf32> -> vector<16x32xf32>
    %99 = arith.addf %74, %98 : vector<16x32xf32>
    %100 = vector.extract_strided_slice %21 {offsets = [0, 24], sizes = [16, 8], strides = [1, 1]} : vector<16x96xbf16> to vector<16x8xbf16>
    %101 = vector.shape_cast %100 : vector<16x8xbf16> to vector<2x8x8xbf16>
    %102 = vector.extract_strided_slice %21 {offsets = [0, 56], sizes = [16, 8], strides = [1, 1]} : vector<16x96xbf16> to vector<16x8xbf16>
    %103 = vector.shape_cast %102 : vector<16x8xbf16> to vector<2x8x8xbf16>
    %104 = vector.extract_strided_slice %21 {offsets = [0, 88], sizes = [16, 8], strides = [1, 1]} : vector<16x96xbf16> to vector<16x8xbf16>
    %105 = vector.shape_cast %104 : vector<16x8xbf16> to vector<2x8x8xbf16>
    "tpu.trace_start"() <{level = 10 : i32, message = "bqd,bkd->bqk"}> : () -> ()
    %cst_38 = arith.constant dense<0.000000e+00> : vector<2x8x8xf32>
    %106 = tpu.matmul %101, %103, %cst_38 {dimension_numbers = #tpu.dot_dimension_numbers<[2], [2], [1], [1], [0, 0, 0, 1, 1, 1], [0], [0]>} : vector<2x8x8xbf16>, vector<2x8x8xbf16>, vector<2x8x8xf32> -> vector<2x8x8xf32>
    "tpu.trace_stop"() : () -> ()
    %cst_39 = arith.constant 0.353553385 : f32
    %107 = vector.broadcast %cst_39 : f32 to vector<2x8x8xf32>
    %108 = arith.mulf %106, %107 : vector<2x8x8xf32>
    %cst_40 = arith.constant dense<0xFF800000> : vector<2x8xf32>
    %109 = vector.multi_reduction <maximumf>, %108, %cst_40 [2] : vector<2x8x8xf32> to vector<2x8xf32>
    %110 = vector.shape_cast %109 : vector<2x8xf32> to vector<2x8x1xf32>
    %111 = vector.broadcast %110 : vector<2x8x1xf32> to vector<2x8x8xf32>
    %112 = arith.subf %108, %111 : vector<2x8x8xf32>
    %113 = math.exp %112 : vector<2x8x8xf32>
    %cst_41 = arith.constant dense<0.000000e+00> : vector<2x8xf32>
    %114 = vector.multi_reduction <add>, %113, %cst_41 [2] : vector<2x8x8xf32> to vector<2x8xf32>
    %115 = vector.shape_cast %114 : vector<2x8xf32> to vector<2x8x1xf32>
    %116 = vector.broadcast %115 : vector<2x8x1xf32> to vector<2x8x8xf32>
    %117 = arith.divf %113, %116 : vector<2x8x8xf32>
    %118 = arith.truncf %117 : vector<2x8x8xf32> to vector<2x8x8xbf16>
    "tpu.trace_start"() <{level = 10 : i32, message = "bqk,bkd->bqd"}> : () -> ()
    %cst_42 = arith.constant dense<0.000000e+00> : vector<2x8x8xf32>
    %119 = tpu.matmul %118, %105, %cst_42 {dimension_numbers = #tpu.dot_dimension_numbers<[2], [1], [1], [2], [0, 0, 0, 1, 1, 2], [0], [0]>} : vector<2x8x8xbf16>, vector<2x8x8xbf16>, vector<2x8x8xf32> -> vector<2x8x8xf32>
    "tpu.trace_stop"() : () -> ()
    %120 = vector.shape_cast %119 : vector<2x8x8xf32> to vector<16x8xf32>
    %121 = arith.truncf %120 : vector<16x8xf32> to vector<16x8xbf16>
    %122 = vector.extract_strided_slice %23 {offsets = [24, 0], sizes = [8, 32], strides = [1, 1]} : vector<32x32xbf16> to vector<8x32xbf16>
    %cst_43 = arith.constant dense<0.000000e+00> : vector<16x32xf32>
    %123 = tpu.matmul %121, %122, %cst_43 {dimension_numbers = #tpu.dot_dimension_numbers<[1], [0], [0], [1], [0, 0, 1, 1], [], []>} : vector<16x8xbf16>, vector<8x32xbf16>, vector<16x32xf32> -> vector<16x32xf32>
    %124 = arith.addf %99, %123 : vector<16x32xf32>
    %c0_44 = arith.constant 0 : index
    %c0_45 = arith.constant 0 : index
    %c0_46 = arith.constant 0 : index
    %125 = vector.load %arg8[%c0_44, %c0_45, %c0_46] : memref<2x1x32xf32, #tpu.memory_space<vmem>>, vector<1x1x32xf32>
    %126 = vector.shape_cast %125 : vector<1x1x32xf32> to vector<1x32xf32>
    %127 = vector.broadcast %126 : vector<1x32xf32> to vector<16x32xf32>
    %128 = arith.addf %124, %127 : vector<16x32xf32>
    %129 = arith.addf %12, %128 : vector<16x32xf32>
    %c0_47 = arith.constant 0 : index
    %c0_48 = arith.constant 0 : index
    %c0_49 = arith.constant 0 : index
    %130 = vector.load %arg9[%c0_47, %c0_48, %c0_49] : memref<2x1x32xf32, #tpu.memory_space<vmem>>, vector<1x1x32xf32>
    %131 = vector.shape_cast %130 : vector<1x1x32xf32> to vector<1x32xf32>
    %c0_50 = arith.constant 0 : index
    %c0_51 = arith.constant 0 : index
    %c0_52 = arith.constant 0 : index
    %132 = vector.load %arg10[%c0_50, %c0_51, %c0_52] : memref<2x1x32xf32, #tpu.memory_space<vmem>>, vector<1x1x32xf32>
    %133 = vector.shape_cast %132 : vector<1x1x32xf32> to vector<1x32xf32>
    %cst_53 = arith.constant dense<0.000000e+00> : vector<16xf32>
    %134 = vector.multi_reduction <add>, %129, %cst_53 [1] : vector<16x32xf32> to vector<16xf32>
    %135 = vector.shape_cast %134 : vector<16xf32> to vector<16x1xf32>
    %cst_54 = arith.constant 3.200000e+01 : f32
    %136 = vector.broadcast %cst_54 : f32 to vector<16x1xf32>
    %137 = arith.divf %135, %136 : vector<16x1xf32>
    %138 = vector.broadcast %137 : vector<16x1xf32> to vector<16x32xf32>
    %139 = arith.subf %129, %138 : vector<16x32xf32>
    %140 = arith.mulf %139, %139 : vector<16x32xf32>
    %cst_55 = arith.constant dense<0.000000e+00> : vector<16xf32>
    %141 = vector.multi_reduction <add>, %140, %cst_55 [1] : vector<16x32xf32> to vector<16xf32>
    %142 = vector.shape_cast %141 : vector<16xf32> to vector<16x1xf32>
    %cst_56 = arith.constant 3.200000e+01 : f32
    %143 = vector.broadcast %cst_56 : f32 to vector<16x1xf32>
    %144 = arith.divf %142, %143 : vector<16x1xf32>
    %cst_57 = arith.constant 9.99999974E-6 : f32
    %145 = vector.broadcast %cst_57 : f32 to vector<16x1xf32>
    %146 = arith.addf %144, %145 : vector<16x1xf32>
    %147 = math.rsqrt %146 : vector<16x1xf32>
    %148 = vector.broadcast %147 : vector<16x1xf32> to vector<16x32xf32>
    %149 = arith.mulf %139, %148 : vector<16x32xf32>
    %150 = vector.broadcast %131 : vector<1x32xf32> to vector<16x32xf32>
    %151 = arith.mulf %149, %150 : vector<16x32xf32>
    %152 = vector.broadcast %133 : vector<1x32xf32> to vector<16x32xf32>
    %153 = arith.addf %151, %152 : vector<16x32xf32>
    %154 = arith.truncf %153 : vector<16x32xf32> to vector<16x32xbf16>
    %c0_58 = arith.constant 0 : index
    %c0_59 = arith.constant 0 : index
    %c0_60 = arith.constant 0 : index
    %155 = vector.load %arg11[%c0_58, %c0_59, %c0_60] : memref<2x32x128xbf16, #tpu.memory_space<vmem>>, vector<1x32x128xbf16>
    %156 = vector.shape_cast %155 : vector<1x32x128xbf16> to vector<32x128xbf16>
    %cst_61 = arith.constant dense<0.000000e+00> : vector<16x128xf32>
    %157 = tpu.matmul %154, %156, %cst_61 {dimension_numbers = #tpu.dot_dimension_numbers<[1], [0], [0], [1], [0, 0, 1, 1], [], []>} : vector<16x32xbf16>, vector<32x128xbf16>, vector<16x128xf32> -> vector<16x128xf32>
    %c0_62 = arith.constant 0 : index
    %c0_63 = arith.constant 0 : index
    %c0_64 = arith.constant 0 : index
    %158 = vector.load %arg12[%c0_62, %c0_63, %c0_64] : memref<2x1x128xf32, #tpu.memory_space<vmem>>, vector<1x1x128xf32>
    %159 = vector.shape_cast %158 : vector<1x1x128xf32> to vector<1x128xf32>
    %160 = vector.broadcast %159 : vector<1x128xf32> to vector<16x128xf32>
    %161 = arith.addf %157, %160 : vector<16x128xf32>
    %cst_65 = arith.constant 0.000000e+00 : f32
    %162 = vector.broadcast %cst_65 : f32 to vector<16x128xf32>
    %163 = arith.maximumf %161, %162 : vector<16x128xf32>
    %164 = arith.truncf %163 : vector<16x128xf32> to vector<16x128xbf16>
    %c0_66 = arith.constant 0 : index
    %c0_67 = arith.constant 0 : index
    %c0_68 = arith.constant 0 : index
    %165 = vector.load %arg13[%c0_66, %c0_67, %c0_68] : memref<2x128x32xbf16, #tpu.memory_space<vmem>>, vector<1x128x32xbf16>
    %166 = vector.shape_cast %165 : vector<1x128x32xbf16> to vector<128x32xbf16>
    %cst_69 = arith.constant dense<0.000000e+00> : vector<16x32xf32>
    %167 = tpu.matmul %164, %166, %cst_69 {dimension_numbers = #tpu.dot_dimension_numbers<[1], [0], [0], [1], [0, 0, 1, 1], [], []>} : vector<16x128xbf16>, vector<128x32xbf16>, vector<16x32xf32> -> vector<16x32xf32>
    %c0_70 = arith.constant 0 : index
    %c0_71 = arith.constant 0 : index
    %c0_72 = arith.constant 0 : index
    %168 = vector.load %arg14[%c0_70, %c0_71, %c0_72] : memref<2x1x32xf32, #tpu.memory_space<vmem>>, vector<1x1x32xf32>
    %169 = vector.shape_cast %168 : vector<1x1x32xf32> to vector<1x32xf32>
    %170 = vector.broadcast %169 : vector<1x32xf32> to vector<16x32xf32>
    %171 = arith.addf %167, %170 : vector<16x32xf32>
    %172 = arith.addf %153, %171 : vector<16x32xf32>
    %c0_73 = arith.constant 0 : index
    %c0_74 = arith.constant 0 : index
    %c0_75 = arith.constant 0 : index
    %173 = vector.load %arg15[%c0_73, %c0_74, %c0_75] : memref<2x1x32xf32, #tpu.memory_space<vmem>>, vector<1x1x32xf32>
    %174 = vector.shape_cast %173 : vector<1x1x32xf32> to vector<1x32xf32>
    %c0_76 = arith.constant 0 : index
    %c0_77 = arith.constant 0 : index
    %c0_78 = arith.constant 0 : index
    %175 = vector.load %arg16[%c0_76, %c0_77, %c0_78] : memref<2x1x32xf32, #tpu.memory_space<vmem>>, vector<1x1x32xf32>
    %176 = vector.shape_cast %175 : vector<1x1x32xf32> to vector<1x32xf32>
    %cst_79 = arith.constant dense<0.000000e+00> : vector<16xf32>
    %177 = vector.multi_reduction <add>, %172, %cst_79 [1] : vector<16x32xf32> to vector<16xf32>
    %178 = vector.shape_cast %177 : vector<16xf32> to vector<16x1xf32>
    %cst_80 = arith.constant 3.200000e+01 : f32
    %179 = vector.broadcast %cst_80 : f32 to vector<16x1xf32>
    %180 = arith.divf %178, %179 : vector<16x1xf32>
    %181 = vector.broadcast %180 : vector<16x1xf32> to vector<16x32xf32>
    %182 = arith.subf %172, %181 : vector<16x32xf32>
    %183 = arith.mulf %182, %182 : vector<16x32xf32>
    %cst_81 = arith.constant dense<0.000000e+00> : vector<16xf32>
    %184 = vector.multi_reduction <add>, %183, %cst_81 [1] : vector<16x32xf32> to vector<16xf32>
    %185 = vector.shape_cast %184 : vector<16xf32> to vector<16x1xf32>
    %cst_82 = arith.constant 3.200000e+01 : f32
    %186 = vector.broadcast %cst_82 : f32 to vector<16x1xf32>
    %187 = arith.divf %185, %186 : vector<16x1xf32>
    %cst_83 = arith.constant 9.99999974E-6 : f32
    %188 = vector.broadcast %cst_83 : f32 to vector<16x1xf32>
    %189 = arith.addf %187, %188 : vector<16x1xf32>
    %190 = math.rsqrt %189 : vector<16x1xf32>
    %191 = vector.broadcast %190 : vector<16x1xf32> to vector<16x32xf32>
    %192 = arith.mulf %182, %191 : vector<16x32xf32>
    %193 = vector.broadcast %174 : vector<1x32xf32> to vector<16x32xf32>
    %194 = arith.mulf %192, %193 : vector<16x32xf32>
    %195 = vector.broadcast %176 : vector<1x32xf32> to vector<16x32xf32>
    %196 = arith.addf %194, %195 : vector<16x32xf32>
    %197 = arith.truncf %196 : vector<16x32xf32> to vector<16x32xbf16>
    %c1 = arith.constant 1 : index
    %c0_84 = arith.constant 0 : index
    %c0_85 = arith.constant 0 : index
    %198 = vector.load %arg5[%c1, %c0_84, %c0_85] : memref<2x32x96xbf16, #tpu.memory_space<vmem>>, vector<1x32x96xbf16>
    %199 = vector.shape_cast %198 : vector<1x32x96xbf16> to vector<32x96xbf16>
    %cst_86 = arith.constant dense<0.000000e+00> : vector<16x96xf32>
    %200 = tpu.matmul %197, %199, %cst_86 {dimension_numbers = #tpu.dot_dimension_numbers<[1], [0], [0], [1], [0, 0, 1, 1], [], []>} : vector<16x32xbf16>, vector<32x96xbf16>, vector<16x96xf32> -> vector<16x96xf32>
    %c1_87 = arith.constant 1 : index
    %c0_88 = arith.constant 0 : index
    %c0_89 = arith.constant 0 : index
    %201 = vector.load %arg6[%c1_87, %c0_88, %c0_89] : memref<2x1x96xf32, #tpu.memory_space<vmem>>, vector<1x1x96xf32>
    %202 = vector.shape_cast %201 : vector<1x1x96xf32> to vector<1x96xf32>
    %203 = vector.broadcast %202 : vector<1x96xf32> to vector<16x96xf32>
    %204 = arith.addf %200, %203 : vector<16x96xf32>
    %205 = arith.truncf %204 : vector<16x96xf32> to vector<16x96xbf16>
    %c1_90 = arith.constant 1 : index
    %c0_91 = arith.constant 0 : index
    %c0_92 = arith.constant 0 : index
    %206 = vector.load %arg7[%c1_90, %c0_91, %c0_92] : memref<2x32x32xbf16, #tpu.memory_space<vmem>>, vector<1x32x32xbf16>
    %207 = vector.shape_cast %206 : vector<1x32x32xbf16> to vector<32x32xbf16>
    %cst_93 = arith.constant 0.000000e+00 : f32
    %208 = vector.broadcast %cst_93 : f32 to vector<16x32xf32>
    %209 = vector.extract_strided_slice %205 {offsets = [0, 0], sizes = [16, 8], strides = [1, 1]} : vector<16x96xbf16> to vector<16x8xbf16>
    %210 = vector.shape_cast %209 : vector<16x8xbf16> to vector<2x8x8xbf16>
    %211 = vector.extract_strided_slice %205 {offsets = [0, 32], sizes = [16, 8], strides = [1, 1]} : vector<16x96xbf16> to vector<16x8xbf16>
    %212 = vector.shape_cast %211 : vector<16x8xbf16> to vector<2x8x8xbf16>
    %213 = vector.extract_strided_slice %205 {offsets = [0, 64], sizes = [16, 8], strides = [1, 1]} : vector<16x96xbf16> to vector<16x8xbf16>
    %214 = vector.shape_cast %213 : vector<16x8xbf16> to vector<2x8x8xbf16>
    "tpu.trace_start"() <{level = 10 : i32, message = "bqd,bkd->bqk"}> : () -> ()
    %cst_94 = arith.constant dense<0.000000e+00> : vector<2x8x8xf32>
    %215 = tpu.matmul %210, %212, %cst_94 {dimension_numbers = #tpu.dot_dimension_numbers<[2], [2], [1], [1], [0, 0, 0, 1, 1, 1], [0], [0]>} : vector<2x8x8xbf16>, vector<2x8x8xbf16>, vector<2x8x8xf32> -> vector<2x8x8xf32>
    "tpu.trace_stop"() : () -> ()
    %cst_95 = arith.constant 0.353553385 : f32
    %216 = vector.broadcast %cst_95 : f32 to vector<2x8x8xf32>
    %217 = arith.mulf %215, %216 : vector<2x8x8xf32>
    %cst_96 = arith.constant dense<0xFF800000> : vector<2x8xf32>
    %218 = vector.multi_reduction <maximumf>, %217, %cst_96 [2] : vector<2x8x8xf32> to vector<2x8xf32>
    %219 = vector.shape_cast %218 : vector<2x8xf32> to vector<2x8x1xf32>
    %220 = vector.broadcast %219 : vector<2x8x1xf32> to vector<2x8x8xf32>
    %221 = arith.subf %217, %220 : vector<2x8x8xf32>
    %222 = math.exp %221 : vector<2x8x8xf32>
    %cst_97 = arith.constant dense<0.000000e+00> : vector<2x8xf32>
    %223 = vector.multi_reduction <add>, %222, %cst_97 [2] : vector<2x8x8xf32> to vector<2x8xf32>
    %224 = vector.shape_cast %223 : vector<2x8xf32> to vector<2x8x1xf32>
    %225 = vector.broadcast %224 : vector<2x8x1xf32> to vector<2x8x8xf32>
    %226 = arith.divf %222, %225 : vector<2x8x8xf32>
    %227 = arith.truncf %226 : vector<2x8x8xf32> to vector<2x8x8xbf16>
    "tpu.trace_start"() <{level = 10 : i32, message = "bqk,bkd->bqd"}> : () -> ()
    %cst_98 = arith.constant dense<0.000000e+00> : vector<2x8x8xf32>
    %228 = tpu.matmul %227, %214, %cst_98 {dimension_numbers = #tpu.dot_dimension_numbers<[2], [1], [1], [2], [0, 0, 0, 1, 1, 2], [0], [0]>} : vector<2x8x8xbf16>, vector<2x8x8xbf16>, vector<2x8x8xf32> -> vector<2x8x8xf32>
    "tpu.trace_stop"() : () -> ()
    %229 = vector.shape_cast %228 : vector<2x8x8xf32> to vector<16x8xf32>
    %230 = arith.truncf %229 : vector<16x8xf32> to vector<16x8xbf16>
    %231 = vector.extract_strided_slice %207 {offsets = [0, 0], sizes = [8, 32], strides = [1, 1]} : vector<32x32xbf16> to vector<8x32xbf16>
    %cst_99 = arith.constant dense<0.000000e+00> : vector<16x32xf32>
    %232 = tpu.matmul %230, %231, %cst_99 {dimension_numbers = #tpu.dot_dimension_numbers<[1], [0], [0], [1], [0, 0, 1, 1], [], []>} : vector<16x8xbf16>, vector<8x32xbf16>, vector<16x32xf32> -> vector<16x32xf32>
    %233 = arith.addf %208, %232 : vector<16x32xf32>
    %234 = vector.extract_strided_slice %205 {offsets = [0, 8], sizes = [16, 8], strides = [1, 1]} : vector<16x96xbf16> to vector<16x8xbf16>
    %235 = vector.shape_cast %234 : vector<16x8xbf16> to vector<2x8x8xbf16>
    %236 = vector.extract_strided_slice %205 {offsets = [0, 40], sizes = [16, 8], strides = [1, 1]} : vector<16x96xbf16> to vector<16x8xbf16>
    %237 = vector.shape_cast %236 : vector<16x8xbf16> to vector<2x8x8xbf16>
    %238 = vector.extract_strided_slice %205 {offsets = [0, 72], sizes = [16, 8], strides = [1, 1]} : vector<16x96xbf16> to vector<16x8xbf16>
    %239 = vector.shape_cast %238 : vector<16x8xbf16> to vector<2x8x8xbf16>
    "tpu.trace_start"() <{level = 10 : i32, message = "bqd,bkd->bqk"}> : () -> ()
    %cst_100 = arith.constant dense<0.000000e+00> : vector<2x8x8xf32>
    %240 = tpu.matmul %235, %237, %cst_100 {dimension_numbers = #tpu.dot_dimension_numbers<[2], [2], [1], [1], [0, 0, 0, 1, 1, 1], [0], [0]>} : vector<2x8x8xbf16>, vector<2x8x8xbf16>, vector<2x8x8xf32> -> vector<2x8x8xf32>
    "tpu.trace_stop"() : () -> ()
    %cst_101 = arith.constant 0.353553385 : f32
    %241 = vector.broadcast %cst_101 : f32 to vector<2x8x8xf32>
    %242 = arith.mulf %240, %241 : vector<2x8x8xf32>
    %cst_102 = arith.constant dense<0xFF800000> : vector<2x8xf32>
    %243 = vector.multi_reduction <maximumf>, %242, %cst_102 [2] : vector<2x8x8xf32> to vector<2x8xf32>
    %244 = vector.shape_cast %243 : vector<2x8xf32> to vector<2x8x1xf32>
    %245 = vector.broadcast %244 : vector<2x8x1xf32> to vector<2x8x8xf32>
    %246 = arith.subf %242, %245 : vector<2x8x8xf32>
    %247 = math.exp %246 : vector<2x8x8xf32>
    %cst_103 = arith.constant dense<0.000000e+00> : vector<2x8xf32>
    %248 = vector.multi_reduction <add>, %247, %cst_103 [2] : vector<2x8x8xf32> to vector<2x8xf32>
    %249 = vector.shape_cast %248 : vector<2x8xf32> to vector<2x8x1xf32>
    %250 = vector.broadcast %249 : vector<2x8x1xf32> to vector<2x8x8xf32>
    %251 = arith.divf %247, %250 : vector<2x8x8xf32>
    %252 = arith.truncf %251 : vector<2x8x8xf32> to vector<2x8x8xbf16>
    "tpu.trace_start"() <{level = 10 : i32, message = "bqk,bkd->bqd"}> : () -> ()
    %cst_104 = arith.constant dense<0.000000e+00> : vector<2x8x8xf32>
    %253 = tpu.matmul %252, %239, %cst_104 {dimension_numbers = #tpu.dot_dimension_numbers<[2], [1], [1], [2], [0, 0, 0, 1, 1, 2], [0], [0]>} : vector<2x8x8xbf16>, vector<2x8x8xbf16>, vector<2x8x8xf32> -> vector<2x8x8xf32>
    "tpu.trace_stop"() : () -> ()
    %254 = vector.shape_cast %253 : vector<2x8x8xf32> to vector<16x8xf32>
    %255 = arith.truncf %254 : vector<16x8xf32> to vector<16x8xbf16>
    %256 = vector.extract_strided_slice %207 {offsets = [8, 0], sizes = [8, 32], strides = [1, 1]} : vector<32x32xbf16> to vector<8x32xbf16>
    %cst_105 = arith.constant dense<0.000000e+00> : vector<16x32xf32>
    %257 = tpu.matmul %255, %256, %cst_105 {dimension_numbers = #tpu.dot_dimension_numbers<[1], [0], [0], [1], [0, 0, 1, 1], [], []>} : vector<16x8xbf16>, vector<8x32xbf16>, vector<16x32xf32> -> vector<16x32xf32>
    %258 = arith.addf %233, %257 : vector<16x32xf32>
    %259 = vector.extract_strided_slice %205 {offsets = [0, 16], sizes = [16, 8], strides = [1, 1]} : vector<16x96xbf16> to vector<16x8xbf16>
    %260 = vector.shape_cast %259 : vector<16x8xbf16> to vector<2x8x8xbf16>
    %261 = vector.extract_strided_slice %205 {offsets = [0, 48], sizes = [16, 8], strides = [1, 1]} : vector<16x96xbf16> to vector<16x8xbf16>
    %262 = vector.shape_cast %261 : vector<16x8xbf16> to vector<2x8x8xbf16>
    %263 = vector.extract_strided_slice %205 {offsets = [0, 80], sizes = [16, 8], strides = [1, 1]} : vector<16x96xbf16> to vector<16x8xbf16>
    %264 = vector.shape_cast %263 : vector<16x8xbf16> to vector<2x8x8xbf16>
    "tpu.trace_start"() <{level = 10 : i32, message = "bqd,bkd->bqk"}> : () -> ()
    %cst_106 = arith.constant dense<0.000000e+00> : vector<2x8x8xf32>
    %265 = tpu.matmul %260, %262, %cst_106 {dimension_numbers = #tpu.dot_dimension_numbers<[2], [2], [1], [1], [0, 0, 0, 1, 1, 1], [0], [0]>} : vector<2x8x8xbf16>, vector<2x8x8xbf16>, vector<2x8x8xf32> -> vector<2x8x8xf32>
    "tpu.trace_stop"() : () -> ()
    %cst_107 = arith.constant 0.353553385 : f32
    %266 = vector.broadcast %cst_107 : f32 to vector<2x8x8xf32>
    %267 = arith.mulf %265, %266 : vector<2x8x8xf32>
    %cst_108 = arith.constant dense<0xFF800000> : vector<2x8xf32>
    %268 = vector.multi_reduction <maximumf>, %267, %cst_108 [2] : vector<2x8x8xf32> to vector<2x8xf32>
    %269 = vector.shape_cast %268 : vector<2x8xf32> to vector<2x8x1xf32>
    %270 = vector.broadcast %269 : vector<2x8x1xf32> to vector<2x8x8xf32>
    %271 = arith.subf %267, %270 : vector<2x8x8xf32>
    %272 = math.exp %271 : vector<2x8x8xf32>
    %cst_109 = arith.constant dense<0.000000e+00> : vector<2x8xf32>
    %273 = vector.multi_reduction <add>, %272, %cst_109 [2] : vector<2x8x8xf32> to vector<2x8xf32>
    %274 = vector.shape_cast %273 : vector<2x8xf32> to vector<2x8x1xf32>
    %275 = vector.broadcast %274 : vector<2x8x1xf32> to vector<2x8x8xf32>
    %276 = arith.divf %272, %275 : vector<2x8x8xf32>
    %277 = arith.truncf %276 : vector<2x8x8xf32> to vector<2x8x8xbf16>
    "tpu.trace_start"() <{level = 10 : i32, message = "bqk,bkd->bqd"}> : () -> ()
    %cst_110 = arith.constant dense<0.000000e+00> : vector<2x8x8xf32>
    %278 = tpu.matmul %277, %264, %cst_110 {dimension_numbers = #tpu.dot_dimension_numbers<[2], [1], [1], [2], [0, 0, 0, 1, 1, 2], [0], [0]>} : vector<2x8x8xbf16>, vector<2x8x8xbf16>, vector<2x8x8xf32> -> vector<2x8x8xf32>
    "tpu.trace_stop"() : () -> ()
    %279 = vector.shape_cast %278 : vector<2x8x8xf32> to vector<16x8xf32>
    %280 = arith.truncf %279 : vector<16x8xf32> to vector<16x8xbf16>
    %281 = vector.extract_strided_slice %207 {offsets = [16, 0], sizes = [8, 32], strides = [1, 1]} : vector<32x32xbf16> to vector<8x32xbf16>
    %cst_111 = arith.constant dense<0.000000e+00> : vector<16x32xf32>
    %282 = tpu.matmul %280, %281, %cst_111 {dimension_numbers = #tpu.dot_dimension_numbers<[1], [0], [0], [1], [0, 0, 1, 1], [], []>} : vector<16x8xbf16>, vector<8x32xbf16>, vector<16x32xf32> -> vector<16x32xf32>
    %283 = arith.addf %258, %282 : vector<16x32xf32>
    %284 = vector.extract_strided_slice %205 {offsets = [0, 24], sizes = [16, 8], strides = [1, 1]} : vector<16x96xbf16> to vector<16x8xbf16>
    %285 = vector.shape_cast %284 : vector<16x8xbf16> to vector<2x8x8xbf16>
    %286 = vector.extract_strided_slice %205 {offsets = [0, 56], sizes = [16, 8], strides = [1, 1]} : vector<16x96xbf16> to vector<16x8xbf16>
    %287 = vector.shape_cast %286 : vector<16x8xbf16> to vector<2x8x8xbf16>
    %288 = vector.extract_strided_slice %205 {offsets = [0, 88], sizes = [16, 8], strides = [1, 1]} : vector<16x96xbf16> to vector<16x8xbf16>
    %289 = vector.shape_cast %288 : vector<16x8xbf16> to vector<2x8x8xbf16>
    "tpu.trace_start"() <{level = 10 : i32, message = "bqd,bkd->bqk"}> : () -> ()
    %cst_112 = arith.constant dense<0.000000e+00> : vector<2x8x8xf32>
    %290 = tpu.matmul %285, %287, %cst_112 {dimension_numbers = #tpu.dot_dimension_numbers<[2], [2], [1], [1], [0, 0, 0, 1, 1, 1], [0], [0]>} : vector<2x8x8xbf16>, vector<2x8x8xbf16>, vector<2x8x8xf32> -> vector<2x8x8xf32>
    "tpu.trace_stop"() : () -> ()
    %cst_113 = arith.constant 0.353553385 : f32
    %291 = vector.broadcast %cst_113 : f32 to vector<2x8x8xf32>
    %292 = arith.mulf %290, %291 : vector<2x8x8xf32>
    %cst_114 = arith.constant dense<0xFF800000> : vector<2x8xf32>
    %293 = vector.multi_reduction <maximumf>, %292, %cst_114 [2] : vector<2x8x8xf32> to vector<2x8xf32>
    %294 = vector.shape_cast %293 : vector<2x8xf32> to vector<2x8x1xf32>
    %295 = vector.broadcast %294 : vector<2x8x1xf32> to vector<2x8x8xf32>
    %296 = arith.subf %292, %295 : vector<2x8x8xf32>
    %297 = math.exp %296 : vector<2x8x8xf32>
    %cst_115 = arith.constant dense<0.000000e+00> : vector<2x8xf32>
    %298 = vector.multi_reduction <add>, %297, %cst_115 [2] : vector<2x8x8xf32> to vector<2x8xf32>
    %299 = vector.shape_cast %298 : vector<2x8xf32> to vector<2x8x1xf32>
    %300 = vector.broadcast %299 : vector<2x8x1xf32> to vector<2x8x8xf32>
    %301 = arith.divf %297, %300 : vector<2x8x8xf32>
    %302 = arith.truncf %301 : vector<2x8x8xf32> to vector<2x8x8xbf16>
    "tpu.trace_start"() <{level = 10 : i32, message = "bqk,bkd->bqd"}> : () -> ()
    %cst_116 = arith.constant dense<0.000000e+00> : vector<2x8x8xf32>
    %303 = tpu.matmul %302, %289, %cst_116 {dimension_numbers = #tpu.dot_dimension_numbers<[2], [1], [1], [2], [0, 0, 0, 1, 1, 2], [0], [0]>} : vector<2x8x8xbf16>, vector<2x8x8xbf16>, vector<2x8x8xf32> -> vector<2x8x8xf32>
    "tpu.trace_stop"() : () -> ()
    %304 = vector.shape_cast %303 : vector<2x8x8xf32> to vector<16x8xf32>
    %305 = arith.truncf %304 : vector<16x8xf32> to vector<16x8xbf16>
    %306 = vector.extract_strided_slice %207 {offsets = [24, 0], sizes = [8, 32], strides = [1, 1]} : vector<32x32xbf16> to vector<8x32xbf16>
    %cst_117 = arith.constant dense<0.000000e+00> : vector<16x32xf32>
    %307 = tpu.matmul %305, %306, %cst_117 {dimension_numbers = #tpu.dot_dimension_numbers<[1], [0], [0], [1], [0, 0, 1, 1], [], []>} : vector<16x8xbf16>, vector<8x32xbf16>, vector<16x32xf32> -> vector<16x32xf32>
    %308 = arith.addf %283, %307 : vector<16x32xf32>
    %c1_118 = arith.constant 1 : index
    %c0_119 = arith.constant 0 : index
    %c0_120 = arith.constant 0 : index
    %309 = vector.load %arg8[%c1_118, %c0_119, %c0_120] : memref<2x1x32xf32, #tpu.memory_space<vmem>>, vector<1x1x32xf32>
    %310 = vector.shape_cast %309 : vector<1x1x32xf32> to vector<1x32xf32>
    %311 = vector.broadcast %310 : vector<1x32xf32> to vector<16x32xf32>
    %312 = arith.addf %308, %311 : vector<16x32xf32>
    %313 = arith.addf %196, %312 : vector<16x32xf32>
    %c1_121 = arith.constant 1 : index
    %c0_122 = arith.constant 0 : index
    %c0_123 = arith.constant 0 : index
    %314 = vector.load %arg9[%c1_121, %c0_122, %c0_123] : memref<2x1x32xf32, #tpu.memory_space<vmem>>, vector<1x1x32xf32>
    %315 = vector.shape_cast %314 : vector<1x1x32xf32> to vector<1x32xf32>
    %c1_124 = arith.constant 1 : index
    %c0_125 = arith.constant 0 : index
    %c0_126 = arith.constant 0 : index
    %316 = vector.load %arg10[%c1_124, %c0_125, %c0_126] : memref<2x1x32xf32, #tpu.memory_space<vmem>>, vector<1x1x32xf32>
    %317 = vector.shape_cast %316 : vector<1x1x32xf32> to vector<1x32xf32>
    %cst_127 = arith.constant dense<0.000000e+00> : vector<16xf32>
    %318 = vector.multi_reduction <add>, %313, %cst_127 [1] : vector<16x32xf32> to vector<16xf32>
    %319 = vector.shape_cast %318 : vector<16xf32> to vector<16x1xf32>
    %cst_128 = arith.constant 3.200000e+01 : f32
    %320 = vector.broadcast %cst_128 : f32 to vector<16x1xf32>
    %321 = arith.divf %319, %320 : vector<16x1xf32>
    %322 = vector.broadcast %321 : vector<16x1xf32> to vector<16x32xf32>
    %323 = arith.subf %313, %322 : vector<16x32xf32>
    %324 = arith.mulf %323, %323 : vector<16x32xf32>
    %cst_129 = arith.constant dense<0.000000e+00> : vector<16xf32>
    %325 = vector.multi_reduction <add>, %324, %cst_129 [1] : vector<16x32xf32> to vector<16xf32>
    %326 = vector.shape_cast %325 : vector<16xf32> to vector<16x1xf32>
    %cst_130 = arith.constant 3.200000e+01 : f32
    %327 = vector.broadcast %cst_130 : f32 to vector<16x1xf32>
    %328 = arith.divf %326, %327 : vector<16x1xf32>
    %cst_131 = arith.constant 9.99999974E-6 : f32
    %329 = vector.broadcast %cst_131 : f32 to vector<16x1xf32>
    %330 = arith.addf %328, %329 : vector<16x1xf32>
    %331 = math.rsqrt %330 : vector<16x1xf32>
    %332 = vector.broadcast %331 : vector<16x1xf32> to vector<16x32xf32>
    %333 = arith.mulf %323, %332 : vector<16x32xf32>
    %334 = vector.broadcast %315 : vector<1x32xf32> to vector<16x32xf32>
    %335 = arith.mulf %333, %334 : vector<16x32xf32>
    %336 = vector.broadcast %317 : vector<1x32xf32> to vector<16x32xf32>
    %337 = arith.addf %335, %336 : vector<16x32xf32>
    %338 = arith.truncf %337 : vector<16x32xf32> to vector<16x32xbf16>
    %c1_132 = arith.constant 1 : index
    %c0_133 = arith.constant 0 : index
    %c0_134 = arith.constant 0 : index
    %339 = vector.load %arg11[%c1_132, %c0_133, %c0_134] : memref<2x32x128xbf16, #tpu.memory_space<vmem>>, vector<1x32x128xbf16>
    %340 = vector.shape_cast %339 : vector<1x32x128xbf16> to vector<32x128xbf16>
    %cst_135 = arith.constant dense<0.000000e+00> : vector<16x128xf32>
    %341 = tpu.matmul %338, %340, %cst_135 {dimension_numbers = #tpu.dot_dimension_numbers<[1], [0], [0], [1], [0, 0, 1, 1], [], []>} : vector<16x32xbf16>, vector<32x128xbf16>, vector<16x128xf32> -> vector<16x128xf32>
    %c1_136 = arith.constant 1 : index
    %c0_137 = arith.constant 0 : index
    %c0_138 = arith.constant 0 : index
    %342 = vector.load %arg12[%c1_136, %c0_137, %c0_138] : memref<2x1x128xf32, #tpu.memory_space<vmem>>, vector<1x1x128xf32>
    %343 = vector.shape_cast %342 : vector<1x1x128xf32> to vector<1x128xf32>
    %344 = vector.broadcast %343 : vector<1x128xf32> to vector<16x128xf32>
    %345 = arith.addf %341, %344 : vector<16x128xf32>
    %cst_139 = arith.constant 0.000000e+00 : f32
    %346 = vector.broadcast %cst_139 : f32 to vector<16x128xf32>
    %347 = arith.maximumf %345, %346 : vector<16x128xf32>
    %348 = arith.truncf %347 : vector<16x128xf32> to vector<16x128xbf16>
    %c1_140 = arith.constant 1 : index
    %c0_141 = arith.constant 0 : index
    %c0_142 = arith.constant 0 : index
    %349 = vector.load %arg13[%c1_140, %c0_141, %c0_142] : memref<2x128x32xbf16, #tpu.memory_space<vmem>>, vector<1x128x32xbf16>
    %350 = vector.shape_cast %349 : vector<1x128x32xbf16> to vector<128x32xbf16>
    %cst_143 = arith.constant dense<0.000000e+00> : vector<16x32xf32>
    %351 = tpu.matmul %348, %350, %cst_143 {dimension_numbers = #tpu.dot_dimension_numbers<[1], [0], [0], [1], [0, 0, 1, 1], [], []>} : vector<16x128xbf16>, vector<128x32xbf16>, vector<16x32xf32> -> vector<16x32xf32>
    %c1_144 = arith.constant 1 : index
    %c0_145 = arith.constant 0 : index
    %c0_146 = arith.constant 0 : index
    %352 = vector.load %arg14[%c1_144, %c0_145, %c0_146] : memref<2x1x32xf32, #tpu.memory_space<vmem>>, vector<1x1x32xf32>
    %353 = vector.shape_cast %352 : vector<1x1x32xf32> to vector<1x32xf32>
    %354 = vector.broadcast %353 : vector<1x32xf32> to vector<16x32xf32>
    %355 = arith.addf %351, %354 : vector<16x32xf32>
    %356 = arith.addf %337, %355 : vector<16x32xf32>
    %c1_147 = arith.constant 1 : index
    %c0_148 = arith.constant 0 : index
    %c0_149 = arith.constant 0 : index
    %357 = vector.load %arg15[%c1_147, %c0_148, %c0_149] : memref<2x1x32xf32, #tpu.memory_space<vmem>>, vector<1x1x32xf32>
    %358 = vector.shape_cast %357 : vector<1x1x32xf32> to vector<1x32xf32>
    %c1_150 = arith.constant 1 : index
    %c0_151 = arith.constant 0 : index
    %c0_152 = arith.constant 0 : index
    %359 = vector.load %arg16[%c1_150, %c0_151, %c0_152] : memref<2x1x32xf32, #tpu.memory_space<vmem>>, vector<1x1x32xf32>
    %360 = vector.shape_cast %359 : vector<1x1x32xf32> to vector<1x32xf32>
    %cst_153 = arith.constant dense<0.000000e+00> : vector<16xf32>
    %361 = vector.multi_reduction <add>, %356, %cst_153 [1] : vector<16x32xf32> to vector<16xf32>
    %362 = vector.shape_cast %361 : vector<16xf32> to vector<16x1xf32>
    %cst_154 = arith.constant 3.200000e+01 : f32
    %363 = vector.broadcast %cst_154 : f32 to vector<16x1xf32>
    %364 = arith.divf %362, %363 : vector<16x1xf32>
    %365 = vector.broadcast %364 : vector<16x1xf32> to vector<16x32xf32>
    %366 = arith.subf %356, %365 : vector<16x32xf32>
    %367 = arith.mulf %366, %366 : vector<16x32xf32>
    %cst_155 = arith.constant dense<0.000000e+00> : vector<16xf32>
    %368 = vector.multi_reduction <add>, %367, %cst_155 [1] : vector<16x32xf32> to vector<16xf32>
    %369 = vector.shape_cast %368 : vector<16xf32> to vector<16x1xf32>
    %cst_156 = arith.constant 3.200000e+01 : f32
    %370 = vector.broadcast %cst_156 : f32 to vector<16x1xf32>
    %371 = arith.divf %369, %370 : vector<16x1xf32>
    %cst_157 = arith.constant 9.99999974E-6 : f32
    %372 = vector.broadcast %cst_157 : f32 to vector<16x1xf32>
    %373 = arith.addf %371, %372 : vector<16x1xf32>
    %374 = math.rsqrt %373 : vector<16x1xf32>
    %375 = vector.broadcast %374 : vector<16x1xf32> to vector<16x32xf32>
    %376 = arith.mulf %366, %375 : vector<16x32xf32>
    %377 = vector.broadcast %358 : vector<1x32xf32> to vector<16x32xf32>
    %378 = arith.mulf %376, %377 : vector<16x32xf32>
    %379 = vector.broadcast %360 : vector<1x32xf32> to vector<16x32xf32>
    %380 = arith.addf %378, %379 : vector<16x32xf32>
    %c0_158 = arith.constant 0 : index
    %c0_159 = arith.constant 0 : index
    %381 = vector.load %arg17[%c0_158, %c0_159] : memref<32x128xbf16, #tpu.memory_space<vmem>>, vector<32x128xbf16>
    %c0_160 = arith.constant 0 : index
    %c0_161 = arith.constant 0 : index
    %382 = vector.load %arg18[%c0_160, %c0_161] : memref<32x128xbf16, #tpu.memory_space<vmem>>, vector<32x128xbf16>
    %c0_162 = arith.constant 0 : index
    %c0_163 = arith.constant 0 : index
    %383 = vector.load %arg19[%c0_162, %c0_163] : memref<1x128xf32, #tpu.memory_space<vmem>>, vector<1x128xf32>
    %384 = arith.truncf %380 : vector<16x32xf32> to vector<16x32xbf16>
    %cst_164 = arith.constant dense<0.000000e+00> : vector<16x128xf32>
    %385 = tpu.matmul %384, %381, %cst_164 {dimension_numbers = #tpu.dot_dimension_numbers<[1], [0], [0], [1], [0, 0, 1, 1], [], []>} : vector<16x32xbf16>, vector<32x128xbf16>, vector<16x128xf32> -> vector<16x128xf32>
    %386 = vector.broadcast %383 : vector<1x128xf32> to vector<16x128xf32>
    %387 = arith.addf %385, %386 : vector<16x128xf32>
    %cst_165 = arith.constant 0.000000e+00 : f32
    %388 = vector.broadcast %cst_165 : f32 to vector<8x32xf32>
    %cst_166 = arith.constant 0.000000e+00 : f32
    %389 = vector.broadcast %cst_166 : f32 to vector<8x32xf32>
    %390 = vector.extract_strided_slice %387 {offsets = [0, 0], sizes = [8, 128], strides = [1, 1]} : vector<16x128xf32> to vector<8x128xf32>
    %391 = arith.truncf %388 : vector<8x32xf32> to vector<8x32xbf16>
    %cst_167 = arith.constant dense<0.000000e+00> : vector<8x128xf32>
    %392 = tpu.matmul %391, %382, %cst_167 {dimension_numbers = #tpu.dot_dimension_numbers<[1], [0], [0], [1], [0, 0, 1, 1], [], []>} : vector<8x32xbf16>, vector<32x128xbf16>, vector<8x128xf32> -> vector<8x128xf32>
    %393 = arith.addf %390, %392 : vector<8x128xf32>
    %394 = vector.extract_strided_slice %393 {offsets = [0, 0], sizes = [8, 32], strides = [1, 1]} : vector<8x128xf32> to vector<8x32xf32>
    %395 = arith.negf %394 : vector<8x32xf32>
    %396 = math.exp %395 : vector<8x32xf32>
    %cst_168 = arith.constant 1.000000e+00 : f32
    %397 = vector.broadcast %cst_168 : f32 to vector<8x32xf32>
    %398 = arith.addf %397, %396 : vector<8x32xf32>
    %399 = arith.divf %397, %398 : vector<8x32xf32>
    %400 = vector.extract_strided_slice %393 {offsets = [0, 32], sizes = [8, 32], strides = [1, 1]} : vector<8x128xf32> to vector<8x32xf32>
    %401 = arith.negf %400 : vector<8x32xf32>
    %402 = math.exp %401 : vector<8x32xf32>
    %cst_169 = arith.constant 1.000000e+00 : f32
    %403 = vector.broadcast %cst_169 : f32 to vector<8x32xf32>
    %404 = arith.addf %403, %402 : vector<8x32xf32>
    %405 = arith.divf %403, %404 : vector<8x32xf32>
    %406 = vector.extract_strided_slice %393 {offsets = [0, 64], sizes = [8, 32], strides = [1, 1]} : vector<8x128xf32> to vector<8x32xf32>
    %407 = math.tanh %406 : vector<8x32xf32>
    %408 = vector.extract_strided_slice %393 {offsets = [0, 96], sizes = [8, 32], strides = [1, 1]} : vector<8x128xf32> to vector<8x32xf32>
    %409 = arith.negf %408 : vector<8x32xf32>
    %410 = math.exp %409 : vector<8x32xf32>
    %cst_170 = arith.constant 1.000000e+00 : f32
    %411 = vector.broadcast %cst_170 : f32 to vector<8x32xf32>
    %412 = arith.addf %411, %410 : vector<8x32xf32>
    %413 = arith.divf %411, %412 : vector<8x32xf32>
    %414 = arith.mulf %405, %389 : vector<8x32xf32>
    %415 = arith.mulf %399, %407 : vector<8x32xf32>
    %416 = arith.addf %414, %415 : vector<8x32xf32>
    %417 = math.tanh %416 : vector<8x32xf32>
    %418 = arith.mulf %413, %417 : vector<8x32xf32>
    %419 = vector.extract_strided_slice %387 {offsets = [8, 0], sizes = [8, 128], strides = [1, 1]} : vector<16x128xf32> to vector<8x128xf32>
    %420 = arith.truncf %418 : vector<8x32xf32> to vector<8x32xbf16>
    %cst_171 = arith.constant dense<0.000000e+00> : vector<8x128xf32>
    %421 = tpu.matmul %420, %382, %cst_171 {dimension_numbers = #tpu.dot_dimension_numbers<[1], [0], [0], [1], [0, 0, 1, 1], [], []>} : vector<8x32xbf16>, vector<32x128xbf16>, vector<8x128xf32> -> vector<8x128xf32>
    %422 = arith.addf %419, %421 : vector<8x128xf32>
    %423 = vector.extract_strided_slice %422 {offsets = [0, 0], sizes = [8, 32], strides = [1, 1]} : vector<8x128xf32> to vector<8x32xf32>
    %424 = arith.negf %423 : vector<8x32xf32>
    %425 = math.exp %424 : vector<8x32xf32>
    %cst_172 = arith.constant 1.000000e+00 : f32
    %426 = vector.broadcast %cst_172 : f32 to vector<8x32xf32>
    %427 = arith.addf %426, %425 : vector<8x32xf32>
    %428 = arith.divf %426, %427 : vector<8x32xf32>
    %429 = vector.extract_strided_slice %422 {offsets = [0, 32], sizes = [8, 32], strides = [1, 1]} : vector<8x128xf32> to vector<8x32xf32>
    %430 = arith.negf %429 : vector<8x32xf32>
    %431 = math.exp %430 : vector<8x32xf32>
    %cst_173 = arith.constant 1.000000e+00 : f32
    %432 = vector.broadcast %cst_173 : f32 to vector<8x32xf32>
    %433 = arith.addf %432, %431 : vector<8x32xf32>
    %434 = arith.divf %432, %433 : vector<8x32xf32>
    %435 = vector.extract_strided_slice %422 {offsets = [0, 64], sizes = [8, 32], strides = [1, 1]} : vector<8x128xf32> to vector<8x32xf32>
    %436 = math.tanh %435 : vector<8x32xf32>
    %437 = vector.extract_strided_slice %422 {offsets = [0, 96], sizes = [8, 32], strides = [1, 1]} : vector<8x128xf32> to vector<8x32xf32>
    %438 = arith.negf %437 : vector<8x32xf32>
    %439 = math.exp %438 : vector<8x32xf32>
    %cst_174 = arith.constant 1.000000e+00 : f32
    %440 = vector.broadcast %cst_174 : f32 to vector<8x32xf32>
    %441 = arith.addf %440, %439 : vector<8x32xf32>
    %442 = arith.divf %440, %441 : vector<8x32xf32>
    %443 = arith.mulf %434, %416 : vector<8x32xf32>
    %444 = arith.mulf %428, %436 : vector<8x32xf32>
    %445 = arith.addf %443, %444 : vector<8x32xf32>
    %446 = math.tanh %445 : vector<8x32xf32>
    %447 = arith.mulf %442, %446 : vector<8x32xf32>
    %448 = vector.extract_strided_slice %418 {offsets = [7, 0], sizes = [1, 32], strides = [1, 1]} : vector<8x32xf32> to vector<1x32xf32>
    %449 = vector.extract_strided_slice %447 {offsets = [7, 0], sizes = [1, 32], strides = [1, 1]} : vector<8x32xf32> to vector<1x32xf32>
    %450 = tpu.concatenate %448, %449 in 0 : vector<1x32xf32>, vector<1x32xf32> -> vector<2x32xf32>
    %cst_175 = arith.constant 0.999994993 : f32
    %451 = vector.broadcast %cst_175 : f32 to vector<2x32xf32>
    %452 = arith.mulf %450, %451 : vector<2x32xf32>
    %453 = arith.truncf %452 : vector<2x32xf32> to vector<2x32xbf16>
    %c0_176 = arith.constant 0 : index
    %c0_177 = arith.constant 0 : index
    %454 = vector.load %arg20[%c0_176, %c0_177] : memref<32x4xbf16, #tpu.memory_space<vmem>>, vector<32x4xbf16>
    %cst_178 = arith.constant dense<0.000000e+00> : vector<2x4xf32>
    %455 = tpu.matmul %453, %454, %cst_178 {dimension_numbers = #tpu.dot_dimension_numbers<[1], [0], [0], [1], [0, 0, 1, 1], [], []>} : vector<2x32xbf16>, vector<32x4xbf16>, vector<2x4xf32> -> vector<2x4xf32>
    %c0_179 = arith.constant 0 : index
    %c0_180 = arith.constant 0 : index
    %456 = vector.load %arg21[%c0_179, %c0_180] : memref<1x4xf32, #tpu.memory_space<vmem>>, vector<1x4xf32>
    %457 = vector.broadcast %456 : vector<1x4xf32> to vector<2x4xf32>
    %458 = arith.addf %455, %457 : vector<2x4xf32>
    %c0_181 = arith.constant 0 : index
    %c0_182 = arith.constant 0 : index
    %459 = vector.load %arg22[%c0_181, %c0_182] : memref<2x4xf32, #tpu.memory_space<vmem>>, vector<2x4xf32>
    tpu.vector_store %arg22[%c0_181, %c0_182], %458 {strides = array<i32>} : memref<2x4xf32, #tpu.memory_space<vmem>>, vector<2x4xf32>,
    return
  }
  func.func @transform_0(%arg0: i32) -> (i32, i32, i32) {
    %c0_i32 = arith.constant 0 : i32
    %c0_i32_0 = arith.constant 0 : i32
    %c0_i32_1 = arith.constant 0 : i32
    %c0_i32_2 = arith.constant 0 : i32
    return %c0_i32, %c0_i32_0, %c0_i32_1 : i32, i32, i32
  }
  func.func @transform_1(%arg0: i32) -> (i32, i32) {
    %c0_i32 = arith.constant 0 : i32
    %c0_i32_0 = arith.constant 0 : i32
    %c0_i32_1 = arith.constant 0 : i32
    return %c0_i32, %c0_i32_0 : i32, i32
  }
  func.func @transform_2(%arg0: i32) -> (i32, i32) {
    %c0_i32 = arith.constant 0 : i32
    %c0_i32_0 = arith.constant 0 : i32
    %c0_i32_1 = arith.constant 0 : i32
    return %c0_i32, %c0_i32_0 : i32, i32
  }
  func.func @transform_3(%arg0: i32) -> (i32, i32) {
    %c0_i32 = arith.constant 0 : i32
    %c0_i32_0 = arith.constant 0 : i32
    %c0_i32_1 = arith.constant 0 : i32
    return %c0_i32, %c0_i32_0 : i32, i32
  }
  func.func @transform_4(%arg0: i32) -> (i32, i32, i32) {
    %c0_i32 = arith.constant 0 : i32
    %c0_i32_0 = arith.constant 0 : i32
    %c0_i32_1 = arith.constant 0 : i32
    %c0_i32_2 = arith.constant 0 : i32
    return %c0_i32, %c0_i32_0, %c0_i32_1 : i32, i32, i32
  }
  func.func @transform_5(%arg0: i32) -> (i32, i32, i32) {
    %c0_i32 = arith.constant 0 : i32
    %c0_i32_0 = arith.constant 0 : i32
    %c0_i32_1 = arith.constant 0 : i32
    %c0_i32_2 = arith.constant 0 : i32
    return %c0_i32, %c0_i32_0, %c0_i32_1 : i32, i32, i32
  }
  func.func @transform_6(%arg0: i32) -> (i32, i32, i32) {
    %c0_i32 = arith.constant 0 : i32
    %c0_i32_0 = arith.constant 0 : i32
    %c0_i32_1 = arith.constant 0 : i32
    %c0_i32_2 = arith.constant 0 : i32
    return %c0_i32, %c0_i32_0, %c0_i32_1 : i32, i32, i32
  }
  func.func @transform_7(%arg0: i32) -> (i32, i32, i32) {
    %c0_i32 = arith.constant 0 : i32
    %c0_i32_0 = arith.constant 0 : i32
    %c0_i32_1 = arith.constant 0 : i32
    %c0_i32_2 = arith.constant 0 : i32
    return %c0_i32, %c0_i32_0, %c0_i32_1 : i32, i32, i32
  }
  func.func @transform_8(%arg0: i32) -> (i32, i32, i32) {
    %c0_i32 = arith.constant 0 : i32
    %c0_i32_0 = arith.constant 0 : i32
    %c0_i32_1 = arith.constant 0 : i32
    %c0_i32_2 = arith.constant 0 : i32
    return %c0_i32, %c0_i32_0, %c0_i32_1 : i32, i32, i32
  }
  func.func @transform_9(%arg0: i32) -> (i32, i32, i32) {
    %c0_i32 = arith.constant 0 : i32
    %c0_i32_0 = arith.constant 0 : i32
    %c0_i32_1 = arith.constant 0 : i32
    %c0_i32_2 = arith.constant 0 : i32
    return %c0_i32, %c0_i32_0, %c0_i32_1 : i32, i32, i32
  }
  func.func @transform_10(%arg0: i32) -> (i32, i32, i32) {
    %c0_i32 = arith.constant 0 : i32
    %c0_i32_0 = arith.constant 0 : i32
    %c0_i32_1 = arith.constant 0 : i32
    %c0_i32_2 = arith.constant 0 : i32
    return %c0_i32, %c0_i32_0, %c0_i32_1 : i32, i32, i32
  }
  func.func @transform_11(%arg0: i32) -> (i32, i32, i32) {
    %c0_i32 = arith.constant 0 : i32
    %c0_i32_0 = arith.constant 0 : i32
    %c0_i32_1 = arith.constant 0 : i32
    %c0_i32_2 = arith.constant 0 : i32
    return %c0_i32, %c0_i32_0, %c0_i32_1 : i32, i32, i32
  }
  func.func @transform_12(%arg0: i32) -> (i32, i32, i32) {
    %c0_i32 = arith.constant 0 : i32
    %c0_i32_0 = arith.constant 0 : i32
    %c0_i32_1 = arith.constant 0 : i32
    %c0_i32_2 = arith.constant 0 : i32
    return %c0_i32, %c0_i32_0, %c0_i32_1 : i32, i32, i32
  }
  func.func @transform_13(%arg0: i32) -> (i32, i32, i32) {
    %c0_i32 = arith.constant 0 : i32
    %c0_i32_0 = arith.constant 0 : i32
    %c0_i32_1 = arith.constant 0 : i32
    %c0_i32_2 = arith.constant 0 : i32
    return %c0_i32, %c0_i32_0, %c0_i32_1 : i32, i32, i32
  }
  func.func @transform_14(%arg0: i32) -> (i32, i32, i32) {
    %c0_i32 = arith.constant 0 : i32
    %c0_i32_0 = arith.constant 0 : i32
    %c0_i32_1 = arith.constant 0 : i32
    %c0_i32_2 = arith.constant 0 : i32
    return %c0_i32, %c0_i32_0, %c0_i32_1 : i32, i32, i32
  }
  func.func @transform_15(%arg0: i32) -> (i32, i32, i32) {
    %c0_i32 = arith.constant 0 : i32
    %c0_i32_0 = arith.constant 0 : i32
    %c0_i32_1 = arith.constant 0 : i32
    %c0_i32_2 = arith.constant 0 : i32
    return %c0_i32, %c0_i32_0, %c0_i32_1 : i32, i32, i32
  }
  func.func @transform_16(%arg0: i32) -> (i32, i32) {
    %c0_i32 = arith.constant 0 : i32
    %c0_i32_0 = arith.constant 0 : i32
    %c0_i32_1 = arith.constant 0 : i32
    return %c0_i32, %c0_i32_0 : i32, i32
  }
  func.func @transform_17(%arg0: i32) -> (i32, i32) {
    %c0_i32 = arith.constant 0 : i32
    %c0_i32_0 = arith.constant 0 : i32
    %c0_i32_1 = arith.constant 0 : i32
    return %c0_i32, %c0_i32_0 : i32, i32
  }
  func.func @transform_18(%arg0: i32) -> (i32, i32) {
    %c0_i32 = arith.constant 0 : i32
    %c0_i32_0 = arith.constant 0 : i32
    %c0_i32_1 = arith.constant 0 : i32
    return %c0_i32, %c0_i32_0 : i32, i32
  }
  func.func @transform_19(%arg0: i32) -> (i32, i32) {
    %c0_i32 = arith.constant 0 : i32
    %c0_i32_0 = arith.constant 0 : i32
    %c0_i32_1 = arith.constant 0 : i32
    return %c0_i32, %c0_i32_0 : i32, i32
  }
  func.func @transform_20(%arg0: i32) -> (i32, i32) {
    %c0_i32 = arith.constant 0 : i32
    %c0_i32_0 = arith.constant 0 : i32
    %c0_i32_1 = arith.constant 0 : i32
    return %c0_i32, %c0_i32_0 : i32, i32
  }
  func.func @transform_21(%arg0: i32) -> (i32, i32) {
    %c0_i32 = arith.constant 0 : i32
    %c0_i32_0 = arith.constant 0 : i32
    %c0_i32_1 = arith.constant 0 : i32
    return %c0_i32, %c0_i32_0 : i32, i32
  }
}

</mosaic_0001>

<bundles_post_ra>
// kernel: forward.1
= control target key start
LH: loop header
LB: loop body
LE: loop exit
PB: predicated region body
PF: predicated region fallthrough
CT: control target
= control target key end

     0   :  { %s4935_s0 = inlined_call_operand.vmem [shape: f32[2,8,16], index: 0, kind: input, shape index: {}]   ;;  %s4936_s1 = inlined_call_operand.vmem [shape: bf16[16,32], index: 1, kind: input, shape index: {}]   ;;  %s4937_s2 = inlined_call_operand.vmem [shape: f32[1,32], index: 2, kind: input, shape index: {}]   ;;  %s4938_s3 = inlined_call_operand.vmem [shape: f32[1,32], index: 3, kind: input, shape index: {}]   ;;  %s4939_s4 = inlined_call_operand.vmem [shape: bf16[2,32,96], index: 4, kind: input, shape index: {}]   ;;  %s4940_s5 = inlined_call_operand.vmem [shape: f32[2,1,96], index: 5, kind: input, shape index: {}]   ;;  %s4941_s6 = inlined_call_operand.vmem [shape: bf16[2,32,32], index: 6, kind: input, shape index: {}]   ;;  %s4942_s7 = inlined_call_operand.vmem [shape: f32[2,1,32], index: 7, kind: input, shape index: {}]   ;;  %s4943_s8 = inlined_call_operand.vmem [shape: f32[2,1,32], index: 8, kind: input, shape index: {}]   ;;  %s4944_s9 = inlined_call_operand.vmem [shape: f32[2,1,32], index: 9, kind: input, shape index: {}]   ;;  %s4945_s10 = inlined_call_operand.vmem [shape: bf16[2,32,128], index: 10, kind: input, shape index: {}]   ;;  %s4946_s11 = inlined_call_operand.vmem [shape: f32[2,1,128], index: 11, kind: input, shape index: {}]   ;;  %s4947_s12 = inlined_call_operand.vmem [shape: bf16[2,128,32], index: 12, kind: input, shape index: {}]   ;;  %s4948_s13 = inlined_call_operand.vmem [shape: f32[2,1,32], index: 13, kind: input, shape index: {}]   ;;  %s4949_s14 = inlined_call_operand.vmem [shape: f32[2,1,32], index: 14, kind: input, shape index: {}]   ;;  %s4950_s15 = inlined_call_operand.vmem [shape: f32[2,1,32], index: 15, kind: input, shape index: {}]   ;;  %s4951_s16 = inlined_call_operand.vmem [shape: bf16[32,128], index: 16, kind: input, shape index: {}]   ;;  %s4952_s17 = inlined_call_operand.vmem [shape: bf16[32,128], index: 17, kind: input, shape index: {}]   ;;  %s4953_s18 = inlined_call_operand.vmem [shape: f32[1,128], index: 18, kind: input, shape index: {}]   ;;  %s4954_s19 = inlined_call_operand.vmem [shape: bf16[32,4], index: 19, kind: input, shape index: {}]   ;;  %s4955_s20 = inlined_call_operand.vmem [shape: f32[1,4], index: 20, kind: input, shape index: {}]   ;;  %s4956_s21 = inlined_call_operand.hbm [shape: f32[2,4], index: 21, kind: output, shape index: {}]  }
   0x1   :  { %4972 = sst [smem:[#allocation5_spill]] %s4935_s0 }
   0x2   :  { %4973 = sst [smem:[#allocation6_spill]] %s4936_s1 }
   0x3   :  { %4974 = sst [smem:[#allocation7_spill]] %s4937_s2 }
   0x4   :  { %4975 = sst [smem:[#allocation8_spill]] %s4938_s3 }
   0x5   :  { %4976 = sst [smem:[#allocation9_spill]] %s4939_s4 }
   0x6   :  { %4977 = sst [smem:[#allocation10_spill]] %s4940_s5 }
   0x7   :  { %s4978_s26 = sld [smem:[#allocation6_spill]]  ;;  %v4147_v1 = vmov 0.0   ;;  %vm88_vm0 = vcmask 130048   ;;  %vm4148_vm1 = vmmov 0  }
   0x8   :  { %3632 = vmatprep.subr.bf16.mxu0 %v4147_v1  ;;  %s4979_s28 = sld [smem:[#allocation5_spill]]  ;;  %3638 = vmatprep.subr.bf16.mxu1 %v4147_v1 }
   0x9   :  { %3634 = vmatprep.mubr.msk.bf16.mxu0 %vm4148_vm1, %v4147_v1  ;;  %3642 = vmatprep.mubr.msk.bf16.mxu1 %vm4148_vm1, %v4147_v1 }
   0xd   :  { %v3998_v0 = vld [vmem:[%s4978_s26] sm:$0xff]  }
   0xe   :  { %v70_v2 = vld [vmem:[%s4979_s28] sm:$0xff]  ;;  %v71_v3 = vld [vmem:[%s4979_s28 + $0x8] sm:$0xff]  ;;  %3633 = vmatpush3.bf16.msra.mxu0 %v3998_v0 }
   0xf   :  { %v72_v4 = vpack.c.bf16 %v71_v3, %v70_v2  ;;  %3646 = vmatprep.subr.bf16.mxu0 %v4147_v1 }
  0x11   :  { %3635 = vmatmul.mubr.msk.bf16.vlgmr.msra.gmra.mxu0 %vm88_vm0, %v72_v4 }
  0x12   :  { %3648 = vmatprep.mubr.msk.bf16.mxu0 %vm4148_vm1, %v4147_v1 }
  0x13   :  { %26 = vsyncpa [#allocation3], 0  ;;  %s4980_s5 = sld [smem:[#allocation9_spill]]  ;;  %vm168_vm2 = vcmask 261120   ;;  %s4149_s0 = smov 96   ;;  %vm225_vm3 = vcmask 64512  }
  0x14   :  { %s4981_s2 = sld [smem:[#allocation7_spill]]  ;;  %s4150_s4 = smov 64   ;;  %vm351_vm4 = vcmask 1043456   ;;  %vm3274_vm5 = vcmask 1040384   ;;  %vm3347_vm6 = vcmask 25600  }
  0x15   :  { %s4982_s27 = sld [smem:[#allocation8_spill]]  ;;  %s4151_s30 = smov 88  }
  0x16   :  { %s4983_s29 = sld [smem:[#allocation10_spill]]  ;;  %s4152_s22 = smov 120  }
  0x17   :  { %s4153_s23 = smov 56   ;;  %s4968_s1 = smov 112  }
  0x18   :  { %s4970_s24 = smov 80   ;;  %s4966_s3 = smov 48  }
  0x19   :  { %v3999_v5 = vld [vmem:[%s4980_s5 + $0x8] sm:$0xff]   ;;  %v4000_v6 = vld [vmem:[%s4980_s5] sm:$0xff]   ;;  %s4964_s28 = smov 72   ;;  %s4988_s25 = smov 104  }
  0x1a   :  { %3639 = vmatpush3.bf16.msra.mxu1 %v3999_v5  ;;  %v3363_v7 = vld [vmem:[%s4981_s2] ss:$0 sm:$0xff]  ;;  %s4962_s2 = smov 104  }
  0x1b   :  { %3640 = vmatprep.subr.bf16.mxu1 %v4147_v1  ;;  %v3366_v14 = vld [vmem:[%s4982_s27] ss:$0 sm:$0xff]  ;;  %s4960_s27 = smov 40  }
  0x1c   :  { %v3367_v20 = vld [vmem:[%s4983_s29] ss:$0 sm:$0xff] }
  0x1e   :  { %3641 = vmatpush3.bf16.msra.mxu1 %v4000_v6 }
  0x1f   :  { %3652 = vmatprep.subr.bf16.mxu1 %v4147_v1 }
  0xd1   :  { %v126_v8 = vpop.f32.mrf.mxu0 }
  0xd2   :  { %v127_v9 = vadd.f32 %v3363_v7, %v126_v8 }
  0xd3   :  { %v3636_v10 = vpop.f32.mrf.mxu0 }
  0xd4   :  { %v133_v12 = vmul.f32 5.656854, %v127_v9 }
  0xd5   :  { %v129_v11 = vpop.f32.mrf.mxu0 }
  0xd6   :  { %v130_v13 = vadd.f32 %v3363_v7, %v129_v11  ;;  %v4305_v17 = vadd.f32 %v3366_v14, %v133_v12 }
  0xd7   :  { %v3637_v15 = vpop.f32.mrf.mxu0 }
  0xd8   :  { %v134_v16 = vmul.f32 5.656854, %v130_v13 }
  0xda   :  { %v4307_v18 = vadd.f32 %v3366_v14, %v134_v16 }
  0xdc   :  { %v144_v19 = vpack.c.bf16 %v4307_v18, %v4305_v17 }
  0xde   :  { %3643 = vmatmul.mubr.msk.bf16.vlgmr.msra.gmra.mxu1 %vm168_vm2, %v144_v19 }
  0xdf   :  { %3654 = vmatprep.mubr.msk.bf16.mxu1 %vm4148_vm1, %v4147_v1 }
 0x19e   :  { %v206_v21 = vpop.f32.mrf.mxu1 }
 0x19f   :  { %v207_v22 = vadd.f32 %v3367_v20, %v206_v21 }
 0x1a0   :  { %v3644_v23 = vpop.f32.mrf.mxu1 }
 0x1a1   :  { %v4317_v24 = vpack.c.bf16 %v207_v22, %v207_v22 }
 0x1a2   :  { %v209_v25 = vpop.f32.mrf.mxu1 }
 0x1a3   :  { %v210_v26 = vadd.f32 %v3367_v20, %v209_v25  ;;  %223 = vrot.lane.b32.xlu0 %v4317_v24, %s4149_s0 }
 0x1a4   :  { %v3645_v27 = vpop.f32.mrf.mxu1 }
 0x1a5   :  { %v4321_v28 = vpack.c.bf16 %v210_v26, %v210_v26 }
 0x1a7   :  { %272 = vrot.lane.b32.xlu0 %v4321_v28, %s4149_s0 }
 0x215   :  { %v224_v29 = vpop.permute.xlu0 %223 }
 0x216   :  { %v230_v30 = vsel %vm225_vm3, %v224_v29, 0 }
 0x217   :  { %3647 = vmatpush3.bf16.xpose.msra.mxu0 %v230_v30 }
 0x218   :  { %3658 = vmatprep.subr.bf16.mxu0 %v4147_v1 }
 0x219   :  { %v273_v31 = vpop.permute.xlu0 %272 }
 0x21a   :  { %v278_v32 = vsel %vm225_vm3, %v273_v31, 0 }
 0x21b   :  { %3653 = vmatpush3.bf16.xpose.msra.mxu1 %v278_v32 }
 0x21c   :  { %3664 = vmatprep.subr.bf16.mxu1 %v4147_v1 }
 0x21e   :  { %3649 = vmatmul.mubr.msk.bf16.vlgmr.msra.gmra.mxu0 %vm225_vm3, %v4317_v24 }
 0x21f   :  { %3660 = vmatprep.mubr.msk.bf16.mxu0 %vm4148_vm1, %v4147_v1 }
 0x222   :  { %3655 = vmatmul.mubr.msk.bf16.vlgmr.msra.gmra.mxu1 %vm225_vm3, %v4321_v28 }
 0x223   :  { %3666 = vmatprep.mubr.msk.bf16.mxu1 %vm4148_vm1, %v4147_v1 }
 0x2de   :  { %v266_v33 = vpop.f32.mrf.mxu0 }
 0x2df   :  { %v320_v34 = vmul.f32 0.35355338, %v266_v33 }
 0x2e0   :  { %v3650_v35 = vpop.f32.mrf.mxu0 }
 0x2e1   :  { %v322_v36 = vsel %vm225_vm3, %v320_v34, -inf }
 0x2e2   :  { %v314_v37 = vpop.f32.mrf.mxu1  ;;  %323 = vmax.xlane.f32.xlu1 %v322_v36  ;;  %v269_v38 = vpop.f32.mrf.mxu0 }
 0x2e3   :  { %v321_v39 = vmul.f32 0.35355338, %v314_v37 }
 0x2e4   :  { %v3651_v40 = vpop.f32.mrf.mxu0  ;;  %v3656_v41 = vpop.f32.mrf.mxu1 }
 0x2e5   :  { %v325_v42 = vsel %vm225_vm3, %v321_v39, -inf }
 0x2e6   :  { %v317_v43 = vpop.f32.mrf.mxu1  ;;  %326 = vmax.xlane.f32.xlu1 %v325_v42 }
 0x2e8   :  { %v3657_v44 = vpop.f32.mrf.mxu1 }
 0x2f7   :  { %346 = vrot.lane.b32.xlu1 %v4317_v24, %s4150_s4 }
 0x2fb   :  { %395 = vrot.lane.b32.xlu1 %v4321_v28, %s4150_s4 }
 0x2ff   :  { %446 = vrot.lane.b32.xlu1 %v4317_v24, %s4151_s30 }
 0x36b   :  { %v324_v45 = vpop.xlane.xlu1 %323 }
 0x36c   :  { %v328_v46 = vsub.f32 %v320_v34, %v324_v45 }
 0x36e   :  { %v330_v47 = vmul.f32 1.442695, %v328_v46 }
 0x36f   :  { %v327_v48 = vpop.xlane.xlu1 %326 }
 0x370   :  { %4029 = vpow2.f32 %v330_v47  ;;  %v329_v49 = vsub.f32 %v321_v39, %v327_v48 }
 0x372   :  { %v332_v50 = vmul.f32 1.442695, %v329_v49 }
 0x373   :  { %v347_v51 = vpop.permute.xlu1 %346 }
 0x374   :  { %4031 = vpow2.f32 %v332_v50  ;;  %v353_v52 = vsel %vm351_vm4, %v347_v51, 0 }
 0x375   :  { %3659 = vmatpush3.bf16.msra.mxu0 %v353_v52 }
 0x376   :  { %3670 = vmatprep.subr.bf16.mxu0 %v4147_v1 }
 0x377   :  { %v396_v53 = vpop.permute.xlu1 %395 }
 0x378   :  { %v401_v54 = vsel %vm351_vm4, %v396_v53, 0 }
 0x379   :  { %3665 = vmatpush3.bf16.msra.mxu1 %v401_v54 }
 0x37a   :  { %3676 = vmatprep.subr.bf16.mxu1 %v4147_v1 }
 0x37b   :  { %v447_v59 = vpop.permute.xlu1 %446 }
 0x37c   :  { %v452_v3 = vsel %vm225_vm3, %v447_v59, 0 }
 0x37d   :  { %v4030_v55 = vpop.eup %4029 }
 0x37e   :  { %v334_v56 = vsel %vm225_vm3, %v4030_v55, 0.0 }
 0x37f   :  { %335 = vadd.xlane.f32.xlu0 %v334_v56 }
 0x381   :  { %v4032_v57 = vpop.eup %4031 }
 0x382   :  { %v337_v58 = vsel %vm225_vm3, %v4032_v57, 0.0 }
 0x383   :  { %338 = vadd.xlane.f32.xlu1 %v337_v58 }
 0x394   :  { %496 = vrot.lane.b32.xlu1 %v4321_v28, %s4151_s30 }
 0x395   :  { %444 = vrot.lane.b32.xlu0 %v4317_v24, %s4152_s22 }
 0x398   :  { %494 = vrot.lane.b32.xlu1 %v4321_v28, %s4152_s22 }
 0x408   :  { %v336_v60 = vpop.xlane.xlu0 %335 }
 0x409   :  { %4033 = vrcp.f32 %v336_v60 }
 0x40c   :  { %v339_v61 = vpop.xlane.xlu1 %338  ;;  %v445_v8 = vpop.permute.xlu0 %444 }
 0x40d   :  { %4035 = vrcp.f32 %v339_v61 }
 0x410   :  { %v497_v5 = vpop.permute.xlu1 %496 }
 0x411   :  { %v502_v7 = vsel %vm225_vm3, %v497_v5, 0 }
 0x414   :  { %v495_v9 = vpop.permute.xlu1 %494 }
 0x416   :  { %v4034_v62 = vpop.eup %4033 }
 0x417   :  { %v341_v63 = vmul.f32 %v4034_v62, %v4030_v55  ;;  %v214_v55 = vld [vmem:[%s4941_s6] sm:$0xf] }
 0x418   :  { %v718_v58 = vsel %vm351_vm4, %v214_v55, 0 }
 0x419   :  { %v344_v0 = vpack.c.bf16 %v341_v63, %v341_v63  ;;  %v215_v63 = vld [vmem:[%s4941_s6 + $0x4] sm:$0xf] }
 0x41a   :  { %v4036_v2 = vpop.eup %4035 }
 0x41b   :  { %3661 = vmatmul.mubr.msk.bf16.vlgmr.msra.gmra.mxu0 %vm225_vm3, %v344_v0  ;;  %v343_v4 = vmul.f32 %v4036_v2, %v4032_v57  ;;  %v671_v0 = vsel %vm351_vm4, %v215_v63, 0 }
 0x41c   :  { %3671 = vmatpush3.bf16.xpose.msra.mxu0 %v452_v3  ;;  %3672 = vmatprep.mubr.msk.bf16.mxu0 %vm4148_vm1, %v4147_v1 }
 0x41d   :  { %v345_v6 = vpack.c.bf16 %v343_v4, %v343_v4  ;;  %3682 = vmatprep.subr.bf16.mxu0 %v4147_v1 }
 0x41f   :  { %3667 = vmatmul.mubr.msk.bf16.vlgmr.msra.gmra.mxu1 %vm225_vm3, %v345_v6 }
 0x420   :  { %3677 = vmatpush3.bf16.xpose.msra.mxu1 %v502_v7  ;;  %3678 = vmatprep.mubr.msk.bf16.mxu1 %vm4148_vm1, %v4147_v1 }
 0x421   :  { %3688 = vmatprep.subr.bf16.mxu1 %v4147_v1 }
 0x423   :  { %3673 = vmatmul.mubr.msk.bf16.vlgmr.msra.gmra.mxu0 %vm225_vm3, %v445_v8 }
 0x424   :  { %3684 = vmatprep.mubr.msk.bf16.mxu0 %vm4148_vm1, %v4147_v1 }
 0x427   :  { %3679 = vmatmul.mubr.msk.bf16.vlgmr.msra.gmra.mxu1 %vm225_vm3, %v495_v9 }
 0x428   :  { %3690 = vmatprep.mubr.msk.bf16.mxu1 %vm4148_vm1, %v4147_v1 }
 0x4db   :  { %v4373_v10 = vpop.f32.mrf.mxu0 }
 0x4dd   :  { %v3662_v11 = vpop.f32.mrf.mxu0 }
 0x4df   :  { %v392_v12 = vpop.f32.mrf.mxu0  ;;  %v4375_v13 = vpop.f32.mrf.mxu1 }
 0x4e0   :  { %v443_v14 = vpack.c.bf16 %v4375_v13, %v4373_v10 }
 0x4e1   :  { %v3663_v15 = vpop.f32.mrf.mxu0  ;;  %v3668_v16 = vpop.f32.mrf.mxu1 }
 0x4e3   :  { %v440_v19 = vpop.f32.mrf.mxu1  ;;  %v488_v20 = vpop.f32.mrf.mxu0 }
 0x4e4   :  { %v544_v21 = vmul.f32 0.35355338, %v488_v20 }
 0x4e5   :  { %v3669_v22 = vpop.f32.mrf.mxu1  ;;  %v3674_v23 = vpop.f32.mrf.mxu0 }
 0x4e6   :  { %v546_v25 = vsel %vm225_vm3, %v544_v21, -inf }
 0x4e7   :  { %v538_v26 = vpop.f32.mrf.mxu1  ;;  %547 = vmax.xlane.f32.xlu1 %v546_v25  ;;  %v491_v27 = vpop.f32.mrf.mxu0 }
 0x4e8   :  { %v545_v29 = vmul.f32 0.35355338, %v538_v26 }
 0x4e9   :  { %v3675_v30 = vpop.f32.mrf.mxu0  ;;  %v3680_v31 = vpop.f32.mrf.mxu1 }
 0x4ea   :  { %v549_v32 = vsel %vm225_vm3, %v545_v29, -inf }
 0x4eb   :  { %550 = vmax.xlane.f32.xlu0 %v549_v32  ;;  %v541_v33 = vpop.f32.mrf.mxu1 }
 0x4ed   :  { %v3681_v34 = vpop.f32.mrf.mxu1 }
 0x501   :  { %618 = vrot.lane.b32.xlu0 %v4321_v28, %s4153_s23 }
 0x505   :  { %761 = vrot.lane.b32.xlu0 %v4317_v24, %s4968_s1 }
 0x570   :  { %v548_v35 = vpop.xlane.xlu1 %547 }
 0x571   :  { %v552_v36 = vsub.f32 %v544_v21, %v548_v35 }
 0x573   :  { %v554_v37 = vmul.f32 1.442695, %v552_v36 }
 0x574   :  { %v551_v38 = vpop.xlane.xlu0 %550 }
 0x575   :  { %4037 = vpow2.f32 %v554_v37  ;;  %v553_v39 = vsub.f32 %v545_v29, %v551_v38 }
 0x577   :  { %v556_v40 = vmul.f32 1.442695, %v553_v39 }
 0x578   :  { %v619_v41 = vpop.permute.xlu0 %618 }
 0x579   :  { %4039 = vpow2.f32 %v556_v40  ;;  %v624_v42 = vsel %vm351_vm4, %v619_v41, 0 }
 0x57a   :  { %3689 = vmatpush3.bf16.msra.mxu1 %v624_v42 }
 0x57b   :  { %3700 = vmatprep.subr.bf16.mxu1 %v4147_v1 }
 0x57c   :  { %v762_v13 = vpop.permute.xlu0 %761 }
 0x582   :  { %v4038_v43 = vpop.eup %4037 }
 0x583   :  { %v558_v44 = vsel %vm225_vm3, %v4038_v43, 0.0 }
 0x584   :  { %559 = vadd.xlane.f32.xlu1 %v558_v44 }
 0x586   :  { %v4040_v45 = vpop.eup %4039 }
 0x587   :  { %v561_v46 = vsel %vm225_vm3, %v4040_v45, 0.0 }
 0x588   :  { %562 = vadd.xlane.f32.xlu1 %v561_v46 }
 0x599   :  { %570 = vrot.lane.b32.xlu1 %v4317_v24, %s4153_s23 }
 0x59d   :  { %763 = vrot.lane.b32.xlu1 %v4317_v24, %s4970_s24 }
 0x5a1   :  { %813 = vrot.lane.b32.xlu1 %v4321_v28, %s4970_s24  ;;  %s4986_s24 = smov 48  }
 0x5a5   :  { %811 = vrot.lane.b32.xlu1 %v4321_v28, %s4968_s1 }
 0x60d   :  { %v560_v47 = vpop.xlane.xlu1 %559 }
 0x60e   :  { %4041 = vrcp.f32 %v560_v47 }
 0x611   :  { %v563_v48 = vpop.xlane.xlu1 %562 }
 0x612   :  { %4043 = vrcp.f32 %v563_v48 }
 0x615   :  { %v571_v49 = vpop.permute.xlu1 %570 }
 0x616   :  { %v576_v50 = vsel %vm351_vm4, %v571_v49, 0 }
 0x617   :  { %3683 = vmatpush3.bf16.msra.mxu0 %v576_v50 }
 0x618   :  { %3694 = vmatprep.subr.bf16.mxu0 %v4147_v1 }
 0x619   :  { %v764_v59 = vpop.permute.xlu1 %763 }
 0x61a   :  { %v769_v9 = vsel %vm225_vm3, %v764_v59, 0 }
 0x61b   :  { %v4042_v51 = vpop.eup %4041 }
 0x61c   :  { %v565_v52 = vmul.f32 %v4042_v51, %v4038_v43 }
 0x61d   :  { %v814_v60 = vpop.permute.xlu1 %813 }
 0x61e   :  { %v568_v53 = vpack.c.bf16 %v565_v52, %v565_v52  ;;  %v819_v61 = vsel %vm225_vm3, %v814_v60, 0 }
 0x61f   :  { %v4044_v54 = vpop.eup %4043 }
 0x620   :  { %3685 = vmatmul.mubr.msk.bf16.vlgmr.msra.gmra.mxu0 %vm225_vm3, %v568_v53  ;;  %v567_v56 = vmul.f32 %v4044_v54, %v4040_v45 }
 0x621   :  { %3696 = vmatprep.mubr.msk.bf16.mxu0 %vm4148_vm1, %v4147_v1  ;;  %v812_v62 = vpop.permute.xlu1 %811  ;;  %3695 = vmatpush3.bf16.msra.mxu0 %v671_v0 }
 0x622   :  { %v569_v57 = vpack.c.bf16 %v567_v56, %v567_v56  ;;  %3706 = vmatprep.subr.bf16.mxu0 %v4147_v1 }
 0x624   :  { %3691 = vmatmul.mubr.msk.bf16.vlgmr.msra.gmra.mxu1 %vm225_vm3, %v569_v57 }
 0x625   :  { %3701 = vmatpush3.bf16.msra.mxu1 %v718_v58  ;;  %3702 = vmatprep.mubr.msk.bf16.mxu1 %vm4148_vm1, %v4147_v1 }
 0x626   :  { %3712 = vmatprep.subr.bf16.mxu1 %v4147_v1 }
 0x62c   :  { %3703 = vmatmul.mubr.msk.bf16.vlgmr.msra.gmra.mxu1 %vm225_vm3, %v443_v14 }
 0x62d   :  { %3713 = vmatpush3.bf16.xpose.msra.mxu1 %v819_v61  ;;  %3714 = vmatprep.mubr.msk.bf16.mxu1 %vm4148_vm1, %v4147_v1 }
 0x62e   :  { %3724 = vmatprep.subr.bf16.mxu1 %v4147_v1 }
 0x634   :  { %3715 = vmatmul.mubr.msk.bf16.vlgmr.msra.gmra.mxu1 %vm225_vm3, %v812_v62  ;;  %v216_v62 = vld [vmem:[%s4941_s6 + $0x8] sm:$0xf] }
 0x635   :  { %3726 = vmatprep.mubr.msk.bf16.mxu1 %vm4148_vm1, %v4147_v1  ;;  %v988_v63 = vsel %vm351_vm4, %v216_v62, 0 }
 0x6e0   :  { %v612_v2 = vpop.f32.mrf.mxu0 }
 0x6e2   :  { %v3686_v3 = vpop.f32.mrf.mxu0 }
 0x6e4   :  { %v615_v4 = vpop.f32.mrf.mxu0  ;;  %v660_v5 = vpop.f32.mrf.mxu1 }
 0x6e5   :  { %v666_v6 = vpack.c.bf16 %v660_v5, %v612_v2 }
 0x6e6   :  { %v3687_v7 = vpop.f32.mrf.mxu0  ;;  %v3692_v8 = vpop.f32.mrf.mxu1 }
 0x6e7   :  { %3697 = vmatmul.mubr.msk.bf16.vlgmr.msra.gmra.mxu0 %vm225_vm3, %v666_v6 }
 0x6e8   :  { %3707 = vmatpush3.bf16.xpose.msra.mxu0 %v769_v9  ;;  %v663_v10 = vpop.f32.mrf.mxu1  ;;  %3708 = vmatprep.mubr.msk.bf16.mxu0 %vm4148_vm1, %v4147_v1 }
 0x6e9   :  { %3718 = vmatprep.subr.bf16.mxu0 %v4147_v1 }
 0x6ea   :  { %v3693_v11 = vpop.f32.mrf.mxu1 }
 0x6ec   :  { %v4431_v12 = vpop.f32.mrf.mxu1 }
 0x6ee   :  { %v3704_v14 = vpop.f32.mrf.mxu1 }
 0x6ef   :  { %3709 = vmatmul.mubr.msk.bf16.vlgmr.msra.gmra.mxu0 %vm225_vm3, %v762_v13 }
 0x6f0   :  { %v4434_v15 = vpop.f32.mrf.mxu1  ;;  %3720 = vmatprep.mubr.msk.bf16.mxu0 %vm4148_vm1, %v4147_v1 }
 0x6f2   :  { %v3705_v16 = vpop.f32.mrf.mxu1 }
 0x6f4   :  { %v855_v19 = vpop.f32.mrf.mxu1 }
 0x6f5   :  { %v862_v20 = vmul.f32 0.35355338, %v855_v19 }
 0x6f6   :  { %v3716_v21 = vpop.f32.mrf.mxu1 }
 0x6f7   :  { %v866_v22 = vsel %vm225_vm3, %v862_v20, -inf }
 0x6f8   :  { %867 = vmax.xlane.f32.xlu1 %v866_v22  ;;  %v858_v23 = vpop.f32.mrf.mxu1 }
 0x6fa   :  { %v3717_v25 = vpop.f32.mrf.mxu1 }
 0x709   :  { %887 = vrot.lane.b32.xlu1 %v4317_v24, %s4966_s3 }
 0x70d   :  { %1035 = vrot.lane.b32.xlu1 %v4317_v24, %s4964_s28 }
 0x711   :  { %1085 = vrot.lane.b32.xlu1 %v4321_v28, %s4964_s28  ;;  %s4987_s28 = smov 72  }
 0x715   :  { %1083 = vrot.lane.b32.xlu1 %v4321_v28, %s4962_s2 }
 0x781   :  { %v868_v26 = vpop.xlane.xlu1 %867 }
 0x782   :  { %v870_v30 = vsub.f32 %v862_v20, %v868_v26 }
 0x784   :  { %v873_v31 = vmul.f32 1.442695, %v870_v30 }
 0x785   :  { %v888_v27 = vpop.permute.xlu1 %887 }
 0x786   :  { %v893_v29 = vsel %vm351_vm4, %v888_v27, 0  ;;  %4045 = vpow2.f32 %v873_v31 }
 0x787   :  { %3719 = vmatpush3.bf16.msra.mxu0 %v893_v29 }
 0x788   :  { %3730 = vmatprep.subr.bf16.mxu0 %v4147_v1 }
 0x789   :  { %v1036_v55 = vpop.permute.xlu1 %1035 }
 0x78a   :  { %v1041_v57 = vsel %vm225_vm3, %v1036_v55, 0 }
 0x78d   :  { %v1086_v6 = vpop.permute.xlu1 %1085 }
 0x78e   :  { %v1091_v16 = vsel %vm225_vm3, %v1086_v6, 0  ;;  %v3393_v6 = vld [vmem:[%s4942_s7] ss:$0 sm:$0xff] }
 0x791   :  { %v1084_v22 = vpop.permute.xlu1 %1083 }
 0x793   :  { %v4046_v40 = vpop.eup %4045 }
 0x794   :  { %v878_v43 = vsel %vm225_vm3, %v4046_v40, 0.0 }
 0x7a7   :  { %v4449_v32 = vpop.f32.mrf.mxu0 }
 0x7a8   :  { %v755_v30 = vadd.f32 %v4431_v12, %v4449_v32 }
 0x7a9   :  { %v3698_v33 = vpop.f32.mrf.mxu0 }
 0x7ab   :  { %v4451_v34 = vpop.f32.mrf.mxu0 }
 0x7ad   :  { %v3699_v35 = vpop.f32.mrf.mxu0 }
 0x7af   :  { %v805_v36 = vpop.f32.mrf.mxu0 }
 0x7b0   :  { %v861_v37 = vmul.f32 0.35355338, %v805_v36  ;;  %v758_v36 = vadd.f32 %v4434_v15, %v4451_v34 }
 0x7b1   :  { %v3710_v38 = vpop.f32.mrf.mxu0 }
 0x7b2   :  { %v863_v39 = vsel %vm225_vm3, %v861_v37, -inf }
 0x7b3   :  { %864 = vmax.xlane.f32.xlu0 %v863_v39  ;;  %v808_v41 = vpop.f32.mrf.mxu0 }
 0x7b5   :  { %v3711_v42 = vpop.f32.mrf.mxu0 }
 0x7b7   :  { %879 = vadd.xlane.f32.xlu0 %v878_v43 }
 0x83c   :  { %v865_v44 = vpop.xlane.xlu0 %864 }
 0x83d   :  { %v869_v45 = vsub.f32 %v861_v37, %v865_v44 }
 0x83f   :  { %v871_v46 = vmul.f32 1.442695, %v869_v45 }
 0x840   :  { %v880_v49 = vpop.xlane.xlu0 %879 }
 0x841   :  { %4047 = vpow2.f32 %v871_v46 }
 0x842   :  { %4049 = vrcp.f32 %v880_v49 }
 0x84e   :  { %v4048_v47 = vpop.eup %4047 }
 0x84f   :  { %v875_v48 = vsel %vm225_vm3, %v4048_v47, 0.0  ;;  %v4050_v50 = vpop.eup %4049 }
 0x850   :  { %876 = vadd.xlane.f32.xlu0 %v875_v48  ;;  %v884_v52 = vmul.f32 %v4050_v50, %v4046_v40 }
 0x852   :  { %v886_v56 = vpack.c.bf16 %v884_v52, %v884_v52  ;;  %v217_v52 = vld [vmem:[%s4941_s6 + $0xc] sm:$0xf] }
 0x866   :  { %935 = vrot.lane.b32.xlu0 %v4321_v28, %s4966_s3 }
 0x86a   :  { %1033 = vrot.lane.b32.xlu0 %v4317_v24, %s4962_s2 }
 0x8d9   :  { %v877_v51 = vpop.xlane.xlu0 %876 }
 0x8da   :  { %4051 = vrcp.f32 %v877_v51 }
 0x8dd   :  { %v936_v53 = vpop.permute.xlu0 %935 }
 0x8de   :  { %v941_v54 = vsel %vm351_vm4, %v936_v53, 0  ;;  %v1260_v53 = vsel %vm351_vm4, %v217_v52, 0 }
 0x8df   :  { %3725 = vmatpush3.bf16.msra.mxu1 %v941_v54 }
 0x8e0   :  { %3736 = vmatprep.subr.bf16.mxu1 %v4147_v1 }
 0x8e1   :  { %v1034_v60 = vpop.permute.xlu0 %1033 }
 0x8e2   :  { %3727 = vmatmul.mubr.msk.bf16.vlgmr.msra.gmra.mxu1 %vm225_vm3, %v886_v56 }
 0x8e3   :  { %3737 = vmatpush3.bf16.xpose.msra.mxu1 %v1041_v57  ;;  %3738 = vmatprep.mubr.msk.bf16.mxu1 %vm4148_vm1, %v4147_v1 }
 0x8e4   :  { %3748 = vmatprep.subr.bf16.mxu1 %v4147_v1 }
 0x8e7   :  { %v4052_v58 = vpop.eup %4051 }
 0x8e8   :  { %v882_v59 = vmul.f32 %v4052_v58, %v4048_v47 }
 0x8ea   :  { %3739 = vmatmul.mubr.msk.bf16.vlgmr.msra.gmra.mxu1 %vm225_vm3, %v1034_v60  ;;  %v885_v61 = vpack.c.bf16 %v882_v59, %v882_v59 }
 0x8eb   :  { %3750 = vmatprep.mubr.msk.bf16.mxu1 %vm4148_vm1, %v4147_v1 }
 0x8ec   :  { %3721 = vmatmul.mubr.msk.bf16.vlgmr.msra.gmra.mxu0 %vm225_vm3, %v885_v61 }
 0x8ed   :  { %3732 = vmatprep.mubr.msk.bf16.mxu0 %vm4148_vm1, %v4147_v1  ;;  %3731 = vmatpush3.bf16.msra.mxu0 %v988_v63 }
 0x8ee   :  { %3742 = vmatprep.subr.bf16.mxu0 %v4147_v1 }
 0x9a2   :  { %v977_v0 = vpop.f32.mrf.mxu1 }
 0x9a4   :  { %v3728_v2 = vpop.f32.mrf.mxu1 }
 0x9a6   :  { %v980_v3 = vpop.f32.mrf.mxu1 }
 0x9a8   :  { %v3729_v4 = vpop.f32.mrf.mxu1 }
 0x9aa   :  { %v1077_v5 = vpop.f32.mrf.mxu1 }
 0x9ab   :  { %v1133_v7 = vmul.f32 0.35355338, %v1077_v5 }
 0x9ac   :  { %v929_v8 = vpop.f32.mrf.mxu0  ;;  %v3740_v9 = vpop.f32.mrf.mxu1 }
 0x9ad   :  { %v983_v10 = vpack.c.bf16 %v977_v0, %v929_v8  ;;  %v1135_v11 = vsel %vm225_vm3, %v1133_v7, -inf }
 0x9ae   :  { %1136 = vmax.xlane.f32.xlu0 %v1135_v11  ;;  %v3722_v13 = vpop.f32.mrf.mxu0  ;;  %v1080_v14 = vpop.f32.mrf.mxu1 }
 0x9af   :  { %3733 = vmatmul.mubr.msk.bf16.vlgmr.msra.gmra.mxu0 %vm225_vm3, %v983_v10 }
 0x9b0   :  { %3743 = vmatpush3.bf16.xpose.msra.mxu0 %v1091_v16  ;;  %v932_v19 = vpop.f32.mrf.mxu0  ;;  %v3741_v20 = vpop.f32.mrf.mxu1  ;;  %3744 = vmatprep.mubr.msk.bf16.mxu0 %vm4148_vm1, %v4147_v1 }
 0x9b1   :  { %3754 = vmatprep.subr.bf16.mxu0 %v4147_v1 }
 0x9b2   :  { %v3723_v21 = vpop.f32.mrf.mxu0 }
 0x9b7   :  { %3745 = vmatmul.mubr.msk.bf16.vlgmr.msra.gmra.mxu0 %vm225_vm3, %v1084_v22 }
 0x9b8   :  { %3756 = vmatprep.mubr.msk.bf16.mxu0 %vm4148_vm1, %v4147_v1 }
 0xa37   :  { %v1137_v23 = vpop.xlane.xlu0 %1136 }
 0xa38   :  { %v1141_v25 = vsub.f32 %v1133_v7, %v1137_v23 }
 0xa3a   :  { %v1143_v26 = vmul.f32 1.442695, %v1141_v25 }
 0xa3c   :  { %4053 = vpow2.f32 %v1143_v26 }
 0xa49   :  { %v4054_v27 = vpop.eup %4053 }
 0xa4a   :  { %v1147_v29 = vsel %vm225_vm3, %v4054_v27, 0.0 }
 0xa4b   :  { %1148 = vadd.xlane.f32.xlu0 %v1147_v29 }
 0xa6f   :  { %v1024_v31 = vpop.f32.mrf.mxu0 }
 0xa70   :  { %v1031_v33 = vadd.f32 %v1024_v31, %v755_v30 }
 0xa71   :  { %v3734_v35 = vpop.f32.mrf.mxu0 }
 0xa72   :  { %v4002_v35 = vld [vmem:[%s4945_s10] sm:$0xff]  }
 0xa73   :  { %v1027_v37 = vpop.f32.mrf.mxu0 }
 0xa74   :  { %v1032_v38 = vadd.f32 %v1027_v37, %v758_v36  ;;  %v4003_v36 = vld [vmem:[%s4947_s12 + $0x38] sm:$0xff]   ;;  %v4004_v37 = vld [vmem:[%s4947_s12 + $0x30] sm:$0xff]  }
 0xa75   :  { %v3735_v39 = vpop.f32.mrf.mxu0 }
 0xa76   :  { %v4006_v39 = vld [vmem:[%s4947_s12 + $0x20] sm:$0xff]  }
 0xa77   :  { %v1127_v40 = vpop.f32.mrf.mxu0 }
 0xa78   :  { %v1134_v41 = vmul.f32 0.35355338, %v1127_v40  ;;  %v4007_v40 = vld [vmem:[%s4947_s12 + $0x18] sm:$0xff]  }
 0xa79   :  { %v3746_v42 = vpop.f32.mrf.mxu0 }
 0xa7a   :  { %v1138_v43 = vsel %vm225_vm3, %v1134_v41, -inf }
 0xa7b   :  { %1139 = vmax.xlane.f32.xlu1 %v1138_v43  ;;  %v1130_v44 = vpop.f32.mrf.mxu0 }
 0xa7d   :  { %v3747_v45 = vpop.f32.mrf.mxu0 }
 0xa8c   :  { %1159 = vrot.lane.b32.xlu1 %v4317_v24, %s4960_s27 }
 0xad4   :  { %v1149_v12 = vpop.xlane.xlu0 %1148 }
 0xad5   :  { %4055 = vrcp.f32 %v1149_v12 }
 0xae2   :  { %v4056_v32 = vpop.eup %4055 }
 0xae3   :  { %v1154_v47 = vmul.f32 %v4056_v32, %v4054_v27 }
 0xae5   :  { %v1157_v50 = vpack.c.bf16 %v1154_v47, %v1154_v47 }
 0xb04   :  { %v1140_v46 = vpop.xlane.xlu1 %1139 }
 0xb05   :  { %v1142_v15 = vsub.f32 %v1134_v41, %v1140_v46 }
 0xb07   :  { %v1145_v34 = vmul.f32 1.442695, %v1142_v15  ;;  %v3394_v15 = vld [vmem:[%s4943_s8] ss:$0 sm:$0xff] }
 0xb08   :  { %v1160_v48 = vpop.permute.xlu1 %1159 }
 0xb09   :  { %4057 = vpow2.f32 %v1145_v34  ;;  %v1165_v49 = vsel %vm351_vm4, %v1160_v48, 0 }
 0xb0a   :  { %3749 = vmatpush3.bf16.msra.mxu1 %v1165_v49  ;;  %v3395_v49 = vld [vmem:[%s4944_s9] ss:$0 sm:$0xff] }
 0xb0b   :  { %3760 = vmatprep.subr.bf16.mxu1 %v4147_v1 }
 0xb0d   :  { %3751 = vmatmul.mubr.msk.bf16.vlgmr.msra.gmra.mxu1 %vm225_vm3, %v1157_v50 }
 0xb0e   :  { %3762 = vmatprep.mubr.msk.bf16.mxu1 %vm4148_vm1, %v4147_v1  ;;  %3761 = vmatpush3.bf16.msra.mxu1 %v1260_v53  ;;  %v4008_v53 = vld [vmem:[%s4947_s12 + $0x10] sm:$0xff]  }
 0xb0f   :  { %3774 = vmatprep.subr.bf16.mxu1 %v4147_v1 }
 0xb16   :  { %v4058_v24 = vpop.eup %4057 }
 0xb17   :  { %v1150_v51 = vsel %vm225_vm3, %v4058_v24, 0.0 }
 0xb18   :  { %1151 = vadd.xlane.f32.xlu0 %v1150_v51 }
 0xb2e   :  { %1207 = vrot.lane.b32.xlu0 %v4321_v28, %s4960_s27  ;;  %s4989_s27 = smov 40  }
 0xba1   :  { %v1152_v54 = vpop.xlane.xlu0 %1151 }
 0xba2   :  { %4059 = vrcp.f32 %v1152_v54  ;;  %v4009_v54 = vld [vmem:[%s4947_s12 + $0x8] sm:$0xff]  }
 0xba5   :  { %v1208_v55 = vpop.permute.xlu0 %1207 }
 0xba6   :  { %v1213_v56 = vsel %vm351_vm4, %v1208_v55, 0  ;;  %v4010_v55 = vld [vmem:[%s4947_s12] sm:$0xff]  }
 0xba7   :  { %3755 = vmatpush3.bf16.msra.mxu0 %v1213_v56  ;;  %v3396_v56 = vld [vmem:[%s4946_s11] ss:$0 sm:$0xff] }
 0xba8   :  { %3766 = vmatprep.subr.bf16.mxu0 %v4147_v1 }
 0xbaf   :  { %v4060_v57 = vpop.eup %4059 }
 0xbb0   :  { %v1156_v58 = vmul.f32 %v4060_v57, %v4058_v24 }
 0xbb2   :  { %v1158_v28 = vpack.c.bf16 %v1156_v58, %v1156_v58 }
 0xbb4   :  { %3757 = vmatmul.mubr.msk.bf16.vlgmr.msra.gmra.mxu0 %vm225_vm3, %v1158_v28 }
 0xbb5   :  { %3770 = vmatprep.mubr.msk.bf16.mxu0 %vm4148_vm1, %v4147_v1 }
 0xbcd   :  { %v1201_v59 = vpop.f32.mrf.mxu1 }
 0xbcf   :  { %v3752_v60 = vpop.f32.mrf.mxu1 }
 0xbd1   :  { %v1204_v61 = vpop.f32.mrf.mxu1 }
 0xbd3   :  { %v3753_v62 = vpop.f32.mrf.mxu1 }
 0xc74   :  { %v1249_v63 = vpop.f32.mrf.mxu0 }
 0xc75   :  { %v1255_v0 = vpack.c.bf16 %v1249_v63, %v1201_v59 }
 0xc76   :  { %v3758_v2 = vpop.f32.mrf.mxu0 }
 0xc77   :  { %3763 = vmatmul.mubr.msk.bf16.vlgmr.msra.gmra.mxu1 %vm225_vm3, %v1255_v0  ;;  %v3400_v2 = vld [vmem:[%s4948_s13] ss:$0 sm:$0xff] }
 0xc78   :  { %v1252_v3 = vpop.f32.mrf.mxu0  ;;  %3790 = vmatprep.mubr.msk.bf16.mxu1 %vm4148_vm1, %v4147_v1  ;;  %3775 = vmatpush3.bf16.msra.mxu1 %v4003_v36 }
 0xc79   :  { %3776 = vmatprep.subr.bf16.mxu1 %v4147_v1 }
 0xc7a   :  { %v3759_v4 = vpop.f32.mrf.mxu0 }
 0xc7c   :  { %3777 = vmatpush3.bf16.msra.mxu1 %v4004_v37 }
 0xc7d   :  { %3778 = vmatprep.subr.bf16.mxu1 %v4147_v1 }
 0xd37   :  { %v1296_v5 = vpop.f32.mrf.mxu1 }
 0xd38   :  { %v1303_v7 = vadd.f32 %v1296_v5, %v1031_v33 }
 0xd39   :  { %v3764_v8 = vpop.f32.mrf.mxu1 }
 0xd3a   :  { %v1312_v9 = vadd.f32 %v3393_v6, %v1303_v7 }
 0xd3b   :  { %v1299_v10 = vpop.f32.mrf.mxu1 }
 0xd3c   :  { %v1304_v11 = vadd.f32 %v1299_v10, %v1032_v38  ;;  %v1314_v13 = vadd.f32 %v1312_v9, %v4305_v17  ;;  %v4005_v38 = vld [vmem:[%s4947_s12 + $0x28] sm:$0xff]  }
 0xd3d   :  { %v3765_v14 = vpop.f32.mrf.mxu1  ;;  %3779 = vmatpush3.bf16.msra.mxu1 %v4005_v38 }
 0xd3e   :  { %v1313_v16 = vadd.f32 %v3393_v6, %v1304_v11  ;;  %v1318_v19 = vsel %vm168_vm2, %v1314_v13, 0.0  ;;  %3780 = vmatprep.subr.bf16.mxu1 %v4147_v1 }
 0xd3f   :  { %1319 = vadd.xlane.f32.xlu1 %v1318_v19 }
 0xd40   :  { %v1315_v20 = vadd.f32 %v1313_v16, %v4307_v18  ;;  %v4001_v18 = vld [vmem:[%s4945_s10 + $0x8] sm:$0xff]  }
 0xd41   :  { %3767 = vmatpush3.bf16.msra.mxu0 %v4001_v18  ;;  %3781 = vmatpush3.bf16.msra.mxu1 %v4006_v39  ;;  %v3409_v39 = vld [vmem:[%s4949_s14] ss:$0 sm:$0xff] }
 0xd42   :  { %v1321_v21 = vsel %vm168_vm2, %v1315_v20, 0.0  ;;  %3768 = vmatprep.subr.bf16.mxu0 %v4147_v1  ;;  %3782 = vmatprep.subr.bf16.mxu1 %v4147_v1 }
 0xd43   :  { %1322 = vadd.xlane.f32.xlu0 %v1321_v21 }
 0xd45   :  { %3769 = vmatpush3.bf16.msra.mxu0 %v4002_v35  ;;  %3783 = vmatpush3.bf16.msra.mxu1 %v4007_v40 }
 0xd46   :  { %3794 = vmatprep.subr.bf16.mxu0 %v4147_v1  ;;  %3784 = vmatprep.subr.bf16.mxu1 %v4147_v1 }
 0xd49   :  { %3785 = vmatpush3.bf16.msra.mxu1 %v4008_v53 }
 0xd4a   :  { %3786 = vmatprep.subr.bf16.mxu1 %v4147_v1 }
 0xd4d   :  { %3787 = vmatpush3.bf16.msra.mxu1 %v4009_v54 }
 0xd4e   :  { %3788 = vmatprep.subr.bf16.mxu1 %v4147_v1 }
 0xd51   :  { %3789 = vmatpush3.bf16.msra.mxu1 %v4010_v55 }
 0xd52   :  { %3820 = vmatprep.subr.bf16.mxu1 %v4147_v1 }
 0xdc8   :  { %v1320_v22 = vpop.xlane.xlu1 %1319 }
 0xdc9   :  { %v1325_v23 = vmul.f32 0.03125, %v1320_v22 }
 0xdcb   :  { %v1327_v25 = vsub.f32 %v1314_v13, %v1325_v23 }
 0xdcc   :  { %v1323_v26 = vpop.xlane.xlu0 %1322 }
 0xdcd   :  { %v1326_v27 = vmul.f32 0.03125, %v1323_v26  ;;  %v1329_v29 = vmul.f32 %v1327_v25, %v1327_v25 }
 0xdcf   :  { %v1328_v30 = vsub.f32 %v1315_v20, %v1326_v27  ;;  %v1331_v31 = vsel %vm168_vm2, %v1329_v29, 0.0  ;;  %v4011_v29 = vld [vmem:[%s4980_s5 + $0x18] sm:$0xff]  }
 0xdd0   :  { %1332 = vadd.xlane.f32.xlu1 %v1331_v31 }
 0xdd1   :  { %v1330_v17 = vmul.f32 %v1328_v30, %v1328_v30 }
 0xdd3   :  { %v1334_v33 = vsel %vm168_vm2, %v1330_v17, 0.0 }
 0xdd4   :  { %1335 = vadd.xlane.f32.xlu0 %v1334_v33 }
 0xe59   :  { %v1333_v41 = vpop.xlane.xlu1 %1332 }
 0xe5a   :  { %v1337_v42 = vmul.f32 0.03125, %v1333_v41 }
 0xe5c   :  { %v1339_v43 = vadd.f32 1e-05, %v1337_v42 }
 0xe5d   :  { %v1336_v44 = vpop.xlane.xlu0 %1335 }
 0xe5e   :  { %4061 = vrsqrt.f32 %v1339_v43  ;;  %v1338_v45 = vmul.f32 0.03125, %v1336_v44  ;;  %v3410_v43 = vld [vmem:[%s4950_s15] ss:$0 sm:$0xff] }
 0xe60   :  { %v1340_v12 = vadd.f32 1e-05, %v1338_v45 }
 0xe62   :  { %4063 = vrsqrt.f32 %v1340_v12 }
 0xe6b   :  { %v4062_v32 = vpop.eup %4061 }
 0xe6c   :  { %v1343_v46 = vmul.f32 %v4062_v32, %v1327_v25 }
 0xe6e   :  { %v1351_v48 = vmul.f32 %v3394_v15, %v1343_v46  ;;  %v3416_v46 = vld [vmem:[%s4983_s29 + $0x1] ss:$0 sm:$0xff]  ;;  %s4984_s29 = smov 80  }
 0xe6f   :  { %v4064_v34 = vpop.eup %4063 }
 0xe70   :  { %v1344_v47 = vmul.f32 %v4064_v34, %v1328_v30  ;;  %v1359_v24 = vadd.f32 %v3395_v49, %v1351_v48  ;;  %v4012_v30 = vld [vmem:[%s4980_s5 + $0x10] sm:$0xff]  }
 0xe72   :  { %v1352_v50 = vmul.f32 %v3394_v15, %v1344_v47 }
 0xe74   :  { %v1360_v51 = vadd.f32 %v3395_v49, %v1352_v50 }
 0xe76   :  { %v1361_v52 = vpack.c.bf16 %v1360_v51, %v1359_v24 }
 0xe78   :  { %3771 = vmatmul.mubr.msk.bf16.vlgmr.msra.gmra.mxu0 %vm168_vm2, %v1361_v52 }
 0xe79   :  { %3798 = vmatprep.mubr.msk.bf16.mxu0 %vm4148_vm1, %v4147_v1  ;;  %3795 = vmatpush3.bf16.msra.mxu0 %v4011_v29 }
 0xe7a   :  { %3796 = vmatprep.subr.bf16.mxu0 %v4147_v1 }
 0xe7d   :  { %3797 = vmatpush3.bf16.msra.mxu0 %v4012_v30 }
 0xe7e   :  { %3802 = vmatprep.subr.bf16.mxu0 %v4147_v1 }
 0xf38   :  { %v1422_v57 = vpop.f32.mrf.mxu0 }
 0xf39   :  { %v1423_v28 = vadd.f32 %v3396_v56, %v1422_v57 }
 0xf3a   :  { %v3772_v58 = vpop.f32.mrf.mxu0 }
 0xf3b   :  { %v1429_v62 = vmax.f32 %v1423_v28, 0.0 }
 0xf3c   :  { %v1425_v59 = vpop.f32.mrf.mxu0 }
 0xf3d   :  { %v1426_v60 = vadd.f32 %v3396_v56, %v1425_v59 }
 0xf3e   :  { %v3773_v61 = vpop.f32.mrf.mxu0 }
 0xf3f   :  { %v1430_v63 = vmax.f32 %v1426_v60, 0.0 }
 0xf41   :  { %v1431_v0 = vpack.c.bf16 %v1430_v63, %v1429_v62 }
 0xf43   :  { %3791 = vmatmul.mubr.bf16.vlgmr.msra.gmra.mxu1 %v1431_v0 }
 0xf44   :  { %3822 = vmatprep.mubr.msk.bf16.mxu1 %vm4148_vm1, %v4147_v1 }
0x1003   :  { %v1537_v3 = vpop.f32.mrf.mxu1 }
0x1004   :  { %v1538_v4 = vadd.f32 %v3400_v2, %v1537_v3 }
0x1005   :  { %v3792_v5 = vpop.f32.mrf.mxu1 }
0x1006   :  { %v1544_v6 = vadd.f32 %v1538_v4, %v1359_v24 }
0x1007   :  { %v1540_v7 = vpop.f32.mrf.mxu1 }
0x1008   :  { %v1541_v8 = vadd.f32 %v3400_v2, %v1540_v7  ;;  %v1548_v9 = vsel %vm168_vm2, %v1544_v6, 0.0 }
0x1009   :  { %1549 = vadd.xlane.f32.xlu1 %v1548_v9  ;;  %v3793_v10 = vpop.f32.mrf.mxu1 }
0x100a   :  { %v1545_v11 = vadd.f32 %v1541_v8, %v1360_v51 }
0x100c   :  { %v1551_v13 = vsel %vm168_vm2, %v1545_v11, 0.0 }
0x100d   :  { %1552 = vadd.xlane.f32.xlu0 %v1551_v13 }
0x1092   :  { %v1550_v14 = vpop.xlane.xlu1 %1549 }
0x1093   :  { %v1554_v16 = vmul.f32 0.03125, %v1550_v14 }
0x1095   :  { %v1556_v19 = vsub.f32 %v1544_v6, %v1554_v16 }
0x1096   :  { %v1553_v20 = vpop.xlane.xlu0 %1552 }
0x1097   :  { %v1555_v21 = vmul.f32 0.03125, %v1553_v20  ;;  %v1558_v22 = vmul.f32 %v1556_v19, %v1556_v19 }
0x1099   :  { %v1557_v23 = vsub.f32 %v1545_v11, %v1555_v21  ;;  %v1560_v25 = vsel %vm168_vm2, %v1558_v22, 0.0 }
0x109a   :  { %1561 = vadd.xlane.f32.xlu1 %v1560_v25 }
0x109b   :  { %v1559_v26 = vmul.f32 %v1557_v23, %v1557_v23 }
0x109d   :  { %v1563_v27 = vsel %vm168_vm2, %v1559_v26, 0.0 }
0x109e   :  { %1564 = vadd.xlane.f32.xlu0 %v1563_v27 }
0x1123   :  { %v1562_v31 = vpop.xlane.xlu1 %1561 }
0x1124   :  { %v1566_v17 = vmul.f32 0.03125, %v1562_v31 }
0x1126   :  { %v1568_v33 = vadd.f32 1e-05, %v1566_v17 }
0x1127   :  { %v1565_v18 = vpop.xlane.xlu0 %1564 }
0x1128   :  { %4065 = vrsqrt.f32 %v1568_v33  ;;  %v1567_v35 = vmul.f32 0.03125, %v1565_v18 }
0x112a   :  { %v1569_v36 = vadd.f32 1e-05, %v1567_v35 }
0x112c   :  { %4067 = vrsqrt.f32 %v1569_v36 }
0x1135   :  { %v4066_v37 = vpop.eup %4065 }
0x1136   :  { %v1572_v38 = vmul.f32 %v4066_v37, %v1556_v19 }
0x1138   :  { %v1580_v42 = vmul.f32 %v3409_v39, %v1572_v38 }
0x1139   :  { %v4068_v40 = vpop.eup %4067 }
0x113a   :  { %v1573_v41 = vmul.f32 %v4068_v40, %v1557_v23  ;;  %v4600_v45 = vadd.f32 %v3410_v43, %v1580_v42 }
0x113c   :  { %v1581_v44 = vmul.f32 %v3409_v39, %v1573_v41 }
0x113e   :  { %v4602_v12 = vadd.f32 %v3410_v43, %v1581_v44 }
0x1140   :  { %v1590_v32 = vpack.c.bf16 %v4602_v12, %v4600_v45 }
0x1142   :  { %3799 = vmatmul.mubr.msk.bf16.vlgmr.msra.gmra.mxu0 %vm168_vm2, %v1590_v32 }
0x1143   :  { %3804 = vmatprep.mubr.msk.bf16.mxu0 %vm4148_vm1, %v4147_v1 }
0x1202   :  { %v1653_v15 = vpop.f32.mrf.mxu0 }
0x1203   :  { %v1654_v34 = vadd.f32 %v3416_v46, %v1653_v15 }
0x1204   :  { %v3800_v47 = vpop.f32.mrf.mxu0 }
0x1205   :  { %v4612_v48 = vpack.c.bf16 %v1654_v34, %v1654_v34 }
0x1206   :  { %v1656_v49 = vpop.f32.mrf.mxu0 }
0x1207   :  { %v1657_v50 = vadd.f32 %v3416_v46, %v1656_v49  ;;  %1671 = vrot.lane.b32.xlu1 %v4612_v48, %s4149_s0 }
0x1208   :  { %v3801_v24 = vpop.f32.mrf.mxu0 }
0x1209   :  { %v4616_v51 = vpack.c.bf16 %v1657_v50, %v1657_v50 }
0x120b   :  { %1719 = vrot.lane.b32.xlu0 %v4616_v51, %s4149_s0  ;;  %s4985_s0 = smov 112  }
0x1279   :  { %v1672_v52 = vpop.permute.xlu1 %1671 }
0x127a   :  { %v1677_v53 = vsel %vm225_vm3, %v1672_v52, 0 }
0x127b   :  { %3803 = vmatpush3.bf16.xpose.msra.mxu0 %v1677_v53 }
0x127c   :  { %3808 = vmatprep.subr.bf16.mxu0 %v4147_v1 }
0x127d   :  { %v1720_v54 = vpop.permute.xlu0 %1719 }
0x127e   :  { %v1725_v55 = vsel %vm225_vm3, %v1720_v54, 0 }
0x1282   :  { %3805 = vmatmul.mubr.msk.bf16.vlgmr.msra.gmra.mxu0 %vm225_vm3, %v4612_v48 }
0x1283   :  { %3809 = vmatpush3.bf16.xpose.msra.mxu0 %v1725_v55  ;;  %3810 = vmatprep.mubr.msk.bf16.mxu0 %vm4148_vm1, %v4147_v1 }
0x1284   :  { %3814 = vmatprep.subr.bf16.mxu0 %v4147_v1 }
0x128a   :  { %3811 = vmatmul.mubr.msk.bf16.vlgmr.msra.gmra.mxu0 %vm225_vm3, %v4616_v51 }
0x128b   :  { %3816 = vmatprep.mubr.msk.bf16.mxu0 %vm4148_vm1, %v4147_v1 }
0x1342   :  { %v1713_v56 = vpop.f32.mrf.mxu0 }
0x1343   :  { %v1767_v57 = vmul.f32 0.35355338, %v1713_v56 }
0x1344   :  { %v3806_v58 = vpop.f32.mrf.mxu0 }
0x1345   :  { %v1769_v28 = vsel %vm225_vm3, %v1767_v57, -inf }
0x1346   :  { %1770 = vmax.xlane.f32.xlu1 %v1769_v28  ;;  %v1716_v59 = vpop.f32.mrf.mxu0 }
0x1348   :  { %v3807_v60 = vpop.f32.mrf.mxu0 }
0x134a   :  { %v1761_v61 = vpop.f32.mrf.mxu0 }
0x134b   :  { %v1768_v62 = vmul.f32 0.35355338, %v1761_v61 }
0x134c   :  { %v3812_v63 = vpop.f32.mrf.mxu0 }
0x134d   :  { %v1772_v0 = vsel %vm225_vm3, %v1768_v62, -inf }
0x134e   :  { %1773 = vmax.xlane.f32.xlu0 %v1772_v0  ;;  %v1764_v2 = vpop.f32.mrf.mxu0 }
0x1350   :  { %v3813_v3 = vpop.f32.mrf.mxu0 }
0x1357   :  { %1793 = vrot.lane.b32.xlu1 %v4612_v48, %s4150_s4 }
0x13cf   :  { %v1771_v4 = vpop.xlane.xlu1 %1770 }
0x13d0   :  { %v1775_v5 = vsub.f32 %v1767_v57, %v1771_v4 }
0x13d2   :  { %v1777_v6 = vmul.f32 1.442695, %v1775_v5 }
0x13d3   :  { %v1794_v7 = vpop.permute.xlu1 %1793 }
0x13d4   :  { %4069 = vpow2.f32 %v1777_v6  ;;  %v1799_v8 = vsel %vm351_vm4, %v1794_v7, 0 }
0x13d5   :  { %3815 = vmatpush3.bf16.msra.mxu0 %v1799_v8 }
0x13d6   :  { %3826 = vmatprep.subr.bf16.mxu0 %v4147_v1 }
0x13d7   :  { %v1774_v9 = vpop.xlane.xlu0 %1773 }
0x13d8   :  { %v1776_v10 = vsub.f32 %v1768_v62, %v1774_v9 }
0x13da   :  { %v1779_v11 = vmul.f32 1.442695, %v1776_v10 }
0x13dc   :  { %4071 = vpow2.f32 %v1779_v11 }
0x13e1   :  { %v4070_v13 = vpop.eup %4069 }
0x13e2   :  { %v1781_v14 = vsel %vm225_vm3, %v4070_v13, 0.0 }
0x13e3   :  { %1782 = vadd.xlane.f32.xlu1 %v1781_v14 }
0x13e9   :  { %v4072_v16 = vpop.eup %4071 }
0x13ea   :  { %v1784_v19 = vsel %vm225_vm3, %v4072_v16, 0.0 }
0x13eb   :  { %1785 = vadd.xlane.f32.xlu0 %v1784_v19 }
0x13f4   :  { %1892 = vrot.lane.b32.xlu1 %v4612_v48, %s4151_s30 }
0x13f8   :  { %1942 = vrot.lane.b32.xlu1 %v4616_v51, %s4151_s30 }
0x13fc   :  { %1940 = vrot.lane.b32.xlu1 %v4616_v51, %s4152_s22 }
0x1401   :  { %1841 = vrot.lane.b32.xlu0 %v4616_v51, %s4150_s4 }
0x1405   :  { %1890 = vrot.lane.b32.xlu0 %v4612_v48, %s4152_s22  ;;  %s4162_s22 = smov [#allocation2]  }
0x146c   :  { %v1783_v20 = vpop.xlane.xlu1 %1782 }
0x146d   :  { %4073 = vrcp.f32 %v1783_v20 }
0x1470   :  { %v1893_v27 = vpop.permute.xlu1 %1892 }
0x1471   :  { %v1898_v30 = vsel %vm225_vm3, %v1893_v27, 0  ;;  %v3421_v27 = vld [vmem:[%s4941_s6 + $0x14] sm:$0xf] }
0x1474   :  { %v1786_v21 = vpop.xlane.xlu0 %1785  ;;  %v1943_v33 = vpop.permute.xlu1 %1942 }
0x1475   :  { %4075 = vrcp.f32 %v1786_v21  ;;  %v1948_v36 = vsel %vm225_vm3, %v1943_v33, 0 }
0x1478   :  { %v1842_v22 = vpop.permute.xlu0 %1841  ;;  %v1941_v37 = vpop.permute.xlu1 %1940 }
0x1479   :  { %v1847_v23 = vsel %vm351_vm4, %v1842_v22, 0 }
0x147a   :  { %v4074_v25 = vpop.eup %4073  ;;  %3821 = vmatpush3.bf16.msra.mxu1 %v1847_v23 }
0x147b   :  { %v1788_v26 = vmul.f32 %v4074_v25, %v4070_v13  ;;  %3832 = vmatprep.subr.bf16.mxu1 %v4147_v1 }
0x147c   :  { %v1891_v35 = vpop.permute.xlu0 %1890 }
0x147d   :  { %v1791_v29 = vpack.c.bf16 %v1788_v26, %v1788_v26 }
0x147f   :  { %3817 = vmatmul.mubr.msk.bf16.vlgmr.msra.gmra.mxu0 %vm225_vm3, %v1791_v29  ;;  %v2117_v29 = vsel %vm351_vm4, %v3421_v27, 0 }
0x1480   :  { %3827 = vmatpush3.bf16.xpose.msra.mxu0 %v1898_v30  ;;  %3828 = vmatprep.mubr.msk.bf16.mxu0 %vm4148_vm1, %v4147_v1 }
0x1481   :  { %3838 = vmatprep.subr.bf16.mxu0 %v4147_v1 }
0x1482   :  { %v4076_v31 = vpop.eup %4075 }
0x1483   :  { %v1790_v17 = vmul.f32 %v4076_v31, %v4072_v16  ;;  %v3420_v16 = vld [vmem:[%s4941_s6 + $0x10] sm:$0xf] }
0x1484   :  { %v2164_v21 = vsel %vm351_vm4, %v3420_v16, 0 }
0x1485   :  { %v1792_v18 = vpack.c.bf16 %v1790_v17, %v1790_v17 }
0x1487   :  { %3823 = vmatmul.mubr.msk.bf16.vlgmr.msra.gmra.mxu1 %vm225_vm3, %v1792_v18  ;;  %3829 = vmatmul.mubr.msk.bf16.vlgmr.msra.gmra.mxu0 %vm225_vm3, %v1891_v35 }
0x1488   :  { %3833 = vmatpush3.bf16.xpose.msra.mxu1 %v1948_v36  ;;  %3834 = vmatprep.mubr.msk.bf16.mxu1 %vm4148_vm1, %v4147_v1 }
0x1489   :  { %3844 = vmatprep.subr.bf16.mxu1 %v4147_v1  ;;  %3840 = vmatprep.mubr.msk.bf16.mxu0 %vm4148_vm1, %v4147_v1 }
0x148f   :  { %3835 = vmatmul.mubr.msk.bf16.vlgmr.msra.gmra.mxu1 %vm225_vm3, %v1941_v37 }
0x1490   :  { %3846 = vmatprep.mubr.msk.bf16.mxu1 %vm4148_vm1, %v4147_v1 }
0x153f   :  { %v4668_v38 = vpop.f32.mrf.mxu0 }
0x1541   :  { %v3818_v39 = vpop.f32.mrf.mxu0 }
0x1543   :  { %v1838_v40 = vpop.f32.mrf.mxu0 }
0x1545   :  { %v3819_v41 = vpop.f32.mrf.mxu0 }
0x1547   :  { %v4670_v42 = vpop.f32.mrf.mxu1  ;;  %v1934_v43 = vpop.f32.mrf.mxu0 }
0x1548   :  { %v1889_v44 = vpack.c.bf16 %v4670_v42, %v4668_v38  ;;  %v1990_v32 = vmul.f32 0.35355338, %v1934_v43 }
0x1549   :  { %v3824_v46 = vpop.f32.mrf.mxu1  ;;  %v3830_v15 = vpop.f32.mrf.mxu0 }
0x154a   :  { %v1992_v34 = vsel %vm225_vm3, %v1990_v32, -inf }
0x154b   :  { %v1886_v47 = vpop.f32.mrf.mxu1  ;;  %1993 = vmax.xlane.f32.xlu0 %v1992_v34  ;;  %v1937_v49 = vpop.f32.mrf.mxu0 }
0x154d   :  { %v3825_v50 = vpop.f32.mrf.mxu1  ;;  %v3831_v24 = vpop.f32.mrf.mxu0 }
0x154f   :  { %v1984_v52 = vpop.f32.mrf.mxu1 }
0x1550   :  { %v1991_v53 = vmul.f32 0.35355338, %v1984_v52 }
0x1551   :  { %v3836_v54 = vpop.f32.mrf.mxu1 }
0x1552   :  { %v1995_v55 = vsel %vm225_vm3, %v1991_v53, -inf }
0x1553   :  { %1996 = vmax.xlane.f32.xlu1 %v1995_v55  ;;  %v1987_v56 = vpop.f32.mrf.mxu1 }
0x1555   :  { %v3837_v57 = vpop.f32.mrf.mxu1 }
0x1564   :  { %2016 = vrot.lane.b32.xlu1 %v4612_v48, %s4153_s23 }
0x1568   :  { %2209 = vrot.lane.b32.xlu1 %v4612_v48, %s4984_s29 }
0x156c   :  { %2259 = vrot.lane.b32.xlu1 %v4616_v51, %s4984_s29 }
0x1570   :  { %2257 = vrot.lane.b32.xlu1 %v4616_v51, %s4985_s0 }
0x15d4   :  { %v1994_v58 = vpop.xlane.xlu0 %1993 }
0x15d5   :  { %v1998_v28 = vsub.f32 %v1990_v32, %v1994_v58 }
0x15d7   :  { %v2000_v59 = vmul.f32 1.442695, %v1998_v28 }
0x15d9   :  { %4077 = vpow2.f32 %v2000_v59 }
0x15dc   :  { %v1997_v60 = vpop.xlane.xlu1 %1996 }
0x15dd   :  { %v1999_v61 = vsub.f32 %v1991_v53, %v1997_v60 }
0x15df   :  { %v2002_v62 = vmul.f32 1.442695, %v1999_v61 }
0x15e0   :  { %v2017_v63 = vpop.permute.xlu1 %2016 }
0x15e1   :  { %4079 = vpow2.f32 %v2002_v62  ;;  %v2022_v0 = vsel %vm351_vm4, %v2017_v63, 0 }
0x15e2   :  { %3839 = vmatpush3.bf16.msra.mxu0 %v2022_v0 }
0x15e3   :  { %3850 = vmatprep.subr.bf16.mxu0 %v4147_v1 }
0x15e4   :  { %v2210_v22 = vpop.permute.xlu1 %2209 }
0x15e5   :  { %v2215_v37 = vsel %vm225_vm3, %v2210_v22, 0 }
0x15e6   :  { %v4078_v2 = vpop.eup %4077 }
0x15e7   :  { %v2004_v3 = vsel %vm225_vm3, %v4078_v2, 0.0 }
0x15e8   :  { %2005 = vadd.xlane.f32.xlu0 %v2004_v3  ;;  %v2260_v23 = vpop.permute.xlu1 %2259 }
0x15e9   :  { %v2265_v25 = vsel %vm225_vm3, %v2260_v23, 0 }
0x15ec   :  { %v2258_v26 = vpop.permute.xlu1 %2257 }
0x15ee   :  { %v4080_v4 = vpop.eup %4079 }
0x15ef   :  { %v2007_v5 = vsel %vm225_vm3, %v4080_v4, 0.0 }
0x15f0   :  { %2008 = vadd.xlane.f32.xlu0 %v2007_v5 }
0x1606   :  { %2064 = vrot.lane.b32.xlu0 %v4616_v51, %s4153_s23 }
0x160a   :  { %2207 = vrot.lane.b32.xlu0 %v4612_v48, %s4985_s0 }
0x1671   :  { %v2006_v6 = vpop.xlane.xlu0 %2005 }
0x1672   :  { %4081 = vrcp.f32 %v2006_v6 }
0x1679   :  { %v2009_v7 = vpop.xlane.xlu0 %2008 }
0x167a   :  { %4083 = vrcp.f32 %v2009_v7 }
0x167d   :  { %v2065_v8 = vpop.permute.xlu0 %2064 }
0x167e   :  { %v2070_v9 = vsel %vm351_vm4, %v2065_v8, 0 }
0x167f   :  { %v4082_v10 = vpop.eup %4081  ;;  %3845 = vmatpush3.bf16.msra.mxu1 %v2070_v9 }
0x1680   :  { %v2011_v11 = vmul.f32 %v4082_v10, %v4078_v2  ;;  %3856 = vmatprep.subr.bf16.mxu1 %v4147_v1 }
0x1681   :  { %v2208_v41 = vpop.permute.xlu0 %2207 }
0x1682   :  { %v2014_v13 = vpack.c.bf16 %v2011_v11, %v2011_v11 }
0x1684   :  { %3841 = vmatmul.mubr.msk.bf16.vlgmr.msra.gmra.mxu0 %vm225_vm3, %v2014_v13 }
0x1685   :  { %3852 = vmatprep.mubr.msk.bf16.mxu0 %vm4148_vm1, %v4147_v1  ;;  %3851 = vmatpush3.bf16.msra.mxu0 %v2117_v29 }
0x1686   :  { %3862 = vmatprep.subr.bf16.mxu0 %v4147_v1 }
0x1687   :  { %v4084_v14 = vpop.eup %4083 }
0x1688   :  { %v2013_v19 = vmul.f32 %v4084_v14, %v4080_v4 }
0x168a   :  { %v2015_v20 = vpack.c.bf16 %v2013_v19, %v2013_v19 }
0x168c   :  { %3847 = vmatmul.mubr.msk.bf16.vlgmr.msra.gmra.mxu1 %vm225_vm3, %v2015_v20 }
0x168d   :  { %3857 = vmatpush3.bf16.msra.mxu1 %v2164_v21  ;;  %3858 = vmatprep.mubr.msk.bf16.mxu1 %vm4148_vm1, %v4147_v1 }
0x168e   :  { %3868 = vmatprep.subr.bf16.mxu1 %v4147_v1 }
0x1694   :  { %3859 = vmatmul.mubr.msk.bf16.vlgmr.msra.gmra.mxu1 %vm225_vm3, %v1889_v44 }
0x1695   :  { %3869 = vmatpush3.bf16.xpose.msra.mxu1 %v2265_v25  ;;  %3870 = vmatprep.mubr.msk.bf16.mxu1 %vm4148_vm1, %v4147_v1 }
0x1696   :  { %3880 = vmatprep.subr.bf16.mxu1 %v4147_v1 }
0x169c   :  { %3871 = vmatmul.mubr.msk.bf16.vlgmr.msra.gmra.mxu1 %vm225_vm3, %v2258_v26  ;;  %v3422_v26 = vld [vmem:[%s4941_s6 + $0x18] sm:$0xf] }
0x169d   :  { %3882 = vmatprep.mubr.msk.bf16.mxu1 %vm4148_vm1, %v4147_v1  ;;  %v2434_v27 = vsel %vm351_vm4, %v3422_v26, 0 }
0x1744   :  { %v2058_v30 = vpop.f32.mrf.mxu0 }
0x1746   :  { %v3842_v31 = vpop.f32.mrf.mxu0 }
0x1748   :  { %v2061_v17 = vpop.f32.mrf.mxu0 }
0x174a   :  { %v3843_v33 = vpop.f32.mrf.mxu0 }
0x174c   :  { %v2106_v18 = vpop.f32.mrf.mxu1 }
0x174d   :  { %v2112_v35 = vpack.c.bf16 %v2106_v18, %v2058_v30 }
0x174e   :  { %v3848_v36 = vpop.f32.mrf.mxu1 }
0x174f   :  { %3853 = vmatmul.mubr.msk.bf16.vlgmr.msra.gmra.mxu0 %vm225_vm3, %v2112_v35 }
0x1750   :  { %3863 = vmatpush3.bf16.xpose.msra.mxu0 %v2215_v37  ;;  %v2109_v38 = vpop.f32.mrf.mxu1  ;;  %3864 = vmatprep.mubr.msk.bf16.mxu0 %vm4148_vm1, %v4147_v1 }
0x1751   :  { %3874 = vmatprep.subr.bf16.mxu0 %v4147_v1 }
0x1752   :  { %v3849_v39 = vpop.f32.mrf.mxu1 }
0x1754   :  { %v4726_v40 = vpop.f32.mrf.mxu1 }
0x1756   :  { %v3860_v42 = vpop.f32.mrf.mxu1 }
0x1757   :  { %3865 = vmatmul.mubr.msk.bf16.vlgmr.msra.gmra.mxu0 %vm225_vm3, %v2208_v41 }
0x1758   :  { %v4729_v43 = vpop.f32.mrf.mxu1  ;;  %3876 = vmatprep.mubr.msk.bf16.mxu0 %vm4148_vm1, %v4147_v1 }
0x175a   :  { %v3861_v44 = vpop.f32.mrf.mxu1 }
0x175c   :  { %v2301_v32 = vpop.f32.mrf.mxu1 }
0x175d   :  { %v2308_v46 = vmul.f32 0.35355338, %v2301_v32 }
0x175e   :  { %v3872_v15 = vpop.f32.mrf.mxu1 }
0x175f   :  { %v2312_v34 = vsel %vm225_vm3, %v2308_v46, -inf }
0x1760   :  { %2313 = vmax.xlane.f32.xlu1 %v2312_v34  ;;  %v2304_v47 = vpop.f32.mrf.mxu1 }
0x1762   :  { %v3873_v49 = vpop.f32.mrf.mxu1 }
0x1771   :  { %2333 = vrot.lane.b32.xlu1 %v4612_v48, %s4986_s24 }
0x1775   :  { %2481 = vrot.lane.b32.xlu1 %v4612_v48, %s4987_s28 }
0x1779   :  { %2531 = vrot.lane.b32.xlu1 %v4616_v51, %s4987_s28 }
0x177d   :  { %2529 = vrot.lane.b32.xlu1 %v4616_v51, %s4988_s25 }
0x17e9   :  { %v2314_v50 = vpop.xlane.xlu1 %2313 }
0x17ea   :  { %v2316_v53 = vsub.f32 %v2308_v46, %v2314_v50 }
0x17ec   :  { %v2319_v54 = vmul.f32 1.442695, %v2316_v53 }
0x17ed   :  { %v2334_v24 = vpop.permute.xlu1 %2333 }
0x17ee   :  { %v2339_v52 = vsel %vm351_vm4, %v2334_v24, 0  ;;  %4085 = vpow2.f32 %v2319_v54 }
0x17ef   :  { %3875 = vmatpush3.bf16.msra.mxu0 %v2339_v52 }
0x17f0   :  { %3886 = vmatprep.subr.bf16.mxu0 %v4147_v1 }
0x17f1   :  { %v2482_v16 = vpop.permute.xlu1 %2481 }
0x17f2   :  { %v2487_v20 = vsel %vm225_vm3, %v2482_v16, 0 }
0x17f5   :  { %v2532_v18 = vpop.permute.xlu1 %2531 }
0x17f6   :  { %v2537_v44 = vsel %vm225_vm3, %v2532_v18, 0  ;;  %v3447_v18 = vld [vmem:[%s4942_s7 + $0x1] ss:$0 sm:$0xff] }
0x17f9   :  { %v2530_v34 = vpop.permute.xlu1 %2529 }
0x17fb   :  { %v4086_v62 = vpop.eup %4085 }
0x17fc   :  { %v2324_v2 = vsel %vm225_vm3, %v4086_v62, 0.0 }
0x180f   :  { %v4744_v55 = vpop.f32.mrf.mxu0 }
0x1810   :  { %v2201_v53 = vadd.f32 %v4726_v40, %v4744_v55 }
0x1811   :  { %v3854_v56 = vpop.f32.mrf.mxu0 }
0x1813   :  { %v4746_v57 = vpop.f32.mrf.mxu0 }
0x1815   :  { %v3855_v58 = vpop.f32.mrf.mxu0 }
0x1817   :  { %v2251_v28 = vpop.f32.mrf.mxu0 }
0x1818   :  { %v2307_v59 = vmul.f32 0.35355338, %v2251_v28  ;;  %v2204_v28 = vadd.f32 %v4729_v43, %v4746_v57 }
0x1819   :  { %v3866_v60 = vpop.f32.mrf.mxu0 }
0x181a   :  { %v2309_v61 = vsel %vm225_vm3, %v2307_v59, -inf }
0x181b   :  { %2310 = vmax.xlane.f32.xlu0 %v2309_v61  ;;  %v2254_v63 = vpop.f32.mrf.mxu0 }
0x181d   :  { %v3867_v0 = vpop.f32.mrf.mxu0 }
0x181f   :  { %2325 = vadd.xlane.f32.xlu0 %v2324_v2 }
0x18a4   :  { %v2311_v3 = vpop.xlane.xlu0 %2310 }
0x18a5   :  { %v2315_v4 = vsub.f32 %v2307_v59, %v2311_v3 }
0x18a7   :  { %v2317_v5 = vmul.f32 1.442695, %v2315_v4 }
0x18a8   :  { %v2326_v8 = vpop.xlane.xlu0 %2325 }
0x18a9   :  { %4087 = vpow2.f32 %v2317_v5 }
0x18aa   :  { %4089 = vrcp.f32 %v2326_v8 }
0x18b6   :  { %v4088_v6 = vpop.eup %4087 }
0x18b7   :  { %v2321_v7 = vsel %vm225_vm3, %v4088_v6, 0.0  ;;  %v4090_v9 = vpop.eup %4089 }
0x18b8   :  { %2322 = vadd.xlane.f32.xlu0 %v2321_v7  ;;  %v2330_v11 = vmul.f32 %v4090_v9, %v4086_v62 }
0x18ba   :  { %v2332_v19 = vpack.c.bf16 %v2330_v11, %v2330_v11  ;;  %v3423_v11 = vld [vmem:[%s4941_s6 + $0x1c] sm:$0xf] }
0x18ce   :  { %2381 = vrot.lane.b32.xlu0 %v4616_v51, %s4986_s24 }
0x18d2   :  { %2479 = vrot.lane.b32.xlu0 %v4612_v48, %s4988_s25 }
0x1941   :  { %v2323_v10 = vpop.xlane.xlu0 %2322 }
0x1942   :  { %4091 = vrcp.f32 %v2323_v10 }
0x1945   :  { %v2382_v13 = vpop.permute.xlu0 %2381 }
0x1946   :  { %v2387_v14 = vsel %vm351_vm4, %v2382_v13, 0  ;;  %v2706_v13 = vsel %vm351_vm4, %v3423_v11, 0 }
0x1947   :  { %3881 = vmatpush3.bf16.msra.mxu1 %v2387_v14 }
0x1948   :  { %3892 = vmatprep.subr.bf16.mxu1 %v4147_v1 }
0x1949   :  { %v2480_v23 = vpop.permute.xlu0 %2479 }
0x194a   :  { %3883 = vmatmul.mubr.msk.bf16.vlgmr.msra.gmra.mxu1 %vm225_vm3, %v2332_v19 }
0x194b   :  { %3893 = vmatpush3.bf16.xpose.msra.mxu1 %v2487_v20  ;;  %3894 = vmatprep.mubr.msk.bf16.mxu1 %vm4148_vm1, %v4147_v1 }
0x194c   :  { %3904 = vmatprep.subr.bf16.mxu1 %v4147_v1 }
0x194f   :  { %v4092_v21 = vpop.eup %4091 }
0x1950   :  { %v2328_v22 = vmul.f32 %v4092_v21, %v4088_v6 }
0x1952   :  { %3895 = vmatmul.mubr.msk.bf16.vlgmr.msra.gmra.mxu1 %vm225_vm3, %v2480_v23  ;;  %v2331_v25 = vpack.c.bf16 %v2328_v22, %v2328_v22 }
0x1953   :  { %3906 = vmatprep.mubr.msk.bf16.mxu1 %vm4148_vm1, %v4147_v1 }
0x1954   :  { %3877 = vmatmul.mubr.msk.bf16.vlgmr.msra.gmra.mxu0 %vm225_vm3, %v2331_v25 }
0x1955   :  { %3888 = vmatprep.mubr.msk.bf16.mxu0 %vm4148_vm1, %v4147_v1  ;;  %3887 = vmatpush3.bf16.msra.mxu0 %v2434_v27 }
0x1956   :  { %3898 = vmatprep.subr.bf16.mxu0 %v4147_v1 }
0x1a0a   :  { %v2423_v29 = vpop.f32.mrf.mxu1 }
0x1a0c   :  { %v3884_v30 = vpop.f32.mrf.mxu1 }
0x1a0e   :  { %v2426_v31 = vpop.f32.mrf.mxu1 }
0x1a10   :  { %v3885_v17 = vpop.f32.mrf.mxu1 }
0x1a12   :  { %v2523_v33 = vpop.f32.mrf.mxu1 }
0x1a13   :  { %v2579_v35 = vmul.f32 0.35355338, %v2523_v33 }
0x1a14   :  { %v2375_v36 = vpop.f32.mrf.mxu0  ;;  %v3896_v37 = vpop.f32.mrf.mxu1 }
0x1a15   :  { %v2429_v38 = vpack.c.bf16 %v2423_v29, %v2375_v36  ;;  %v2581_v39 = vsel %vm225_vm3, %v2579_v35, -inf }
0x1a16   :  { %2582 = vmax.xlane.f32.xlu0 %v2581_v39  ;;  %v3878_v41 = vpop.f32.mrf.mxu0  ;;  %v2526_v42 = vpop.f32.mrf.mxu1 }
0x1a17   :  { %3889 = vmatmul.mubr.msk.bf16.vlgmr.msra.gmra.mxu0 %vm225_vm3, %v2429_v38 }
0x1a18   :  { %3899 = vmatpush3.bf16.xpose.msra.mxu0 %v2537_v44  ;;  %v2378_v32 = vpop.f32.mrf.mxu0  ;;  %v3897_v46 = vpop.f32.mrf.mxu1  ;;  %3900 = vmatprep.mubr.msk.bf16.mxu0 %vm4148_vm1, %v4147_v1 }
0x1a19   :  { %3910 = vmatprep.subr.bf16.mxu0 %v4147_v1 }
0x1a1a   :  { %v3879_v15 = vpop.f32.mrf.mxu0 }
0x1a1f   :  { %3901 = vmatmul.mubr.msk.bf16.vlgmr.msra.gmra.mxu0 %vm225_vm3, %v2530_v34 }
0x1a20   :  { %3912 = vmatprep.mubr.msk.bf16.mxu0 %vm4148_vm1, %v4147_v1 }
0x1a9f   :  { %v2583_v47 = vpop.xlane.xlu0 %2582 }
0x1aa0   :  { %v2587_v49 = vsub.f32 %v2579_v35, %v2583_v47 }
0x1aa2   :  { %v2589_v50 = vmul.f32 1.442695, %v2587_v49 }
0x1aa4   :  { %4093 = vpow2.f32 %v2589_v50 }
0x1ab1   :  { %v4094_v24 = vpop.eup %4093 }
0x1ab2   :  { %v2593_v52 = vsel %vm225_vm3, %v4094_v24, 0.0 }
0x1ab3   :  { %2594 = vadd.xlane.f32.xlu0 %v2593_v52 }
0x1ad7   :  { %v2470_v54 = vpop.f32.mrf.mxu0 }
0x1ad8   :  { %v2477_v56 = vadd.f32 %v2470_v54, %v2201_v53 }
0x1ad9   :  { %v3890_v58 = vpop.f32.mrf.mxu0 }
0x1ada   :  { %v4014_v58 = vld [vmem:[%s4945_s10 + $0x10] sm:$0xff]  }
0x1adb   :  { %v2473_v59 = vpop.f32.mrf.mxu0 }
0x1adc   :  { %v2478_v60 = vadd.f32 %v2473_v59, %v2204_v28  ;;  %v4015_v28 = vld [vmem:[%s4947_s12 + $0x78] sm:$0xff]   ;;  %v4016_v59 = vld [vmem:[%s4947_s12 + $0x70] sm:$0xff]  }
0x1add   :  { %v3891_v61 = vpop.f32.mrf.mxu0 }
0x1ade   :  { %v4018_v61 = vld [vmem:[%s4947_s12 + $0x60] sm:$0xff]  }
0x1adf   :  { %v2573_v62 = vpop.f32.mrf.mxu0 }
0x1ae0   :  { %v2580_v63 = vmul.f32 0.35355338, %v2573_v62  ;;  %v4019_v62 = vld [vmem:[%s4947_s12 + $0x58] sm:$0xff]  }
0x1ae1   :  { %v3902_v0 = vpop.f32.mrf.mxu0 }
0x1ae2   :  { %v2584_v2 = vsel %vm225_vm3, %v2580_v63, -inf }
0x1ae3   :  { %2585 = vmax.xlane.f32.xlu1 %v2584_v2  ;;  %v2576_v3 = vpop.f32.mrf.mxu0 }
0x1ae5   :  { %v3903_v4 = vpop.f32.mrf.mxu0 }
0x1af4   :  { %2605 = vrot.lane.b32.xlu1 %v4612_v48, %s4989_s27 }
0x1b3c   :  { %v2595_v40 = vpop.xlane.xlu0 %2594 }
0x1b3d   :  { %4095 = vrcp.f32 %v2595_v40 }
0x1b4a   :  { %v4096_v55 = vpop.eup %4095 }
0x1b4b   :  { %v2600_v57 = vmul.f32 %v4096_v55, %v4094_v24 }
0x1b4d   :  { %v2603_v9 = vpack.c.bf16 %v2600_v57, %v2600_v57 }
0x1b6c   :  { %v2586_v5 = vpop.xlane.xlu1 %2585 }
0x1b6d   :  { %v2588_v6 = vsub.f32 %v2580_v63, %v2586_v5 }
0x1b6f   :  { %v2591_v43 = vmul.f32 1.442695, %v2588_v6  ;;  %v3450_v6 = vld [vmem:[%s4943_s8 + $0x1] ss:$0 sm:$0xff] }
0x1b70   :  { %v2606_v7 = vpop.permute.xlu1 %2605 }
0x1b71   :  { %4097 = vpow2.f32 %v2591_v43  ;;  %v2611_v8 = vsel %vm351_vm4, %v2606_v7, 0 }
0x1b72   :  { %3905 = vmatpush3.bf16.msra.mxu1 %v2611_v8  ;;  %v3451_v8 = vld [vmem:[%s4944_s9 + $0x1] ss:$0 sm:$0xff] }
0x1b73   :  { %3916 = vmatprep.subr.bf16.mxu1 %v4147_v1 }
0x1b75   :  { %3907 = vmatmul.mubr.msk.bf16.vlgmr.msra.gmra.mxu1 %vm225_vm3, %v2603_v9 }
0x1b76   :  { %3918 = vmatprep.mubr.msk.bf16.mxu1 %vm4148_vm1, %v4147_v1  ;;  %3917 = vmatpush3.bf16.msra.mxu1 %v2706_v13  ;;  %v4020_v13 = vld [vmem:[%s4947_s12 + $0x50] sm:$0xff]  }
0x1b77   :  { %3930 = vmatprep.subr.bf16.mxu1 %v4147_v1 }
0x1b7e   :  { %v4098_v48 = vpop.eup %4097 }
0x1b7f   :  { %v2596_v10 = vsel %vm225_vm3, %v4098_v48, 0.0 }
0x1b80   :  { %2597 = vadd.xlane.f32.xlu0 %v2596_v10 }
0x1b96   :  { %2653 = vrot.lane.b32.xlu0 %v4616_v51, %s4989_s27 }
0x1c09   :  { %v2598_v14 = vpop.xlane.xlu0 %2597 }
0x1c0a   :  { %4099 = vrcp.f32 %v2598_v14  ;;  %v4021_v14 = vld [vmem:[%s4947_s12 + $0x48] sm:$0xff]  }
0x1c0d   :  { %v2654_v16 = vpop.permute.xlu0 %2653 }
0x1c0e   :  { %v2659_v19 = vsel %vm351_vm4, %v2654_v16, 0  ;;  %v4022_v16 = vld [vmem:[%s4947_s12 + $0x40] sm:$0xff]  }
0x1c0f   :  { %3911 = vmatpush3.bf16.msra.mxu0 %v2659_v19  ;;  %v3457_v19 = vld [vmem:[%s4946_s11 + $0x1] ss:$0 sm:$0xff] }
0x1c10   :  { %3922 = vmatprep.subr.bf16.mxu0 %v4147_v1 }
0x1c17   :  { %v4100_v20 = vpop.eup %4099 }
0x1c18   :  { %v2602_v21 = vmul.f32 %v4100_v20, %v4098_v48 }
0x1c1a   :  { %v2604_v51 = vpack.c.bf16 %v2602_v21, %v2602_v21 }
0x1c1c   :  { %3913 = vmatmul.mubr.msk.bf16.vlgmr.msra.gmra.mxu0 %vm225_vm3, %v2604_v51 }
0x1c1d   :  { %3926 = vmatprep.mubr.msk.bf16.mxu0 %vm4148_vm1, %v4147_v1 }
0x1c35   :  { %v2647_v22 = vpop.f32.mrf.mxu1 }
0x1c37   :  { %v3908_v23 = vpop.f32.mrf.mxu1 }
0x1c39   :  { %v2650_v25 = vpop.f32.mrf.mxu1 }
0x1c3b   :  { %v3909_v26 = vpop.f32.mrf.mxu1 }
0x1cdc   :  { %v2695_v27 = vpop.f32.mrf.mxu0 }
0x1cdd   :  { %v2701_v29 = vpack.c.bf16 %v2695_v27, %v2647_v22 }
0x1cde   :  { %v3914_v30 = vpop.f32.mrf.mxu0 }
0x1cdf   :  { %3919 = vmatmul.mubr.msk.bf16.vlgmr.msra.gmra.mxu1 %vm225_vm3, %v2701_v29  ;;  %v3478_v30 = vld [vmem:[%s4948_s13 + $0x1] ss:$0 sm:$0xff] }
0x1ce0   :  { %v2698_v31 = vpop.f32.mrf.mxu0  ;;  %3946 = vmatprep.mubr.msk.bf16.mxu1 %vm4148_vm1, %v4147_v1  ;;  %3931 = vmatpush3.bf16.msra.mxu1 %v4015_v28 }
0x1ce1   :  { %3932 = vmatprep.subr.bf16.mxu1 %v4147_v1 }
0x1ce2   :  { %v3915_v17 = vpop.f32.mrf.mxu0 }
0x1ce4   :  { %3933 = vmatpush3.bf16.msra.mxu1 %v4016_v59 }
0x1ce5   :  { %3934 = vmatprep.subr.bf16.mxu1 %v4147_v1 }
0x1d9f   :  { %v2742_v33 = vpop.f32.mrf.mxu1 }
0x1da0   :  { %v2749_v35 = vadd.f32 %v2742_v33, %v2477_v56 }
0x1da1   :  { %v3920_v36 = vpop.f32.mrf.mxu1 }
0x1da2   :  { %v2759_v37 = vadd.f32 %v3447_v18, %v2749_v35 }
0x1da3   :  { %v2745_v38 = vpop.f32.mrf.mxu1 }
0x1da4   :  { %v2750_v39 = vadd.f32 %v2745_v38, %v2478_v60  ;;  %v2761_v41 = vadd.f32 %v2759_v37, %v4600_v45  ;;  %v4017_v60 = vld [vmem:[%s4947_s12 + $0x68] sm:$0xff]  }
0x1da5   :  { %v3921_v42 = vpop.f32.mrf.mxu1  ;;  %3935 = vmatpush3.bf16.msra.mxu1 %v4017_v60 }
0x1da6   :  { %v2760_v44 = vadd.f32 %v3447_v18, %v2750_v39  ;;  %v2767_v32 = vsel %vm168_vm2, %v2761_v41, 0.0  ;;  %3936 = vmatprep.subr.bf16.mxu1 %v4147_v1 }
0x1da7   :  { %2768 = vadd.xlane.f32.xlu1 %v2767_v32 }
0x1da8   :  { %v2762_v46 = vadd.f32 %v2760_v44, %v4602_v12  ;;  %v4013_v12 = vld [vmem:[%s4945_s10 + $0x18] sm:$0xff]  }
0x1da9   :  { %3923 = vmatpush3.bf16.msra.mxu0 %v4013_v12  ;;  %3937 = vmatpush3.bf16.msra.mxu1 %v4018_v61  ;;  %v3489_v61 = vld [vmem:[%s4949_s14 + $0x1] ss:$0 sm:$0xff] }
0x1daa   :  { %v2770_v15 = vsel %vm168_vm2, %v2762_v46, 0.0  ;;  %3924 = vmatprep.subr.bf16.mxu0 %v4147_v1  ;;  %3938 = vmatprep.subr.bf16.mxu1 %v4147_v1 }
0x1dab   :  { %2771 = vadd.xlane.f32.xlu0 %v2770_v15 }
0x1dad   :  { %3925 = vmatpush3.bf16.msra.mxu0 %v4014_v58  ;;  %3939 = vmatpush3.bf16.msra.mxu1 %v4019_v62 }
0x1dae   :  { %3950 = vmatprep.subr.bf16.mxu0 %v4147_v1  ;;  %3940 = vmatprep.subr.bf16.mxu1 %v4147_v1 }
0x1db1   :  { %3941 = vmatpush3.bf16.msra.mxu1 %v4020_v13 }
0x1db2   :  { %3942 = vmatprep.subr.bf16.mxu1 %v4147_v1 }
0x1db5   :  { %3943 = vmatpush3.bf16.msra.mxu1 %v4021_v14 }
0x1db6   :  { %3944 = vmatprep.subr.bf16.mxu1 %v4147_v1 }
0x1db9   :  { %3945 = vmatpush3.bf16.msra.mxu1 %v4022_v16 }
0x1e30   :  { %v2769_v34 = vpop.xlane.xlu1 %2768 }
0x1e31   :  { %v2773_v47 = vmul.f32 0.03125, %v2769_v34 }
0x1e33   :  { %v2775_v49 = vsub.f32 %v2761_v41, %v2773_v47 }
0x1e34   :  { %v2772_v50 = vpop.xlane.xlu0 %2771 }
0x1e35   :  { %v2774_v24 = vmul.f32 0.03125, %v2772_v50  ;;  %v2777_v52 = vmul.f32 %v2775_v49, %v2775_v49 }
0x1e37   :  { %v2776_v53 = vsub.f32 %v2762_v46, %v2774_v24  ;;  %v2779_v54 = vsel %vm168_vm2, %v2777_v52, 0.0  ;;  %v4023_v52 = vld [vmem:[%s4951_s16 + $0x8] sm:$0xff]  }
0x1e38   :  { %2780 = vadd.xlane.f32.xlu1 %v2779_v54 }
0x1e39   :  { %v2778_v45 = vmul.f32 %v2776_v53, %v2776_v53 }
0x1e3b   :  { %v2782_v56 = vsel %vm168_vm2, %v2778_v45, 0.0 }
0x1e3c   :  { %2783 = vadd.xlane.f32.xlu0 %v2782_v56 }
0x1ec1   :  { %v2781_v63 = vpop.xlane.xlu1 %2780 }
0x1ec2   :  { %v2785_v0 = vmul.f32 0.03125, %v2781_v63 }
0x1ec4   :  { %v2787_v2 = vadd.f32 1e-05, %v2785_v0 }
0x1ec5   :  { %v2784_v3 = vpop.xlane.xlu0 %2783 }
0x1ec6   :  { %4101 = vrsqrt.f32 %v2787_v2  ;;  %v2786_v4 = vmul.f32 0.03125, %v2784_v3  ;;  %v3490_v2 = vld [vmem:[%s4950_s15 + $0x1] ss:$0 sm:$0xff] }
0x1ec8   :  { %v2788_v40 = vadd.f32 1e-05, %v2786_v4 }
0x1eca   :  { %4103 = vrsqrt.f32 %v2788_v40 }
0x1ed3   :  { %v4102_v55 = vpop.eup %4101 }
0x1ed4   :  { %v2791_v5 = vmul.f32 %v4102_v55, %v2775_v49  ;;  %v4025_v55 = vld [vmem:[%s4952_s17 + $0x8] sm:$0xff]  }
0x1ed6   :  { %v2799_v7 = vmul.f32 %v3450_v6, %v2791_v5 }
0x1ed7   :  { %v4104_v43 = vpop.eup %4103 }
0x1ed8   :  { %v2792_v57 = vmul.f32 %v4104_v43, %v2776_v53  ;;  %v2807_v48 = vadd.f32 %v3451_v8, %v2799_v7  ;;  %v4024_v53 = vld [vmem:[%s4951_s16] sm:$0xff]   ;;  %v4160_v43 = vmov 0  }
0x1eda   :  { %v2800_v9 = vmul.f32 %v3450_v6, %v2792_v57  ;;  %v4026_v6 = vld [vmem:[%s4952_s17] sm:$0xff]  }
0x1edc   :  { %v2808_v10 = vadd.f32 %v3451_v8, %v2800_v9  ;;  %v3491_v8 = vld [vmem:[%s4953_s18] ss:$0 sm:$0xff]  ;;  %s4161_s18 = smov 32  }
0x1ede   :  { %v2809_v11 = vpack.c.bf16 %v2808_v10, %v2807_v48 }
0x1ee0   :  { %3927 = vmatmul.mubr.msk.bf16.vlgmr.msra.gmra.mxu0 %vm168_vm2, %v2809_v11 }
0x1ee1   :  { %3954 = vmatprep.mubr.msk.bf16.mxu0 %vm4148_vm1, %v4147_v1  ;;  %3951 = vmatpush3.bf16.msra.mxu0 %v4023_v52 }
0x1ee2   :  { %3952 = vmatprep.subr.bf16.mxu0 %v4147_v1 }
0x1ee5   :  { %3953 = vmatpush3.bf16.msra.mxu0 %v4024_v53  ;;  %v4027_v53 = vld [vmem:[%s4954_s19 + $0x8] sm:$0xff]  }
0x1ee6   :  { %3958 = vmatprep.subr.bf16.mxu0 %v4147_v1 }
0x1fa0   :  { %v2872_v20 = vpop.f32.mrf.mxu0 }
0x1fa1   :  { %v2873_v51 = vadd.f32 %v3457_v19, %v2872_v20 }
0x1fa2   :  { %v3928_v21 = vpop.f32.mrf.mxu0 }
0x1fa3   :  { %v2879_v26 = vmax.f32 %v2873_v51, 0.0 }
0x1fa4   :  { %v2875_v22 = vpop.f32.mrf.mxu0 }
0x1fa5   :  { %v2876_v23 = vadd.f32 %v3457_v19, %v2875_v22 }
0x1fa6   :  { %v3929_v25 = vpop.f32.mrf.mxu0 }
0x1fa7   :  { %v2880_v27 = vmax.f32 %v2876_v23, 0.0 }
0x1fa9   :  { %v2881_v29 = vpack.c.bf16 %v2880_v27, %v2879_v26 }
0x1fab   :  { %3947 = vmatmul.mubr.bf16.vlgmr.msra.gmra.mxu1 %v2881_v29 }
0x206b   :  { %v2989_v31 = vpop.f32.mrf.mxu1 }
0x206c   :  { %v2990_v17 = vadd.f32 %v3478_v30, %v2989_v31 }
0x206d   :  { %v3948_v33 = vpop.f32.mrf.mxu1 }
0x206e   :  { %v2996_v18 = vadd.f32 %v2990_v17, %v2807_v48 }
0x206f   :  { %v2992_v35 = vpop.f32.mrf.mxu1 }
0x2070   :  { %v2993_v36 = vadd.f32 %v3478_v30, %v2992_v35  ;;  %v3002_v37 = vsel %vm168_vm2, %v2996_v18, 0.0 }
0x2071   :  { %3003 = vadd.xlane.f32.xlu1 %v3002_v37  ;;  %v3949_v38 = vpop.f32.mrf.mxu1 }
0x2072   :  { %v2997_v39 = vadd.f32 %v2993_v36, %v2808_v10 }
0x2074   :  { %v3005_v41 = vsel %vm168_vm2, %v2997_v39, 0.0 }
0x2075   :  { %3006 = vadd.xlane.f32.xlu0 %v3005_v41 }
0x20fa   :  { %v3004_v42 = vpop.xlane.xlu1 %3003 }
0x20fb   :  { %v3008_v44 = vmul.f32 0.03125, %v3004_v42 }
0x20fd   :  { %v3010_v32 = vsub.f32 %v2996_v18, %v3008_v44 }
0x20fe   :  { %v3007_v46 = vpop.xlane.xlu0 %3006 }
0x20ff   :  { %v3009_v15 = vmul.f32 0.03125, %v3007_v46  ;;  %v3012_v34 = vmul.f32 %v3010_v32, %v3010_v32 }
0x2101   :  { %v3011_v47 = vsub.f32 %v2997_v39, %v3009_v15  ;;  %v3014_v49 = vsel %vm168_vm2, %v3012_v34, 0.0 }
0x2102   :  { %3015 = vadd.xlane.f32.xlu1 %v3014_v49 }
0x2103   :  { %v3013_v50 = vmul.f32 %v3011_v47, %v3011_v47 }
0x2105   :  { %v3017_v24 = vsel %vm168_vm2, %v3013_v50, 0.0 }
0x2106   :  { %3018 = vadd.xlane.f32.xlu0 %v3017_v24 }
0x218b   :  { %v3016_v54 = vpop.xlane.xlu1 %3015 }
0x218c   :  { %v3020_v45 = vmul.f32 0.03125, %v3016_v54  ;;  %v4028_v54 = vld [vmem:[%s4954_s19] sm:$0xff]  }
0x218e   :  { %v3022_v56 = vadd.f32 1e-05, %v3020_v45 }
0x218f   :  { %v3019_v12 = vpop.xlane.xlu0 %3018 }
0x2190   :  { %4105 = vrsqrt.f32 %v3022_v56  ;;  %v3021_v58 = vmul.f32 0.03125, %v3019_v12 }
0x2192   :  { %v3023_v28 = vadd.f32 1e-05, %v3021_v58 }
0x2194   :  { %4107 = vrsqrt.f32 %v3023_v28 }
0x219d   :  { %v4106_v59 = vpop.eup %4105 }
0x219e   :  { %v3026_v60 = vmul.f32 %v4106_v59, %v3010_v32 }
0x21a0   :  { %v3034_v0 = vmul.f32 %v3489_v61, %v3026_v60 }
0x21a1   :  { %v4108_v62 = vpop.eup %4107 }
0x21a2   :  { %v3027_v63 = vmul.f32 %v4108_v62, %v3011_v47  ;;  %v3042_v4 = vadd.f32 %v3490_v2, %v3034_v0 }
0x21a4   :  { %v3035_v3 = vmul.f32 %v3489_v61, %v3027_v63 }
0x21a6   :  { %v3043_v40 = vadd.f32 %v3490_v2, %v3035_v3 }
0x21a8   :  { %v3053_v5 = vpack.c.bf16 %v3043_v40, %v3042_v4 }
0x21aa   :  { %3955 = vmatmul.mubr.msk.bf16.vlgmr.msra.gmra.mxu0 %vm168_vm2, %v3053_v5 }
0x21ab   :  { %3959 = vmatpush3.bf16.msra.mxu0 %v4025_v55  ;;  %3962 = vmatprep.mubr.msk.bf16.mxu0 %vm4148_vm1, %v4147_v1 }
0x21ac   :  { %3960 = vmatprep.subr.bf16.mxu0 %v4147_v1 }
0x21af   :  { %3961 = vmatpush3.bf16.msra.mxu0 %v4026_v6 }
0x21b0   :  { %3966 = vmatprep.subr.bf16.mxu0 %v4147_v1 }
0x21b2   :  { %3963 = vmatmul.mubr.bf16.vlgmr.msra.gmra.mxu0 %v4160_v43 }
0x21b3   :  { %3967 = vmatpush3.bf16.msra.mxu0 %v4025_v55  ;;  %3970 = vmatprep.mubr.msk.bf16.mxu0 %vm4148_vm1, %v4147_v1 }
0x21b4   :  { %3968 = vmatprep.subr.bf16.mxu0 %v4147_v1 }
0x21b7   :  { %3969 = vmatpush3.bf16.msra.mxu0 %v4026_v6 }
0x21b8   :  { %3974 = vmatprep.subr.bf16.mxu0 %v4147_v1 }
0x226a   :  { %v3109_v57 = vpop.f32.mrf.mxu0 }
0x226b   :  { %v3110_v11 = vadd.f32 %v3491_v8, %v3109_v57 }
0x226c   :  { %v3956_v7 = vpop.f32.mrf.mxu0 }
0x226e   :  { %v3112_v9 = vpop.f32.mrf.mxu0 }
0x226f   :  { %v3113_v48 = vadd.f32 %v3491_v8, %v3112_v9 }
0x2270   :  { %v3957_v10 = vpop.f32.mrf.mxu0 }
0x2272   :  { %v3165_v13 = vpop.f32.mrf.mxu0 }
0x2273   :  { %v3171_v14 = vadd.f32 %v3165_v13, %v3110_v11 }
0x2274   :  { %v3964_v16 = vpop.f32.mrf.mxu0 }
0x2275   :  { %4109 = vtanh.f32 %v3171_v14  ;;  %v3497_v51 = vmul.f32 -1.442695, %v3171_v14 }
0x2276   :  { %v3168_v19 = vpop.f32.mrf.mxu0 }
0x2277   :  { %4111 = vpow2.f32 %v3497_v51 }
0x2278   :  { %v3965_v20 = vpop.f32.mrf.mxu0 }
0x2282   :  { %v4110_v21 = vpop.eup %4109 }
0x2283   :  { %3181 = vrot.lane.b32.xlu1 %v4110_v21, %s4150_s4 }
0x2284   :  { %v4112_v22 = vpop.eup %4111 }
0x2285   :  { %v3175_v23 = vadd.f32 1.0, %v4112_v22 }
0x2287   :  { %4113 = vrcp.f32 %v3175_v23 }
0x2294   :  { %v4114_v25 = vpop.eup %4113 }
0x2295   :  { %v3179_v29 = vmul.f32 0.0, %v4114_v25 }
0x22f5   :  { %v3182_v26 = vpop.permute.xlu1 %3181 }
0x22f6   :  { %v3184_v27 = vmul.f32 %v4114_v25, %v3182_v26 }
0x22f8   :  { %3186 = vrot.lane.b32.xlu0 %v3184_v27, %s4161_s18 }
0x236a   :  { %v3187_v30 = vpop.permute.xlu0 %3186 }
0x236b   :  { %v3189_v31 = vadd.f32 %v3187_v30, %v3179_v29 }
0x236d   :  { %4115 = vtanh.f32 %v3189_v31 }
0x237a   :  { %v4116_v17 = vpop.eup %4115 }
0x237b   :  { %3192 = vrot.lane.b32.xlu1 %v4116_v17, %s4150_s4 }
0x23ed   :  { %v3193_v33 = vpop.permute.xlu1 %3192 }
0x23ee   :  { %v3195_v18 = vmul.f32 %v4114_v25, %v3193_v33 }
0x23f0   :  { %v3196_v35 = vpack.c.bf16 %v3195_v18, %v3195_v18  ;;  %v3269_v58 = vrot.slane %v3195_v18, 7 }
0x23f2   :  { %3198 = vrot.lane.b32.xlu1 %v3196_v35, %s4161_s18 }
0x2464   :  { %v3199_v36 = vpop.permute.xlu1 %3198 }
0x2465   :  { %3971 = vmatmul.mubr.msk.bf16.vlgmr.msra.gmra.mxu0 %vm168_vm2, %v3199_v36 }
0x2466   :  { %3978 = vmatprep.mubr.msk.bf16.mxu0 %vm4148_vm1, %v4147_v1  ;;  %3975 = vmatpush3.bf16.msra.mxu0 %v4027_v53 }
0x2467   :  { %3976 = vmatprep.subr.bf16.mxu0 %v4147_v1  ;;  %v3500_v1 = vld [vmem:[%s4955_s20] ss:$0 sm:$0xff] }
0x246a   :  { %3977 = vmatpush3.bf16.msra.mxu0 %v4028_v54 }
0x2525   :  { %v3237_v37 = vpop.f32.mrf.mxu0 }
0x2526   :  { %v3243_v38 = vadd.f32 %v3237_v37, %v3113_v48 }
0x2527   :  { %v3972_v39 = vpop.f32.mrf.mxu0 }
0x2528   :  { %4117 = vtanh.f32 %v3243_v38  ;;  %v3499_v32 = vmul.f32 -1.442695, %v3243_v38 }
0x2529   :  { %v3240_v41 = vpop.f32.mrf.mxu0 }
0x252a   :  { %4119 = vpow2.f32 %v3499_v32 }
0x252b   :  { %v3973_v42 = vpop.f32.mrf.mxu0 }
0x2535   :  { %v4118_v44 = vpop.eup %4117 }
0x2536   :  { %3253 = vrot.lane.b32.xlu0 %v4118_v44, %s4150_s4 }
0x2537   :  { %v4120_v46 = vpop.eup %4119 }
0x2538   :  { %v3247_v15 = vadd.f32 1.0, %v4120_v46 }
0x253a   :  { %4121 = vrcp.f32 %v3247_v15 }
0x2547   :  { %v4122_v34 = vpop.eup %4121 }
0x2548   :  { %v3251_v50 = vmul.f32 %v4122_v34, %v3189_v31 }
0x25a8   :  { %v3254_v47 = vpop.permute.xlu0 %3253 }
0x25a9   :  { %v3256_v49 = vmul.f32 %v4122_v34, %v3254_v47 }
0x25ab   :  { %3258 = vrot.lane.b32.xlu1 %v3256_v49, %s4161_s18 }
0x261d   :  { %v3259_v24 = vpop.permute.xlu1 %3258 }
0x261e   :  { %v3261_v52 = vadd.f32 %v3259_v24, %v3251_v50 }
0x2620   :  { %4123 = vtanh.f32 %v3261_v52 }
0x262d   :  { %v4124_v45 = vpop.eup %4123 }
0x262e   :  { %3264 = vrot.lane.b32.xlu0 %v4124_v45, %s4150_s4  ;;  %s3355_s4 = sshll.u32 %s4162_s22, 4  ;;  %s3356_s4 = int_to_ptr.vmem [resolvable:$true] %s3355_s4 }
0x262f   :  { %s4125_s9 = scalar_lea.vmem %s3356_s4, 32  ;;  %p4130_p1 = scmp.lt.s32.totalorder %s3356_s4, %s3356_s4 }
0x2630   :  { %p4126_p0 = scmp.ne.s32.totalorder %s3356_s4, %s4125_s9  ;;  %p4131_p2 = scmp.lt.s32.totalorder %s4125_s9, %s4125_s9 }
0x2632   :  { %p4132_p3 = por %p4131_p2, %p4130_p1 }
0x2634   :  { %p4133_p4 = pnand %p4132_p3, %p4126_p0 }
0x26a0   :  { %v3265_v56 = vpop.permute.xlu0 %3264 }
0x26a1   :  { %v3267_v12 = vmul.f32 %v4122_v34, %v3265_v56 }
0x26a3   :  { %v3272_v28 = vrot.slane %v3267_v12, 6 }
0x26a5   :  { %v3275_v59 = vsel %vm3274_vm5, %v3269_v58, %v3272_v28 }
0x26a6   :  { %v3276_v60 = vmul.f32 0.999995, %v3275_v59 }
0x26a8   :  { %v3277_v61 = vpack.c.bf16 %v3276_v60, %v3276_v60 }
0x26aa   :  { %3290 = vrot.lane.b32.xlu1 %v3277_v61, %s4161_s18 }
0x271c   :  { %v3291_v62 = vpop.permute.xlu1 %3290 }
0x271d   :  { %3979 = vmatmul.mubr.msk.bf16.vlgmr.msra.gmra.mxu0 %vm168_vm2, %v3291_v62 }
0x27dd   :  { %v3341_v63 = vpop.f32.mrf.mxu0 }
0x27de   :  { %v3342_v0 = vadd.f32 %v3500_v1, %v3341_v63 }
0x27df   :  { %v3980_v2 = vpop.f32.mrf.mxu0 }
0x27e0   :  { %3348 = vst.msk [vmem:[#allocation2] sm:$0x3] %vm3347_vm6, %v3342_v0 }
0x27e1   :  { %v3344_v3 = vpop.f32.mrf.mxu0 }
0x27e2   :  { %4136 = shalt.err (!%p4133_p4)
}
0x27e3   :  { %3358 = dma.vmem_to_hbm [thread:$0]  %s3356_s4, 32, %s4956_s21, [#allocation3]   ;;  %v3981_v4 = vpop.f32.mrf.mxu0 }
0x27e4   :  { %4145 = dma.done.wait [#allocation3], 32  }
0x27e5   :  { %4146 = vsyncadd [#allocation3], 4294967264 }
0x27e6   :  { %3362 = vsyncpa [#allocation3], 1 }

</bundles_post_ra>
